<compile_context>
chip_gen: v7x
topology: tpu7x:2x2x1
jax: 0.10.0
libtpu: 0.0.40
codegen_flags: <defaults>
</compile_context>

<pallas_src>
import jax
import jax.numpy as jnp
from jax.experimental import pallas as pl
from jax.experimental.pallas import tpu as pltpu

N_FILTERS = 64
N_BLOCKS = 16
BN_EPS = 1e-5
K_PAD = 128      # pad the 65-channel input dim up to a lane-friendly 128
TM_MAX = 2048    # default rows per M-tile (~2 MB of y traffic per grid step)


def _round_up(x, m):
    return (x + m - 1) // m * m


def _row_mask(tm, m_real):
    # 1.0 for real rows, 0.0 for padded rows of the last tile (keeps BN stats exact).
    rows = pl.program_id(0) * tm + jax.lax.broadcasted_iota(jnp.int32, (tm, 1), 0)
    return (rows < m_real).astype(jnp.float32)


# --------------------------------------------------------------------------
# Kernel A: input 1x1 conv (65->64), fused with block-0 BN partial statistics.
# --------------------------------------------------------------------------
def make_conv_in_call(m_pad, tm, mt, m_real):
    need_mask = (m_pad != m_real)

    def kernel(x_ref, w0_ref, b0_ref, w1n_ref, y_ref, st_ref):
        y = jnp.dot(x_ref[...], w0_ref[...],
                    preferred_element_type=jnp.float32) + b0_ref[...]
        y_ref[...] = y
        # next block's matmul-1, only for its BN statistics (y still in vregs)
        h = jnp.dot(y.astype(jnp.bfloat16), w1n_ref[...],
                    preferred_element_type=jnp.float32)
        if need_mask:
            h = h * _row_mask(tm, m_real)
        st_ref[0:1, :] = jnp.sum(h, axis=0, keepdims=True)
        st_ref[1:2, :] = jnp.sum(h * h, axis=0, keepdims=True)

    return pl.pallas_call(
        kernel,
        out_shape=(jax.ShapeDtypeStruct((m_pad, N_FILTERS), jnp.float32),
                   jax.ShapeDtypeStruct((mt, 2, N_FILTERS), jnp.float32)),
        grid=(mt,),
        in_specs=[
            pl.BlockSpec((tm, K_PAD), lambda i: (i, 0)),
            pl.BlockSpec((K_PAD, N_FILTERS), lambda i: (0, 0)),
            pl.BlockSpec((1, N_FILTERS), lambda i: (0, 0)),
            pl.BlockSpec((N_FILTERS, N_FILTERS), lambda i: (0, 0)),
        ],
        out_specs=(pl.BlockSpec((tm, N_FILTERS), lambda i: (i, 0)),
                   pl.BlockSpec((None, 2, N_FILTERS), lambda i: (i, 0, 0))),
        compiler_params=pltpu.CompilerParams(
            dimension_semantics=("parallel",)),
    )


# --------------------------------------------------------------------------
# Kernel B: one residual block (conv1x1 -> folded-BN -> ReLU -> conv1x1 -> +y),
# M-tiled, plus (unless `last`) the NEXT block's BN partial statistics.
# --------------------------------------------------------------------------
def make_block_call(m_pad, tm, mt, m_real, last):
    need_mask = (m_pad != m_real)

    def kernel(*refs):
        if last:
            y_ref, sc_ref, sh_ref, w1_ref, w2_ref, b2_ref, yo_ref = refs
        else:
            (y_ref, sc_ref, sh_ref, w1_ref, w2_ref, b2_ref, w1n_ref,
             yo_ref, st_ref) = refs
        y = y_ref[...]                                                # (TM,64) f32
        h = jnp.dot(y.astype(jnp.bfloat16), w1_ref[...],
                    preferred_element_type=jnp.float32)
        # folded BN (b1 dropped exactly; affine folded to scale/shift) + ReLU
        hr = jnp.maximum(h * sc_ref[...] + sh_ref[...], 0.0)
        ynew = y + jnp.dot(hr.astype(jnp.bfloat16), w2_ref[...],
                           preferred_element_type=jnp.float32) + b2_ref[...]
        yo_ref[...] = ynew
        if not last:
            hn = jnp.dot(ynew.astype(jnp.bfloat16), w1n_ref[...],
                         preferred_element_type=jnp.float32)
            if need_mask:
                hn = hn * _row_mask(tm, m_real)
            st_ref[0:1, :] = jnp.sum(hn, axis=0, keepdims=True)
            st_ref[1:2, :] = jnp.sum(hn * hn, axis=0, keepdims=True)

    def small(shape):
        return pl.BlockSpec(shape, lambda i, _n=len(shape): (0,) * _n)

    in_specs = [
        pl.BlockSpec((tm, N_FILTERS), lambda i: (i, 0)),   # y tile
        small((1, N_FILTERS)),                             # BN scale
        small((1, N_FILTERS)),                             # BN shift
        small((N_FILTERS, N_FILTERS)),                     # w1
        small((N_FILTERS, N_FILTERS)),                     # w2
        small((1, N_FILTERS)),                             # b2
    ]
    out_shape = [jax.ShapeDtypeStruct((m_pad, N_FILTERS), jnp.float32)]
    out_specs = [pl.BlockSpec((tm, N_FILTERS), lambda i: (i, 0))]
    if not last:
        in_specs.append(small((N_FILTERS, N_FILTERS)))     # next block's w1
        out_shape.append(jax.ShapeDtypeStruct((mt, 2, N_FILTERS), jnp.float32))
        out_specs.append(pl.BlockSpec((None, 2, N_FILTERS), lambda i: (i, 0, 0)))

    return pl.pallas_call(
        kernel,
        out_shape=out_shape[0] if last else tuple(out_shape),
        grid=(mt,),
        in_specs=in_specs,
        out_specs=out_specs[0] if last else tuple(out_specs),
        compiler_params=pltpu.CompilerParams(
            dimension_semantics=("parallel",)),
    )


# --------------------------------------------------------------------------
# Kernel C: AvgPool hoisted before the linear conv_out (2x2, stride 2), fused:
# per pooling-row strip, compute the 4 parity window-means and accumulate the
# 4 (pw,64)@(64,512) matmuls.  Reads y exactly once (free 6-D reshape outside).
# --------------------------------------------------------------------------
def make_pool_convout_call(n, ph, pw, sf):
    two_sf = 2 * sf
    inv = 1.0 / float(sf * sf)

    def kernel(y_ref, w_ref, b_ref, o_ref):
        # y_ref: (2*sf, pw, 2*sf, 64) f32 -- one pooling-row strip of one image.
        acc = jnp.zeros((pw, 512), jnp.float32)
        for di in range(2):
            rsum = y_ref[di]                               # (pw, 2*sf, 64)
            for r in range(1, sf):
                rsum = rsum + y_ref[2 * r + di]
            for dj in range(2):
                csum = rsum[:, dj:dj + 1, :]               # (pw, 1, 64)
                for c in range(1, sf):
                    k = 2 * c + dj
                    csum = csum + rsum[:, k:k + 1, :]
                pm = (csum * inv).reshape(pw, N_FILTERS).astype(jnp.bfloat16)
                acc = acc + jnp.dot(pm, w_ref[2 * di + dj],
                                    preferred_element_type=jnp.float32)
        o_ref[...] = acc + b_ref[...]

    return pl.pallas_call(
        kernel,
        out_shape=jax.ShapeDtypeStruct((n, ph, pw, 512), jnp.float32),
        grid=(n, ph),
        in_specs=[
            pl.BlockSpec((None, None, two_sf, pw, two_sf, N_FILTERS),
                         lambda i, j: (i, j, 0, 0, 0, 0)),
            pl.BlockSpec((4, N_FILTERS, 512), lambda i, j: (0, 0, 0)),
            pl.BlockSpec((1, 512), lambda i, j: (0, 0)),
        ],
        out_specs=pl.BlockSpec((None, None, pw, 512), lambda i, j: (i, j, 0, 0)),
        compiler_params=pltpu.CompilerParams(
            dimension_semantics=("parallel", "parallel")),
    )


# --------------------------------------------------------------------------
# Parameters (PyTorch-shaped, deterministic synthetic init)
# --------------------------------------------------------------------------
def init_params(key):
    ks = jax.random.split(key, 10)
    p = {}
    p["conv_w"] = 0.05 * jax.random.normal(ks[0], (64, 65, 1, 1), jnp.float32)
    p["conv_b"] = 0.05 * jax.random.normal(ks[1], (64,), jnp.float32)
    p["blk_w1"] = 0.05 * jax.random.normal(ks[2], (N_BLOCKS, 64, 64, 1, 1), jnp.float32)
    p["blk_b1"] = 0.05 * jax.random.normal(ks[3], (N_BLOCKS, 64), jnp.float32)
    # non-trivial gamma/beta so the BN affine path is actually exercised
    p["bn_gamma"] = 1.0 + 0.1 * jax.random.normal(ks[4], (N_BLOCKS, 64), jnp.float32)
    p["bn_beta"] = 0.05 * jax.random.normal(ks[5], (N_BLOCKS, 64), jnp.float32)
    p["blk_w2"] = 0.05 * jax.random.normal(ks[6], (N_BLOCKS, 64, 64, 1, 1), jnp.float32)
    p["blk_b2"] = 0.05 * jax.random.normal(ks[7], (N_BLOCKS, 64), jnp.float32)
    p["conv_out_w"] = 0.05 * jax.random.normal(ks[8], (512, 64, 2, 2), jnp.float32)
    p["conv_out_b"] = 0.05 * jax.random.normal(ks[9], (512,), jnp.float32)
    return p


# --------------------------------------------------------------------------
# Forward (glue + kernel calls)
# --------------------------------------------------------------------------
def _scale_shift(stats, gamma, beta, m_real):
    # combine per-tile BN partials: mu = E[h], var = E[h^2] - mu^2 (clamped)
    s = jnp.sum(stats, axis=0)                               # (2, 64)
    mu = s[0] * (1.0 / m_real)
    var = jnp.maximum(s[1] * (1.0 / m_real) - mu * mu, 0.0)
    sc = gamma * jax.lax.rsqrt(var + BN_EPS)
    sh = beta - mu * sc
    return sc.reshape(1, N_FILTERS), sh.reshape(1, N_FILTERS)


def cond_generator_forward(x_nchw, params, noise_key, scale=4, tm=None):
    N, C, H, W = x_nchw.shape
    assert C == N_FILTERS and H % 2 == 0 and W % 2 == 0
    M = N * H * W
    oh, ow = H // 2, W // 2
    sf = oh // scale * 4
    assert sf > 0 and oh % sf == 0 and ow % sf == 0
    ph, pw = oh // sf, ow // sf

    if tm is None:
        tm = min(TM_MAX, _round_up(M, 8))
    assert tm % 8 == 0
    mt = pl.cdiv(M, tm)
    m_pad = mt * tm

    # noise channel (PyTorch draws np.random.uniform(-1,1); jax.random used here)
    noise = jax.random.uniform(noise_key, (N, 1, H, W),
                               minval=-1.0, maxval=1.0, dtype=jnp.float32)
    xc = jnp.concatenate([noise, x_nchw.astype(jnp.float32)], axis=1)   # (N,65,H,W)
    xflat = jnp.transpose(xc, (0, 2, 3, 1)).reshape(M, 65)
    xpad = jnp.pad(xflat, ((0, m_pad - M), (0, K_PAD - 65))).astype(jnp.bfloat16)

    # conv weights (out,in,1,1) -> matmul weights (in,out); matmul operands bf16
    w0 = jnp.pad(params["conv_w"][:, :, 0, 0].T,
                 ((0, K_PAD - 65), (0, 0))).astype(jnp.bfloat16)        # (128,64)
    b0 = params["conv_b"].reshape(1, N_FILTERS)
    w1s = jnp.transpose(params["blk_w1"][:, :, :, 0, 0], (0, 2, 1)).astype(jnp.bfloat16)
    w2s = jnp.transpose(params["blk_w2"][:, :, :, 0, 0], (0, 2, 1)).astype(jnp.bfloat16)
    b2s = params["blk_b2"]
    gammas, betas = params["bn_gamma"], params["bn_beta"]
    # params["blk_b1"] is intentionally unused: conv bias -> BatchNorm cancels exactly.

    conv_in = make_conv_in_call(m_pad, tm, mt, M)
    blk = make_block_call(m_pad, tm, mt, M, last=False)
    blk_last = make_block_call(m_pad, tm, mt, M, last=True)

    y, stats = conv_in(xpad, w0, b0, w1s[0])                 # (m_pad,64), (mt,2,64)
    for b in range(N_BLOCKS):
        sc, sh = _scale_shift(stats, gammas[b], betas[b], M)
        b2 = b2s[b].reshape(1, N_FILTERS)
        if b < N_BLOCKS - 1:
            y, stats = blk(y, sc, sh, w1s[b], w2s[b], b2, w1s[b + 1])
        else:
            y = blk_last(y, sc, sh, w1s[b], w2s[b], b2)

    # conv_out + AvgPool, pool hoisted before the (linear) conv; fused in Pallas.
    y4 = (y[:M] if m_pad != M else y).reshape(N, H, W, N_FILTERS)
    y6 = y4.reshape(N, ph, 2 * sf, pw, 2 * sf, N_FILTERS)    # free reshape, no copy
    w_par = jnp.transpose(params["conv_out_w"], (2, 3, 1, 0)) \
        .reshape(4, N_FILTERS, 512).astype(jnp.bfloat16)     # [di*2+dj] -> (64,512)
    b_out = params["conv_out_b"].reshape(1, 512)
    pooled = make_pool_convout_call(N, ph, pw, sf)(y6, w_par, b_out)    # (N,ph,pw,512)
    return jnp.transpose(pooled, (0, 3, 1, 2))               # NCHW


# --------------------------------------------------------------------------
# Reference 1: pure-JAX replica of the exact Pallas math (bf16 matmul operands,
# b1 dropped, BN folded, pool-before-conv_out) -> tight tolerance.
# --------------------------------------------------------------------------
def ref_forward_match(x_nchw, params, noise_key, scale=4):
    N, C, H, W = x_nchw.shape
    M = N * H * W
    noise = jax.random.uniform(noise_key, (N, 1, H, W),
                               minval=-1.0, maxval=1.0, dtype=jnp.float32)
    xc = jnp.concatenate([noise, x_nchw.astype(jnp.float32)], axis=1)
    xflat = jnp.transpose(xc, (0, 2, 3, 1)).reshape(M, 65)
    xpad = jnp.pad(xflat, ((0, 0), (0, K_PAD - 65))).astype(jnp.bfloat16)
    w0 = jnp.pad(params["conv_w"][:, :, 0, 0].T,
                 ((0, K_PAD - 65), (0, 0))).astype(jnp.bfloat16)
    y = jnp.dot(xpad, w0, preferred_element_type=jnp.float32) + params["conv_b"]
    for b in range(N_BLOCKS):
        w1 = params["blk_w1"][b, :, :, 0, 0].T.astype(jnp.bfloat16)
        w2 = params["blk_w2"][b, :, :, 0, 0].T.astype(jnp.bfloat16)
        h = jnp.dot(y.astype(jnp.bfloat16), w1, preferred_element_type=jnp.float32)
        mu = jnp.mean(h, axis=0)
        var = jnp.maximum(jnp.mean(h * h, axis=0) - mu * mu, 0.0)
        sc = params["bn_gamma"][b] * jax.lax.rsqrt(var + BN_EPS)
        sh = params["bn_beta"][b] - mu * sc
        hr = jnp.maximum(h * sc + sh, 0.0)
        y = y + jnp.dot(hr.astype(jnp.bfloat16), w2,
                        preferred_element_type=jnp.float32) + params["blk_b2"][b]
    oh, ow = H // 2, W // 2
    sf = oh // scale * 4
    ph, pw = oh // sf, ow // sf
    y8 = y.reshape(N, ph, sf, 2, pw, sf, 2, N_FILTERS)
    pm = jnp.mean(y8, axis=(2, 5))                            # (N,ph,2,pw,2,64)
    pm = jnp.transpose(pm, (0, 1, 3, 2, 4, 5)).reshape(N * ph * pw, 4 * N_FILTERS)
    w_out = jnp.transpose(params["conv_out_w"], (2, 3, 1, 0)) \
        .reshape(4 * N_FILTERS, 512).astype(jnp.bfloat16)
    z = jnp.dot(pm.astype(jnp.bfloat16), w_out,
                preferred_element_type=jnp.float32) + params["conv_out_b"]
    return jnp.transpose(z.reshape(N, ph, pw, 512), (0, 3, 1, 2))


# --------------------------------------------------------------------------
# Reference 2: faithful float32 reference of the PyTorch module (f32 matmuls,
# b1 kept before BN, conv_out applied before AvgPool2d) -> loose tolerance,
# since the Pallas path uses bf16 matmul operands.
# --------------------------------------------------------------------------
def ref_forward_f32(x_nchw, params, noise_key, scale=4):
    hi = jax.lax.Precision.HIGHEST
    N, C, H, W = x_nchw.shape
    M = N * H * W
    noise = jax.random.uniform(noise_key, (N, 1, H, W),
                               minval=-1.0, maxval=1.0, dtype=jnp.float32)
    xc = jnp.concatenate([noise, x_nchw.astype(jnp.float32)], axis=1)
    xflat = jnp.transpose(xc, (0, 2, 3, 1)).reshape(M, 65)
    y = jnp.dot(xflat, params["conv_w"][:, :, 0, 0].T, precision=hi) + params["conv_b"]
    for b in range(N_BLOCKS):
        h = jnp.dot(y, params["blk_w1"][b, :, :, 0, 0].T, precision=hi) \
            + params["blk_b1"][b]
        mu = jnp.mean(h, axis=0)
        var = jnp.mean((h - mu) ** 2, axis=0)
        hn = (h - mu) * jax.lax.rsqrt(var + BN_EPS) * params["bn_gamma"][b] \
            + params["bn_beta"][b]
        y = y + jnp.dot(jnp.maximum(hn, 0.0),
                        params["blk_w2"][b, :, :, 0, 0].T, precision=hi) \
            + params["blk_b2"][b]
    oh, ow = H // 2, W // 2
    sf = oh // scale * 4
    ph, pw = oh // sf, ow // sf
    y4 = y.reshape(N, H, W, N_FILTERS)
    patches = y4.reshape(N, oh, 2, ow, 2, N_FILTERS).transpose(0, 1, 3, 2, 4, 5)
    patches = patches.reshape(N * oh * ow, 4 * N_FILTERS)
    w_out = jnp.transpose(params["conv_out_w"], (2, 3, 1, 0)).reshape(4 * N_FILTERS, 512)
    conv = jnp.dot(patches, w_out, precision=hi) + params["conv_out_b"]
    conv = conv.reshape(N, oh, ow, 512)
    pooled = conv.reshape(N, ph, sf, pw, sf, 512).mean(axis=(2, 4))
    return jnp.transpose(pooled, (0, 3, 1, 2))


if __name__ == "__main__":
    key = jax.random.PRNGKey(0)
    pkey, xkey, nkey = jax.random.split(key, 3)

    params = init_params(pkey)
    # channels must be 64 (the module concatenates 1 noise channel -> 65-in conv);
    # scale=4 keeps shapes small (module default scale=32 needs H >= 128).
    x = jax.random.normal(xkey, (2, 64, 16, 16), jnp.float32)
    scale = 4
    tm = 192   # M = 2*16*16 = 512 -> 3 M-tiles; exercises tiling + row masking

    fwd = jax.jit(cond_generator_forward, static_argnames=("scale", "tm"))
    out = jax.block_until_ready(fwd(x, params, nkey, scale=scale, tm=tm))
    assert out.shape == (2, 512, 1, 1), out.shape

    ref_m = jax.block_until_ready(ref_forward_match(x, params, nkey, scale=scale))
    err_m = float(jnp.max(jnp.abs(out - ref_m)))
    assert jnp.allclose(out, ref_m, rtol=2e-3, atol=2e-3), err_m

    ref_f = jax.block_until_ready(ref_forward_f32(x, params, nkey, scale=scale))
    err_f = float(jnp.max(jnp.abs(out - ref_f)))
    assert jnp.allclose(out, ref_f, rtol=1e-1, atol=1e-1), err_f

    print("KERNEL_OK")
</pallas_src>

<mosaic_0001>
module attributes {stable_mosaic.version = 11 : i64} {
  func.func @kernel(%arg0: i32, %arg1: memref<192x128xbf16, #tpu.memory_space<vmem>>, %arg2: memref<128x64xbf16, #tpu.memory_space<vmem>>, %arg3: memref<1x64xf32, #tpu.memory_space<vmem>>, %arg4: memref<64x64xbf16, #tpu.memory_space<vmem>>, %arg5: memref<192x64xf32, #tpu.memory_space<vmem>>, %arg6: memref<1x2x64xf32, #tpu.memory_space<vmem>>) attributes {dimension_semantics = [#tpu.dimension_semantics<parallel>], iteration_bounds = array<i64: 3>, scalar_prefetch = 0 : i64, scratch_operands = 0 : i64, tpu.core_type = #tpu.core_type<tc>, window_params = [{transform_indices = @transform_0, window_bounds = array<i64: 192, 128>}, {pipeline_mode = #tpu.pipeline_mode<synchronous>, transform_indices = @transform_1, window_bounds = array<i64: 128, 64>}, {pipeline_mode = #tpu.pipeline_mode<synchronous>, transform_indices = @transform_2, window_bounds = array<i64: 1, 64>}, {pipeline_mode = #tpu.pipeline_mode<synchronous>, transform_indices = @transform_3, window_bounds = array<i64: 64, 64>}, {transform_indices = @transform_4, window_bounds = array<i64: 192, 64>}, {transform_indices = @transform_5, window_bounds = array<i64: 1, 2, 64>}]} {
    %c0 = arith.constant 0 : index
    %c0_0 = arith.constant 0 : index
    %0 = vector.load %arg1[%c0, %c0_0] : memref<192x128xbf16, #tpu.memory_space<vmem>>, vector<192x128xbf16>
    %c0_1 = arith.constant 0 : index
    %c0_2 = arith.constant 0 : index
    %1 = vector.load %arg2[%c0_1, %c0_2] : memref<128x64xbf16, #tpu.memory_space<vmem>>, vector<128x64xbf16>
    %cst = arith.constant dense<0.000000e+00> : vector<192x64xf32>
    %2 = tpu.matmul %0, %1, %cst {dimension_numbers = #tpu.dot_dimension_numbers<[1], [0], [0], [1], [0, 0, 1, 1], [], []>} : vector<192x128xbf16>, vector<128x64xbf16>, vector<192x64xf32> -> vector<192x64xf32>
    %c0_3 = arith.constant 0 : index
    %c0_4 = arith.constant 0 : index
    %3 = vector.load %arg3[%c0_3, %c0_4] : memref<1x64xf32, #tpu.memory_space<vmem>>, vector<1x64xf32>
    %4 = vector.broadcast %3 : vector<1x64xf32> to vector<192x64xf32>
    %5 = arith.addf %2, %4 : vector<192x64xf32>
    %c0_5 = arith.constant 0 : index
    %c0_6 = arith.constant 0 : index
    %6 = vector.load %arg5[%c0_5, %c0_6] : memref<192x64xf32, #tpu.memory_space<vmem>>, vector<192x64xf32>
    tpu.vector_store %arg5[%c0_5, %c0_6], %5 {strides = array<i32>} : memref<192x64xf32, #tpu.memory_space<vmem>>, vector<192x64xf32>,
    %7 = arith.truncf %5 : vector<192x64xf32> to vector<192x64xbf16>
    %c0_7 = arith.constant 0 : index
    %c0_8 = arith.constant 0 : index
    %8 = vector.load %arg4[%c0_7, %c0_8] : memref<64x64xbf16, #tpu.memory_space<vmem>>, vector<64x64xbf16>
    %cst_9 = arith.constant dense<0.000000e+00> : vector<192x64xf32>
    %9 = tpu.matmul %7, %8, %cst_9 {dimension_numbers = #tpu.dot_dimension_numbers<[1], [0], [0], [1], [0, 0, 1, 1], [], []>} : vector<192x64xbf16>, vector<64x64xbf16>, vector<192x64xf32> -> vector<192x64xf32>
    %c192_i32 = arith.constant 192 : i32
    %10 = arith.muli %arg0, %c192_i32 : i32
    %11 = tpu.iota {dimensions = array<i32: 0>} : vector<192x1xi32>
    %12 = vector.broadcast %10 : i32 to vector<192x1xi32>
    %13 = arith.addi %12, %11 : vector<192x1xi32>
    %c512_i32 = arith.constant 512 : i32
    %14 = vector.broadcast %c512_i32 : i32 to vector<192x1xi32>
    %15 = arith.cmpi slt, %13, %14 : vector<192x1xi32>
    %16 = arith.extui %15 : vector<192x1xi1> to vector<192x1xi32>
    %17 = arith.sitofp %16 : vector<192x1xi32> to vector<192x1xf32>
    %18 = vector.broadcast %17 : vector<192x1xf32> to vector<192x64xf32>
    %19 = arith.mulf %9, %18 : vector<192x64xf32>
    %cst_10 = arith.constant dense<0.000000e+00> : vector<64xf32>
    %20 = vector.multi_reduction <add>, %19, %cst_10 [0] : vector<192x64xf32> to vector<64xf32>
    %21 = vector.shape_cast %20 : vector<64xf32> to vector<1x64xf32>
    %c0_11 = arith.constant 0 : index
    %c0_12 = arith.constant 0 : index
    %c0_13 = arith.constant 0 : index
    %22 = vector.load %arg6[%c0_11, %c0_12, %c0_13] : memref<1x2x64xf32, #tpu.memory_space<vmem>>, vector<1x1x64xf32>
    %23 = vector.shape_cast %22 : vector<1x1x64xf32> to vector<1x64xf32>
    %24 = vector.shape_cast %21 : vector<1x64xf32> to vector<1x1x64xf32>
    tpu.vector_store %arg6[%c0_11, %c0_12, %c0_13], %24 {strides = array<i32>} : memref<1x2x64xf32, #tpu.memory_space<vmem>>, vector<1x1x64xf32>,
    %25 = arith.mulf %19, %19 : vector<192x64xf32>
    %cst_14 = arith.constant dense<0.000000e+00> : vector<64xf32>
    %26 = vector.multi_reduction <add>, %25, %cst_14 [0] : vector<192x64xf32> to vector<64xf32>
    %27 = vector.shape_cast %26 : vector<64xf32> to vector<1x64xf32>
    %c0_15 = arith.constant 0 : index
    %c1 = arith.constant 1 : index
    %c0_16 = arith.constant 0 : index
    %28 = vector.load %arg6[%c0_15, %c1, %c0_16] : memref<1x2x64xf32, #tpu.memory_space<vmem>>, vector<1x1x64xf32>
    %29 = vector.shape_cast %28 : vector<1x1x64xf32> to vector<1x64xf32>
    %30 = vector.shape_cast %27 : vector<1x64xf32> to vector<1x1x64xf32>
    tpu.vector_store %arg6[%c0_15, %c1, %c0_16], %30 {strides = array<i32>} : memref<1x2x64xf32, #tpu.memory_space<vmem>>, vector<1x1x64xf32>,
    return
  }
  func.func @transform_0(%arg0: i32) -> (i32, i32) {
    %c0_i32 = arith.constant 0 : i32
    %c0_i32_0 = arith.constant 0 : i32
    return %arg0, %c0_i32 : i32, i32
  }
  func.func @transform_1(%arg0: i32) -> (i32, i32) {
    %c0_i32 = arith.constant 0 : i32
    %c0_i32_0 = arith.constant 0 : i32
    %c0_i32_1 = arith.constant 0 : i32
    return %c0_i32, %c0_i32_0 : i32, i32
  }
  func.func @transform_2(%arg0: i32) -> (i32, i32) {
    %c0_i32 = arith.constant 0 : i32
    %c0_i32_0 = arith.constant 0 : i32
    %c0_i32_1 = arith.constant 0 : i32
    return %c0_i32, %c0_i32_0 : i32, i32
  }
  func.func @transform_3(%arg0: i32) -> (i32, i32) {
    %c0_i32 = arith.constant 0 : i32
    %c0_i32_0 = arith.constant 0 : i32
    %c0_i32_1 = arith.constant 0 : i32
    return %c0_i32, %c0_i32_0 : i32, i32
  }
  func.func @transform_4(%arg0: i32) -> (i32, i32) {
    %c0_i32 = arith.constant 0 : i32
    %c0_i32_0 = arith.constant 0 : i32
    return %arg0, %c0_i32 : i32, i32
  }
  func.func @transform_5(%arg0: i32) -> (i32, i32, i32) {
    %c0_i32 = arith.constant 0 : i32
    %c0_i32_0 = arith.constant 0 : i32
    %c0_i32_1 = arith.constant 0 : i32
    return %arg0, %c0_i32, %c0_i32_0 : i32, i32, i32
  }
}

module attributes {stable_mosaic.version = 11 : i64} {
  func.func @kernel(%arg0: i32, %arg1: memref<192x64xf32, #tpu.memory_space<vmem>>, %arg2: memref<1x64xf32, #tpu.memory_space<vmem>>, %arg3: memref<1x64xf32, #tpu.memory_space<vmem>>, %arg4: memref<64x64xbf16, #tpu.memory_space<vmem>>, %arg5: memref<64x64xbf16, #tpu.memory_space<vmem>>, %arg6: memref<1x64xf32, #tpu.memory_space<vmem>>, %arg7: memref<64x64xbf16, #tpu.memory_space<vmem>>, %arg8: memref<192x64xf32, #tpu.memory_space<vmem>>, %arg9: memref<1x2x64xf32, #tpu.memory_space<vmem>>) attributes {dimension_semantics = [#tpu.dimension_semantics<parallel>], iteration_bounds = array<i64: 3>, scalar_prefetch = 0 : i64, scratch_operands = 0 : i64, tpu.core_type = #tpu.core_type<tc>, window_params = [{transform_indices = @transform_0, window_bounds = array<i64: 192, 64>}, {pipeline_mode = #tpu.pipeline_mode<synchronous>, transform_indices = @transform_1, window_bounds = array<i64: 1, 64>}, {pipeline_mode = #tpu.pipeline_mode<synchronous>, transform_indices = @transform_2, window_bounds = array<i64: 1, 64>}, {pipeline_mode = #tpu.pipeline_mode<synchronous>, transform_indices = @transform_3, window_bounds = array<i64: 64, 64>}, {pipeline_mode = #tpu.pipeline_mode<synchronous>, transform_indices = @transform_4, window_bounds = array<i64: 64, 64>}, {pipeline_mode = #tpu.pipeline_mode<synchronous>, transform_indices = @transform_5, window_bounds = array<i64: 1, 64>}, {pipeline_mode = #tpu.pipeline_mode<synchronous>, transform_indices = @transform_6, window_bounds = array<i64: 64, 64>}, {transform_indices = @transform_7, window_bounds = array<i64: 192, 64>}, {transform_indices = @transform_8, window_bounds = array<i64: 1, 2, 64>}]} {
    %c0 = arith.constant 0 : index
    %c0_0 = arith.constant 0 : index
    %0 = vector.load %arg1[%c0, %c0_0] : memref<192x64xf32, #tpu.memory_space<vmem>>, vector<192x64xf32>
    %1 = arith.truncf %0 : vector<192x64xf32> to vector<192x64xbf16>
    %c0_1 = arith.constant 0 : index
    %c0_2 = arith.constant 0 : index
    %2 = vector.load %arg4[%c0_1, %c0_2] : memref<64x64xbf16, #tpu.memory_space<vmem>>, vector<64x64xbf16>
    %cst = arith.constant dense<0.000000e+00> : vector<192x64xf32>
    %3 = tpu.matmul %1, %2, %cst {dimension_numbers = #tpu.dot_dimension_numbers<[1], [0], [0], [1], [0, 0, 1, 1], [], []>} : vector<192x64xbf16>, vector<64x64xbf16>, vector<192x64xf32> -> vector<192x64xf32>
    %c0_3 = arith.constant 0 : index
    %c0_4 = arith.constant 0 : index
    %4 = vector.load %arg2[%c0_3, %c0_4] : memref<1x64xf32, #tpu.memory_space<vmem>>, vector<1x64xf32>
    %5 = vector.broadcast %4 : vector<1x64xf32> to vector<192x64xf32>
    %6 = arith.mulf %3, %5 : vector<192x64xf32>
    %c0_5 = arith.constant 0 : index
    %c0_6 = arith.constant 0 : index
    %7 = vector.load %arg3[%c0_5, %c0_6] : memref<1x64xf32, #tpu.memory_space<vmem>>, vector<1x64xf32>
    %8 = vector.broadcast %7 : vector<1x64xf32> to vector<192x64xf32>
    %9 = arith.addf %6, %8 : vector<192x64xf32>
    %cst_7 = arith.constant 0.000000e+00 : f32
    %10 = vector.broadcast %cst_7 : f32 to vector<192x64xf32>
    %11 = arith.maximumf %9, %10 : vector<192x64xf32>
    %12 = arith.truncf %11 : vector<192x64xf32> to vector<192x64xbf16>
    %c0_8 = arith.constant 0 : index
    %c0_9 = arith.constant 0 : index
    %13 = vector.load %arg5[%c0_8, %c0_9] : memref<64x64xbf16, #tpu.memory_space<vmem>>, vector<64x64xbf16>
    %cst_10 = arith.constant dense<0.000000e+00> : vector<192x64xf32>
    %14 = tpu.matmul %12, %13, %cst_10 {dimension_numbers = #tpu.dot_dimension_numbers<[1], [0], [0], [1], [0, 0, 1, 1], [], []>} : vector<192x64xbf16>, vector<64x64xbf16>, vector<192x64xf32> -> vector<192x64xf32>
    %15 = arith.addf %0, %14 : vector<192x64xf32>
    %c0_11 = arith.constant 0 : index
    %c0_12 = arith.constant 0 : index
    %16 = vector.load %arg6[%c0_11, %c0_12] : memref<1x64xf32, #tpu.memory_space<vmem>>, vector<1x64xf32>
    %17 = vector.broadcast %16 : vector<1x64xf32> to vector<192x64xf32>
    %18 = arith.addf %15, %17 : vector<192x64xf32>
    %c0_13 = arith.constant 0 : index
    %c0_14 = arith.constant 0 : index
    %19 = vector.load %arg8[%c0_13, %c0_14] : memref<192x64xf32, #tpu.memory_space<vmem>>, vector<192x64xf32>
    tpu.vector_store %arg8[%c0_13, %c0_14], %18 {strides = array<i32>} : memref<192x64xf32, #tpu.memory_space<vmem>>, vector<192x64xf32>,
    %20 = arith.truncf %18 : vector<192x64xf32> to vector<192x64xbf16>
    %c0_15 = arith.constant 0 : index
    %c0_16 = arith.constant 0 : index
    %21 = vector.load %arg7[%c0_15, %c0_16] : memref<64x64xbf16, #tpu.memory_space<vmem>>, vector<64x64xbf16>
    %cst_17 = arith.constant dense<0.000000e+00> : vector<192x64xf32>
    %22 = tpu.matmul %20, %21, %cst_17 {dimension_numbers = #tpu.dot_dimension_numbers<[1], [0], [0], [1], [0, 0, 1, 1], [], []>} : vector<192x64xbf16>, vector<64x64xbf16>, vector<192x64xf32> -> vector<192x64xf32>
    %c192_i32 = arith.constant 192 : i32
    %23 = arith.muli %arg0, %c192_i32 : i32
    %24 = tpu.iota {dimensions = array<i32: 0>} : vector<192x1xi32>
    %25 = vector.broadcast %23 : i32 to vector<192x1xi32>
    %26 = arith.addi %25, %24 : vector<192x1xi32>
    %c512_i32 = arith.constant 512 : i32
    %27 = vector.broadcast %c512_i32 : i32 to vector<192x1xi32>
    %28 = arith.cmpi slt, %26, %27 : vector<192x1xi32>
    %29 = arith.extui %28 : vector<192x1xi1> to vector<192x1xi32>
    %30 = arith.sitofp %29 : vector<192x1xi32> to vector<192x1xf32>
    %31 = vector.broadcast %30 : vector<192x1xf32> to vector<192x64xf32>
    %32 = arith.mulf %22, %31 : vector<192x64xf32>
    %cst_18 = arith.constant dense<0.000000e+00> : vector<64xf32>
    %33 = vector.multi_reduction <add>, %32, %cst_18 [0] : vector<192x64xf32> to vector<64xf32>
    %34 = vector.shape_cast %33 : vector<64xf32> to vector<1x64xf32>
    %c0_19 = arith.constant 0 : index
    %c0_20 = arith.constant 0 : index
    %c0_21 = arith.constant 0 : index
    %35 = vector.load %arg9[%c0_19, %c0_20, %c0_21] : memref<1x2x64xf32, #tpu.memory_space<vmem>>, vector<1x1x64xf32>
    %36 = vector.shape_cast %35 : vector<1x1x64xf32> to vector<1x64xf32>
    %37 = vector.shape_cast %34 : vector<1x64xf32> to vector<1x1x64xf32>
    tpu.vector_store %arg9[%c0_19, %c0_20, %c0_21], %37 {strides = array<i32>} : memref<1x2x64xf32, #tpu.memory_space<vmem>>, vector<1x1x64xf32>,
    %38 = arith.mulf %32, %32 : vector<192x64xf32>
    %cst_22 = arith.constant dense<0.000000e+00> : vector<64xf32>
    %39 = vector.multi_reduction <add>, %38, %cst_22 [0] : vector<192x64xf32> to vector<64xf32>
    %40 = vector.shape_cast %39 : vector<64xf32> to vector<1x64xf32>
    %c0_23 = arith.constant 0 : index
    %c1 = arith.constant 1 : index
    %c0_24 = arith.constant 0 : index
    %41 = vector.load %arg9[%c0_23, %c1, %c0_24] : memref<1x2x64xf32, #tpu.memory_space<vmem>>, vector<1x1x64xf32>
    %42 = vector.shape_cast %41 : vector<1x1x64xf32> to vector<1x64xf32>
    %43 = vector.shape_cast %40 : vector<1x64xf32> to vector<1x1x64xf32>
    tpu.vector_store %arg9[%c0_23, %c1, %c0_24], %43 {strides = array<i32>} : memref<1x2x64xf32, #tpu.memory_space<vmem>>, vector<1x1x64xf32>,
    return
  }
  func.func @transform_0(%arg0: i32) -> (i32, i32) {
    %c0_i32 = arith.constant 0 : i32
    %c0_i32_0 = arith.constant 0 : i32
    return %arg0, %c0_i32 : i32, i32
  }
  func.func @transform_1(%arg0: i32) -> (i32, i32) {
    %c0_i32 = arith.constant 0 : i32
    %c0_i32_0 = arith.constant 0 : i32
    %c0_i32_1 = arith.constant 0 : i32
    return %c0_i32, %c0_i32_0 : i32, i32
  }
  func.func @transform_2(%arg0: i32) -> (i32, i32) {
    %c0_i32 = arith.constant 0 : i32
    %c0_i32_0 = arith.constant 0 : i32
    %c0_i32_1 = arith.constant 0 : i32
    return %c0_i32, %c0_i32_0 : i32, i32
  }
  func.func @transform_3(%arg0: i32) -> (i32, i32) {
    %c0_i32 = arith.constant 0 : i32
    %c0_i32_0 = arith.constant 0 : i32
    %c0_i32_1 = arith.constant 0 : i32
    return %c0_i32, %c0_i32_0 : i32, i32
  }
  func.func @transform_4(%arg0: i32) -> (i32, i32) {
    %c0_i32 = arith.constant 0 : i32
    %c0_i32_0 = arith.constant 0 : i32
    %c0_i32_1 = arith.constant 0 : i32
    return %c0_i32, %c0_i32_0 : i32, i32
  }
  func.func @transform_5(%arg0: i32) -> (i32, i32) {
    %c0_i32 = arith.constant 0 : i32
    %c0_i32_0 = arith.constant 0 : i32
    %c0_i32_1 = arith.constant 0 : i32
    return %c0_i32, %c0_i32_0 : i32, i32
  }
  func.func @transform_6(%arg0: i32) -> (i32, i32) {
    %c0_i32 = arith.constant 0 : i32
    %c0_i32_0 = arith.constant 0 : i32
    %c0_i32_1 = arith.constant 0 : i32
    return %c0_i32, %c0_i32_0 : i32, i32
  }
  func.func @transform_7(%arg0: i32) -> (i32, i32) {
    %c0_i32 = arith.constant 0 : i32
    %c0_i32_0 = arith.constant 0 : i32
    return %arg0, %c0_i32 : i32, i32
  }
  func.func @transform_8(%arg0: i32) -> (i32, i32, i32) {
    %c0_i32 = arith.constant 0 : i32
    %c0_i32_0 = arith.constant 0 : i32
    %c0_i32_1 = arith.constant 0 : i32
    return %arg0, %c0_i32, %c0_i32_0 : i32, i32, i32
  }
}

module attributes {stable_mosaic.version = 11 : i64} {
  func.func @kernel(%arg0: i32, %arg1: memref<192x64xf32, #tpu.memory_space<vmem>>, %arg2: memref<1x64xf32, #tpu.memory_space<vmem>>, %arg3: memref<1x64xf32, #tpu.memory_space<vmem>>, %arg4: memref<64x64xbf16, #tpu.memory_space<vmem>>, %arg5: memref<64x64xbf16, #tpu.memory_space<vmem>>, %arg6: memref<1x64xf32, #tpu.memory_space<vmem>>, %arg7: memref<192x64xf32, #tpu.memory_space<vmem>>) attributes {dimension_semantics = [#tpu.dimension_semantics<parallel>], iteration_bounds = array<i64: 3>, scalar_prefetch = 0 : i64, scratch_operands = 0 : i64, tpu.core_type = #tpu.core_type<tc>, window_params = [{transform_indices = @transform_0, window_bounds = array<i64: 192, 64>}, {pipeline_mode = #tpu.pipeline_mode<synchronous>, transform_indices = @transform_1, window_bounds = array<i64: 1, 64>}, {pipeline_mode = #tpu.pipeline_mode<synchronous>, transform_indices = @transform_2, window_bounds = array<i64: 1, 64>}, {pipeline_mode = #tpu.pipeline_mode<synchronous>, transform_indices = @transform_3, window_bounds = array<i64: 64, 64>}, {pipeline_mode = #tpu.pipeline_mode<synchronous>, transform_indices = @transform_4, window_bounds = array<i64: 64, 64>}, {pipeline_mode = #tpu.pipeline_mode<synchronous>, transform_indices = @transform_5, window_bounds = array<i64: 1, 64>}, {transform_indices = @transform_6, window_bounds = array<i64: 192, 64>}]} {
    %c0 = arith.constant 0 : index
    %c0_0 = arith.constant 0 : index
    %0 = vector.load %arg1[%c0, %c0_0] : memref<192x64xf32, #tpu.memory_space<vmem>>, vector<192x64xf32>
    %1 = arith.truncf %0 : vector<192x64xf32> to vector<192x64xbf16>
    %c0_1 = arith.constant 0 : index
    %c0_2 = arith.constant 0 : index
    %2 = vector.load %arg4[%c0_1, %c0_2] : memref<64x64xbf16, #tpu.memory_space<vmem>>, vector<64x64xbf16>
    %cst = arith.constant dense<0.000000e+00> : vector<192x64xf32>
    %3 = tpu.matmul %1, %2, %cst {dimension_numbers = #tpu.dot_dimension_numbers<[1], [0], [0], [1], [0, 0, 1, 1], [], []>} : vector<192x64xbf16>, vector<64x64xbf16>, vector<192x64xf32> -> vector<192x64xf32>
    %c0_3 = arith.constant 0 : index
    %c0_4 = arith.constant 0 : index
    %4 = vector.load %arg2[%c0_3, %c0_4] : memref<1x64xf32, #tpu.memory_space<vmem>>, vector<1x64xf32>
    %5 = vector.broadcast %4 : vector<1x64xf32> to vector<192x64xf32>
    %6 = arith.mulf %3, %5 : vector<192x64xf32>
    %c0_5 = arith.constant 0 : index
    %c0_6 = arith.constant 0 : index
    %7 = vector.load %arg3[%c0_5, %c0_6] : memref<1x64xf32, #tpu.memory_space<vmem>>, vector<1x64xf32>
    %8 = vector.broadcast %7 : vector<1x64xf32> to vector<192x64xf32>
    %9 = arith.addf %6, %8 : vector<192x64xf32>
    %cst_7 = arith.constant 0.000000e+00 : f32
    %10 = vector.broadcast %cst_7 : f32 to vector<192x64xf32>
    %11 = arith.maximumf %9, %10 : vector<192x64xf32>
    %12 = arith.truncf %11 : vector<192x64xf32> to vector<192x64xbf16>
    %c0_8 = arith.constant 0 : index
    %c0_9 = arith.constant 0 : index
    %13 = vector.load %arg5[%c0_8, %c0_9] : memref<64x64xbf16, #tpu.memory_space<vmem>>, vector<64x64xbf16>
    %cst_10 = arith.constant dense<0.000000e+00> : vector<192x64xf32>
    %14 = tpu.matmul %12, %13, %cst_10 {dimension_numbers = #tpu.dot_dimension_numbers<[1], [0], [0], [1], [0, 0, 1, 1], [], []>} : vector<192x64xbf16>, vector<64x64xbf16>, vector<192x64xf32> -> vector<192x64xf32>
    %15 = arith.addf %0, %14 : vector<192x64xf32>
    %c0_11 = arith.constant 0 : index
    %c0_12 = arith.constant 0 : index
    %16 = vector.load %arg6[%c0_11, %c0_12] : memref<1x64xf32, #tpu.memory_space<vmem>>, vector<1x64xf32>
    %17 = vector.broadcast %16 : vector<1x64xf32> to vector<192x64xf32>
    %18 = arith.addf %15, %17 : vector<192x64xf32>
    %c0_13 = arith.constant 0 : index
    %c0_14 = arith.constant 0 : index
    %19 = vector.load %arg7[%c0_13, %c0_14] : memref<192x64xf32, #tpu.memory_space<vmem>>, vector<192x64xf32>
    tpu.vector_store %arg7[%c0_13, %c0_14], %18 {strides = array<i32>} : memref<192x64xf32, #tpu.memory_space<vmem>>, vector<192x64xf32>,
    return
  }
  func.func @transform_0(%arg0: i32) -> (i32, i32) {
    %c0_i32 = arith.constant 0 : i32
    %c0_i32_0 = arith.constant 0 : i32
    return %arg0, %c0_i32 : i32, i32
  }
  func.func @transform_1(%arg0: i32) -> (i32, i32) {
    %c0_i32 = arith.constant 0 : i32
    %c0_i32_0 = arith.constant 0 : i32
    %c0_i32_1 = arith.constant 0 : i32
    return %c0_i32, %c0_i32_0 : i32, i32
  }
  func.func @transform_2(%arg0: i32) -> (i32, i32) {
    %c0_i32 = arith.constant 0 : i32
    %c0_i32_0 = arith.constant 0 : i32
    %c0_i32_1 = arith.constant 0 : i32
    return %c0_i32, %c0_i32_0 : i32, i32
  }
  func.func @transform_3(%arg0: i32) -> (i32, i32) {
    %c0_i32 = arith.constant 0 : i32
    %c0_i32_0 = arith.constant 0 : i32
    %c0_i32_1 = arith.constant 0 : i32
    return %c0_i32, %c0_i32_0 : i32, i32
  }
  func.func @transform_4(%arg0: i32) -> (i32, i32) {
    %c0_i32 = arith.constant 0 : i32
    %c0_i32_0 = arith.constant 0 : i32
    %c0_i32_1 = arith.constant 0 : i32
    return %c0_i32, %c0_i32_0 : i32, i32
  }
  func.func @transform_5(%arg0: i32) -> (i32, i32) {
    %c0_i32 = arith.constant 0 : i32
    %c0_i32_0 = arith.constant 0 : i32
    %c0_i32_1 = arith.constant 0 : i32
    return %c0_i32, %c0_i32_0 : i32, i32
  }
  func.func @transform_6(%arg0: i32) -> (i32, i32) {
    %c0_i32 = arith.constant 0 : i32
    %c0_i32_0 = arith.constant 0 : i32
    return %arg0, %c0_i32 : i32, i32
  }
}

module attributes {stable_mosaic.version = 11 : i64} {
  func.func @kernel(%arg0: i32, %arg1: i32, %arg2: memref<1x1x16x1x16x64xf32, #tpu.memory_space<vmem>>, %arg3: memref<4x64x512xbf16, #tpu.memory_space<vmem>>, %arg4: memref<1x512xf32, #tpu.memory_space<vmem>>, %arg5: memref<1x1x1x512xf32, #tpu.memory_space<vmem>>) attributes {dimension_semantics = [#tpu.dimension_semantics<parallel>, #tpu.dimension_semantics<parallel>], iteration_bounds = array<i64: 2, 1>, scalar_prefetch = 0 : i64, scratch_operands = 0 : i64, tpu.core_type = #tpu.core_type<tc>, window_params = [{transform_indices = @transform_0, window_bounds = array<i64: 1, 1, 16, 1, 16, 64>}, {pipeline_mode = #tpu.pipeline_mode<synchronous>, transform_indices = @transform_1, window_bounds = array<i64: 4, 64, 512>}, {pipeline_mode = #tpu.pipeline_mode<synchronous>, transform_indices = @transform_2, window_bounds = array<i64: 1, 512>}, {transform_indices = @transform_3, window_bounds = array<i64: 1, 1, 1, 512>}]} {
    %cst = arith.constant 0.000000e+00 : f32
    %0 = vector.broadcast %cst : f32 to vector<1x512xf32>
    %c0 = arith.constant 0 : index
    %c0_0 = arith.constant 0 : index
    %c0_1 = arith.constant 0 : index
    %c0_2 = arith.constant 0 : index
    %c0_3 = arith.constant 0 : index
    %c0_4 = arith.constant 0 : index
    %1 = vector.load %arg2[%c0, %c0_0, %c0_1, %c0_2, %c0_3, %c0_4] : memref<1x1x16x1x16x64xf32, #tpu.memory_space<vmem>>, vector<1x1x1x1x16x64xf32>
    %2 = vector.shape_cast %1 : vector<1x1x1x1x16x64xf32> to vector<1x16x64xf32>
    %c0_5 = arith.constant 0 : index
    %c0_6 = arith.constant 0 : index
    %c2 = arith.constant 2 : index
    %c0_7 = arith.constant 0 : index
    %c0_8 = arith.constant 0 : index
    %c0_9 = arith.constant 0 : index
    %3 = vector.load %arg2[%c0_5, %c0_6, %c2, %c0_7, %c0_8, %c0_9] : memref<1x1x16x1x16x64xf32, #tpu.memory_space<vmem>>, vector<1x1x1x1x16x64xf32>
    %4 = vector.shape_cast %3 : vector<1x1x1x1x16x64xf32> to vector<1x16x64xf32>
    %5 = arith.addf %2, %4 : vector<1x16x64xf32>
    %c0_10 = arith.constant 0 : index
    %c0_11 = arith.constant 0 : index
    %c4 = arith.constant 4 : index
    %c0_12 = arith.constant 0 : index
    %c0_13 = arith.constant 0 : index
    %c0_14 = arith.constant 0 : index
    %6 = vector.load %arg2[%c0_10, %c0_11, %c4, %c0_12, %c0_13, %c0_14] : memref<1x1x16x1x16x64xf32, #tpu.memory_space<vmem>>, vector<1x1x1x1x16x64xf32>
    %7 = vector.shape_cast %6 : vector<1x1x1x1x16x64xf32> to vector<1x16x64xf32>
    %8 = arith.addf %5, %7 : vector<1x16x64xf32>
    %c0_15 = arith.constant 0 : index
    %c0_16 = arith.constant 0 : index
    %c6 = arith.constant 6 : index
    %c0_17 = arith.constant 0 : index
    %c0_18 = arith.constant 0 : index
    %c0_19 = arith.constant 0 : index
    %9 = vector.load %arg2[%c0_15, %c0_16, %c6, %c0_17, %c0_18, %c0_19] : memref<1x1x16x1x16x64xf32, #tpu.memory_space<vmem>>, vector<1x1x1x1x16x64xf32>
    %10 = vector.shape_cast %9 : vector<1x1x1x1x16x64xf32> to vector<1x16x64xf32>
    %11 = arith.addf %8, %10 : vector<1x16x64xf32>
    %c0_20 = arith.constant 0 : index
    %c0_21 = arith.constant 0 : index
    %c8 = arith.constant 8 : index
    %c0_22 = arith.constant 0 : index
    %c0_23 = arith.constant 0 : index
    %c0_24 = arith.constant 0 : index
    %12 = vector.load %arg2[%c0_20, %c0_21, %c8, %c0_22, %c0_23, %c0_24] : memref<1x1x16x1x16x64xf32, #tpu.memory_space<vmem>>, vector<1x1x1x1x16x64xf32>
    %13 = vector.shape_cast %12 : vector<1x1x1x1x16x64xf32> to vector<1x16x64xf32>
    %14 = arith.addf %11, %13 : vector<1x16x64xf32>
    %c0_25 = arith.constant 0 : index
    %c0_26 = arith.constant 0 : index
    %c10 = arith.constant 10 : index
    %c0_27 = arith.constant 0 : index
    %c0_28 = arith.constant 0 : index
    %c0_29 = arith.constant 0 : index
    %15 = vector.load %arg2[%c0_25, %c0_26, %c10, %c0_27, %c0_28, %c0_29] : memref<1x1x16x1x16x64xf32, #tpu.memory_space<vmem>>, vector<1x1x1x1x16x64xf32>
    %16 = vector.shape_cast %15 : vector<1x1x1x1x16x64xf32> to vector<1x16x64xf32>
    %17 = arith.addf %14, %16 : vector<1x16x64xf32>
    %c0_30 = arith.constant 0 : index
    %c0_31 = arith.constant 0 : index
    %c12 = arith.constant 12 : index
    %c0_32 = arith.constant 0 : index
    %c0_33 = arith.constant 0 : index
    %c0_34 = arith.constant 0 : index
    %18 = vector.load %arg2[%c0_30, %c0_31, %c12, %c0_32, %c0_33, %c0_34] : memref<1x1x16x1x16x64xf32, #tpu.memory_space<vmem>>, vector<1x1x1x1x16x64xf32>
    %19 = vector.shape_cast %18 : vector<1x1x1x1x16x64xf32> to vector<1x16x64xf32>
    %20 = arith.addf %17, %19 : vector<1x16x64xf32>
    %c0_35 = arith.constant 0 : index
    %c0_36 = arith.constant 0 : index
    %c14 = arith.constant 14 : index
    %c0_37 = arith.constant 0 : index
    %c0_38 = arith.constant 0 : index
    %c0_39 = arith.constant 0 : index
    %21 = vector.load %arg2[%c0_35, %c0_36, %c14, %c0_37, %c0_38, %c0_39] : memref<1x1x16x1x16x64xf32, #tpu.memory_space<vmem>>, vector<1x1x1x1x16x64xf32>
    %22 = vector.shape_cast %21 : vector<1x1x1x1x16x64xf32> to vector<1x16x64xf32>
    %23 = arith.addf %20, %22 : vector<1x16x64xf32>
    %24 = vector.extract_strided_slice %23 {offsets = [0, 0, 0], sizes = [1, 1, 64], strides = [1, 1, 1]} : vector<1x16x64xf32> to vector<1x1x64xf32>
    %25 = vector.extract_strided_slice %23 {offsets = [0, 2, 0], sizes = [1, 1, 64], strides = [1, 1, 1]} : vector<1x16x64xf32> to vector<1x1x64xf32>
    %26 = arith.addf %24, %25 : vector<1x1x64xf32>
    %27 = vector.extract_strided_slice %23 {offsets = [0, 4, 0], sizes = [1, 1, 64], strides = [1, 1, 1]} : vector<1x16x64xf32> to vector<1x1x64xf32>
    %28 = arith.addf %26, %27 : vector<1x1x64xf32>
    %29 = vector.extract_strided_slice %23 {offsets = [0, 6, 0], sizes = [1, 1, 64], strides = [1, 1, 1]} : vector<1x16x64xf32> to vector<1x1x64xf32>
    %30 = arith.addf %28, %29 : vector<1x1x64xf32>
    %31 = vector.extract_strided_slice %23 {offsets = [0, 8, 0], sizes = [1, 1, 64], strides = [1, 1, 1]} : vector<1x16x64xf32> to vector<1x1x64xf32>
    %32 = arith.addf %30, %31 : vector<1x1x64xf32>
    %33 = vector.extract_strided_slice %23 {offsets = [0, 10, 0], sizes = [1, 1, 64], strides = [1, 1, 1]} : vector<1x16x64xf32> to vector<1x1x64xf32>
    %34 = arith.addf %32, %33 : vector<1x1x64xf32>
    %35 = vector.extract_strided_slice %23 {offsets = [0, 12, 0], sizes = [1, 1, 64], strides = [1, 1, 1]} : vector<1x16x64xf32> to vector<1x1x64xf32>
    %36 = arith.addf %34, %35 : vector<1x1x64xf32>
    %37 = vector.extract_strided_slice %23 {offsets = [0, 14, 0], sizes = [1, 1, 64], strides = [1, 1, 1]} : vector<1x16x64xf32> to vector<1x1x64xf32>
    %38 = arith.addf %36, %37 : vector<1x1x64xf32>
    %cst_40 = arith.constant 1.562500e-02 : f32
    %39 = vector.broadcast %cst_40 : f32 to vector<1x1x64xf32>
    %40 = arith.mulf %38, %39 : vector<1x1x64xf32>
    %41 = vector.shape_cast %40 : vector<1x1x64xf32> to vector<1x64xf32>
    %42 = arith.truncf %41 : vector<1x64xf32> to vector<1x64xbf16>
    %c0_41 = arith.constant 0 : index
    %c0_42 = arith.constant 0 : index
    %c0_43 = arith.constant 0 : index
    %43 = vector.load %arg3[%c0_41, %c0_42, %c0_43] : memref<4x64x512xbf16, #tpu.memory_space<vmem>>, vector<1x64x512xbf16>
    %44 = vector.shape_cast %43 : vector<1x64x512xbf16> to vector<64x512xbf16>
    %cst_44 = arith.constant dense<0.000000e+00> : vector<1x512xf32>
    %45 = tpu.matmul %42, %44, %cst_44 {dimension_numbers = #tpu.dot_dimension_numbers<[1], [0], [0], [1], [0, 0, 1, 1], [], []>} : vector<1x64xbf16>, vector<64x512xbf16>, vector<1x512xf32> -> vector<1x512xf32>
    %46 = arith.addf %0, %45 : vector<1x512xf32>
    %47 = vector.extract_strided_slice %23 {offsets = [0, 1, 0], sizes = [1, 1, 64], strides = [1, 1, 1]} : vector<1x16x64xf32> to vector<1x1x64xf32>
    %48 = vector.extract_strided_slice %23 {offsets = [0, 3, 0], sizes = [1, 1, 64], strides = [1, 1, 1]} : vector<1x16x64xf32> to vector<1x1x64xf32>
    %49 = arith.addf %47, %48 : vector<1x1x64xf32>
    %50 = vector.extract_strided_slice %23 {offsets = [0, 5, 0], sizes = [1, 1, 64], strides = [1, 1, 1]} : vector<1x16x64xf32> to vector<1x1x64xf32>
    %51 = arith.addf %49, %50 : vector<1x1x64xf32>
    %52 = vector.extract_strided_slice %23 {offsets = [0, 7, 0], sizes = [1, 1, 64], strides = [1, 1, 1]} : vector<1x16x64xf32> to vector<1x1x64xf32>
    %53 = arith.addf %51, %52 : vector<1x1x64xf32>
    %54 = vector.extract_strided_slice %23 {offsets = [0, 9, 0], sizes = [1, 1, 64], strides = [1, 1, 1]} : vector<1x16x64xf32> to vector<1x1x64xf32>
    %55 = arith.addf %53, %54 : vector<1x1x64xf32>
    %56 = vector.extract_strided_slice %23 {offsets = [0, 11, 0], sizes = [1, 1, 64], strides = [1, 1, 1]} : vector<1x16x64xf32> to vector<1x1x64xf32>
    %57 = arith.addf %55, %56 : vector<1x1x64xf32>
    %58 = vector.extract_strided_slice %23 {offsets = [0, 13, 0], sizes = [1, 1, 64], strides = [1, 1, 1]} : vector<1x16x64xf32> to vector<1x1x64xf32>
    %59 = arith.addf %57, %58 : vector<1x1x64xf32>
    %60 = vector.extract_strided_slice %23 {offsets = [0, 15, 0], sizes = [1, 1, 64], strides = [1, 1, 1]} : vector<1x16x64xf32> to vector<1x1x64xf32>
    %61 = arith.addf %59, %60 : vector<1x1x64xf32>
    %cst_45 = arith.constant 1.562500e-02 : f32
    %62 = vector.broadcast %cst_45 : f32 to vector<1x1x64xf32>
    %63 = arith.mulf %61, %62 : vector<1x1x64xf32>
    %64 = vector.shape_cast %63 : vector<1x1x64xf32> to vector<1x64xf32>
    %65 = arith.truncf %64 : vector<1x64xf32> to vector<1x64xbf16>
    %c1 = arith.constant 1 : index
    %c0_46 = arith.constant 0 : index
    %c0_47 = arith.constant 0 : index
    %66 = vector.load %arg3[%c1, %c0_46, %c0_47] : memref<4x64x512xbf16, #tpu.memory_space<vmem>>, vector<1x64x512xbf16>
    %67 = vector.shape_cast %66 : vector<1x64x512xbf16> to vector<64x512xbf16>
    %cst_48 = arith.constant dense<0.000000e+00> : vector<1x512xf32>
    %68 = tpu.matmul %65, %67, %cst_48 {dimension_numbers = #tpu.dot_dimension_numbers<[1], [0], [0], [1], [0, 0, 1, 1], [], []>} : vector<1x64xbf16>, vector<64x512xbf16>, vector<1x512xf32> -> vector<1x512xf32>
    %69 = arith.addf %46, %68 : vector<1x512xf32>
    %c0_49 = arith.constant 0 : index
    %c0_50 = arith.constant 0 : index
    %c1_51 = arith.constant 1 : index
    %c0_52 = arith.constant 0 : index
    %c0_53 = arith.constant 0 : index
    %c0_54 = arith.constant 0 : index
    %70 = vector.load %arg2[%c0_49, %c0_50, %c1_51, %c0_52, %c0_53, %c0_54] : memref<1x1x16x1x16x64xf32, #tpu.memory_space<vmem>>, vector<1x1x1x1x16x64xf32>
    %71 = vector.shape_cast %70 : vector<1x1x1x1x16x64xf32> to vector<1x16x64xf32>
    %c0_55 = arith.constant 0 : index
    %c0_56 = arith.constant 0 : index
    %c3 = arith.constant 3 : index
    %c0_57 = arith.constant 0 : index
    %c0_58 = arith.constant 0 : index
    %c0_59 = arith.constant 0 : index
    %72 = vector.load %arg2[%c0_55, %c0_56, %c3, %c0_57, %c0_58, %c0_59] : memref<1x1x16x1x16x64xf32, #tpu.memory_space<vmem>>, vector<1x1x1x1x16x64xf32>
    %73 = vector.shape_cast %72 : vector<1x1x1x1x16x64xf32> to vector<1x16x64xf32>
    %74 = arith.addf %71, %73 : vector<1x16x64xf32>
    %c0_60 = arith.constant 0 : index
    %c0_61 = arith.constant 0 : index
    %c5 = arith.constant 5 : index
    %c0_62 = arith.constant 0 : index
    %c0_63 = arith.constant 0 : index
    %c0_64 = arith.constant 0 : index
    %75 = vector.load %arg2[%c0_60, %c0_61, %c5, %c0_62, %c0_63, %c0_64] : memref<1x1x16x1x16x64xf32, #tpu.memory_space<vmem>>, vector<1x1x1x1x16x64xf32>
    %76 = vector.shape_cast %75 : vector<1x1x1x1x16x64xf32> to vector<1x16x64xf32>
    %77 = arith.addf %74, %76 : vector<1x16x64xf32>
    %c0_65 = arith.constant 0 : index
    %c0_66 = arith.constant 0 : index
    %c7 = arith.constant 7 : index
    %c0_67 = arith.constant 0 : index
    %c0_68 = arith.constant 0 : index
    %c0_69 = arith.constant 0 : index
    %78 = vector.load %arg2[%c0_65, %c0_66, %c7, %c0_67, %c0_68, %c0_69] : memref<1x1x16x1x16x64xf32, #tpu.memory_space<vmem>>, vector<1x1x1x1x16x64xf32>
    %79 = vector.shape_cast %78 : vector<1x1x1x1x16x64xf32> to vector<1x16x64xf32>
    %80 = arith.addf %77, %79 : vector<1x16x64xf32>
    %c0_70 = arith.constant 0 : index
    %c0_71 = arith.constant 0 : index
    %c9 = arith.constant 9 : index
    %c0_72 = arith.constant 0 : index
    %c0_73 = arith.constant 0 : index
    %c0_74 = arith.constant 0 : index
    %81 = vector.load %arg2[%c0_70, %c0_71, %c9, %c0_72, %c0_73, %c0_74] : memref<1x1x16x1x16x64xf32, #tpu.memory_space<vmem>>, vector<1x1x1x1x16x64xf32>
    %82 = vector.shape_cast %81 : vector<1x1x1x1x16x64xf32> to vector<1x16x64xf32>
    %83 = arith.addf %80, %82 : vector<1x16x64xf32>
    %c0_75 = arith.constant 0 : index
    %c0_76 = arith.constant 0 : index
    %c11 = arith.constant 11 : index
    %c0_77 = arith.constant 0 : index
    %c0_78 = arith.constant 0 : index
    %c0_79 = arith.constant 0 : index
    %84 = vector.load %arg2[%c0_75, %c0_76, %c11, %c0_77, %c0_78, %c0_79] : memref<1x1x16x1x16x64xf32, #tpu.memory_space<vmem>>, vector<1x1x1x1x16x64xf32>
    %85 = vector.shape_cast %84 : vector<1x1x1x1x16x64xf32> to vector<1x16x64xf32>
    %86 = arith.addf %83, %85 : vector<1x16x64xf32>
    %c0_80 = arith.constant 0 : index
    %c0_81 = arith.constant 0 : index
    %c13 = arith.constant 13 : index
    %c0_82 = arith.constant 0 : index
    %c0_83 = arith.constant 0 : index
    %c0_84 = arith.constant 0 : index
    %87 = vector.load %arg2[%c0_80, %c0_81, %c13, %c0_82, %c0_83, %c0_84] : memref<1x1x16x1x16x64xf32, #tpu.memory_space<vmem>>, vector<1x1x1x1x16x64xf32>
    %88 = vector.shape_cast %87 : vector<1x1x1x1x16x64xf32> to vector<1x16x64xf32>
    %89 = arith.addf %86, %88 : vector<1x16x64xf32>
    %c0_85 = arith.constant 0 : index
    %c0_86 = arith.constant 0 : index
    %c15 = arith.constant 15 : index
    %c0_87 = arith.constant 0 : index
    %c0_88 = arith.constant 0 : index
    %c0_89 = arith.constant 0 : index
    %90 = vector.load %arg2[%c0_85, %c0_86, %c15, %c0_87, %c0_88, %c0_89] : memref<1x1x16x1x16x64xf32, #tpu.memory_space<vmem>>, vector<1x1x1x1x16x64xf32>
    %91 = vector.shape_cast %90 : vector<1x1x1x1x16x64xf32> to vector<1x16x64xf32>
    %92 = arith.addf %89, %91 : vector<1x16x64xf32>
    %93 = vector.extract_strided_slice %92 {offsets = [0, 0, 0], sizes = [1, 1, 64], strides = [1, 1, 1]} : vector<1x16x64xf32> to vector<1x1x64xf32>
    %94 = vector.extract_strided_slice %92 {offsets = [0, 2, 0], sizes = [1, 1, 64], strides = [1, 1, 1]} : vector<1x16x64xf32> to vector<1x1x64xf32>
    %95 = arith.addf %93, %94 : vector<1x1x64xf32>
    %96 = vector.extract_strided_slice %92 {offsets = [0, 4, 0], sizes = [1, 1, 64], strides = [1, 1, 1]} : vector<1x16x64xf32> to vector<1x1x64xf32>
    %97 = arith.addf %95, %96 : vector<1x1x64xf32>
    %98 = vector.extract_strided_slice %92 {offsets = [0, 6, 0], sizes = [1, 1, 64], strides = [1, 1, 1]} : vector<1x16x64xf32> to vector<1x1x64xf32>
    %99 = arith.addf %97, %98 : vector<1x1x64xf32>
    %100 = vector.extract_strided_slice %92 {offsets = [0, 8, 0], sizes = [1, 1, 64], strides = [1, 1, 1]} : vector<1x16x64xf32> to vector<1x1x64xf32>
    %101 = arith.addf %99, %100 : vector<1x1x64xf32>
    %102 = vector.extract_strided_slice %92 {offsets = [0, 10, 0], sizes = [1, 1, 64], strides = [1, 1, 1]} : vector<1x16x64xf32> to vector<1x1x64xf32>
    %103 = arith.addf %101, %102 : vector<1x1x64xf32>
    %104 = vector.extract_strided_slice %92 {offsets = [0, 12, 0], sizes = [1, 1, 64], strides = [1, 1, 1]} : vector<1x16x64xf32> to vector<1x1x64xf32>
    %105 = arith.addf %103, %104 : vector<1x1x64xf32>
    %106 = vector.extract_strided_slice %92 {offsets = [0, 14, 0], sizes = [1, 1, 64], strides = [1, 1, 1]} : vector<1x16x64xf32> to vector<1x1x64xf32>
    %107 = arith.addf %105, %106 : vector<1x1x64xf32>
    %cst_90 = arith.constant 1.562500e-02 : f32
    %108 = vector.broadcast %cst_90 : f32 to vector<1x1x64xf32>
    %109 = arith.mulf %107, %108 : vector<1x1x64xf32>
    %110 = vector.shape_cast %109 : vector<1x1x64xf32> to vector<1x64xf32>
    %111 = arith.truncf %110 : vector<1x64xf32> to vector<1x64xbf16>
    %c2_91 = arith.constant 2 : index
    %c0_92 = arith.constant 0 : index
    %c0_93 = arith.constant 0 : index
    %112 = vector.load %arg3[%c2_91, %c0_92, %c0_93] : memref<4x64x512xbf16, #tpu.memory_space<vmem>>, vector<1x64x512xbf16>
    %113 = vector.shape_cast %112 : vector<1x64x512xbf16> to vector<64x512xbf16>
    %cst_94 = arith.constant dense<0.000000e+00> : vector<1x512xf32>
    %114 = tpu.matmul %111, %113, %cst_94 {dimension_numbers = #tpu.dot_dimension_numbers<[1], [0], [0], [1], [0, 0, 1, 1], [], []>} : vector<1x64xbf16>, vector<64x512xbf16>, vector<1x512xf32> -> vector<1x512xf32>
    %115 = arith.addf %69, %114 : vector<1x512xf32>
    %116 = vector.extract_strided_slice %92 {offsets = [0, 1, 0], sizes = [1, 1, 64], strides = [1, 1, 1]} : vector<1x16x64xf32> to vector<1x1x64xf32>
    %117 = vector.extract_strided_slice %92 {offsets = [0, 3, 0], sizes = [1, 1, 64], strides = [1, 1, 1]} : vector<1x16x64xf32> to vector<1x1x64xf32>
    %118 = arith.addf %116, %117 : vector<1x1x64xf32>
    %119 = vector.extract_strided_slice %92 {offsets = [0, 5, 0], sizes = [1, 1, 64], strides = [1, 1, 1]} : vector<1x16x64xf32> to vector<1x1x64xf32>
    %120 = arith.addf %118, %119 : vector<1x1x64xf32>
    %121 = vector.extract_strided_slice %92 {offsets = [0, 7, 0], sizes = [1, 1, 64], strides = [1, 1, 1]} : vector<1x16x64xf32> to vector<1x1x64xf32>
    %122 = arith.addf %120, %121 : vector<1x1x64xf32>
    %123 = vector.extract_strided_slice %92 {offsets = [0, 9, 0], sizes = [1, 1, 64], strides = [1, 1, 1]} : vector<1x16x64xf32> to vector<1x1x64xf32>
    %124 = arith.addf %122, %123 : vector<1x1x64xf32>
    %125 = vector.extract_strided_slice %92 {offsets = [0, 11, 0], sizes = [1, 1, 64], strides = [1, 1, 1]} : vector<1x16x64xf32> to vector<1x1x64xf32>
    %126 = arith.addf %124, %125 : vector<1x1x64xf32>
    %127 = vector.extract_strided_slice %92 {offsets = [0, 13, 0], sizes = [1, 1, 64], strides = [1, 1, 1]} : vector<1x16x64xf32> to vector<1x1x64xf32>
    %128 = arith.addf %126, %127 : vector<1x1x64xf32>
    %129 = vector.extract_strided_slice %92 {offsets = [0, 15, 0], sizes = [1, 1, 64], strides = [1, 1, 1]} : vector<1x16x64xf32> to vector<1x1x64xf32>
    %130 = arith.addf %128, %129 : vector<1x1x64xf32>
    %cst_95 = arith.constant 1.562500e-02 : f32
    %131 = vector.broadcast %cst_95 : f32 to vector<1x1x64xf32>
    %132 = arith.mulf %130, %131 : vector<1x1x64xf32>
    %133 = vector.shape_cast %132 : vector<1x1x64xf32> to vector<1x64xf32>
    %134 = arith.truncf %133 : vector<1x64xf32> to vector<1x64xbf16>
    %c3_96 = arith.constant 3 : index
    %c0_97 = arith.constant 0 : index
    %c0_98 = arith.constant 0 : index
    %135 = vector.load %arg3[%c3_96, %c0_97, %c0_98] : memref<4x64x512xbf16, #tpu.memory_space<vmem>>, vector<1x64x512xbf16>
    %136 = vector.shape_cast %135 : vector<1x64x512xbf16> to vector<64x512xbf16>
    %cst_99 = arith.constant dense<0.000000e+00> : vector<1x512xf32>
    %137 = tpu.matmul %134, %136, %cst_99 {dimension_numbers = #tpu.dot_dimension_numbers<[1], [0], [0], [1], [0, 0, 1, 1], [], []>} : vector<1x64xbf16>, vector<64x512xbf16>, vector<1x512xf32> -> vector<1x512xf32>
    %138 = arith.addf %115, %137 : vector<1x512xf32>
    %c0_100 = arith.constant 0 : index
    %c0_101 = arith.constant 0 : index
    %139 = vector.load %arg4[%c0_100, %c0_101] : memref<1x512xf32, #tpu.memory_space<vmem>>, vector<1x512xf32>
    %140 = arith.addf %138, %139 : vector<1x512xf32>
    %c0_102 = arith.constant 0 : index
    %c0_103 = arith.constant 0 : index
    %c0_104 = arith.constant 0 : index
    %c0_105 = arith.constant 0 : index
    %141 = vector.load %arg5[%c0_102, %c0_103, %c0_104, %c0_105] : memref<1x1x1x512xf32, #tpu.memory_space<vmem>>, vector<1x1x1x512xf32>
    %142 = vector.shape_cast %141 : vector<1x1x1x512xf32> to vector<1x512xf32>
    %143 = vector.shape_cast %140 : vector<1x512xf32> to vector<1x1x1x512xf32>
    tpu.vector_store %arg5[%c0_102, %c0_103, %c0_104, %c0_105], %143 {strides = array<i32>} : memref<1x1x1x512xf32, #tpu.memory_space<vmem>>, vector<1x1x1x512xf32>,
    return
  }
  func.func @transform_0(%arg0: i32, %arg1: i32) -> (i32, i32, i32, i32, i32, i32) {
    %c0_i32 = arith.constant 0 : i32
    %c0_i32_0 = arith.constant 0 : i32
    %c0_i32_1 = arith.constant 0 : i32
    %c0_i32_2 = arith.constant 0 : i32
    %c0_i32_3 = arith.constant 0 : i32
    return %arg0, %arg1, %c0_i32, %c0_i32_0, %c0_i32_1, %c0_i32_2 : i32, i32, i32, i32, i32, i32
  }
  func.func @transform_1(%arg0: i32, %arg1: i32) -> (i32, i32, i32) {
    %c0_i32 = arith.constant 0 : i32
    %c0_i32_0 = arith.constant 0 : i32
    %c0_i32_1 = arith.constant 0 : i32
    %c0_i32_2 = arith.constant 0 : i32
    return %c0_i32, %c0_i32_0, %c0_i32_1 : i32, i32, i32
  }
  func.func @transform_2(%arg0: i32, %arg1: i32) -> (i32, i32) {
    %c0_i32 = arith.constant 0 : i32
    %c0_i32_0 = arith.constant 0 : i32
    %c0_i32_1 = arith.constant 0 : i32
    return %c0_i32, %c0_i32_0 : i32, i32
  }
  func.func @transform_3(%arg0: i32, %arg1: i32) -> (i32, i32, i32, i32) {
    %c0_i32 = arith.constant 0 : i32
    %c0_i32_0 = arith.constant 0 : i32
    %c0_i32_1 = arith.constant 0 : i32
    return %arg0, %arg1, %c0_i32, %c0_i32_0 : i32, i32, i32, i32
  }
}

</mosaic_0001>

<bundles_post_ra>
// kernel: cond_generator_forward.19
= control target key start
LH: loop header
LB: loop body
LE: loop exit
PB: predicated region body
PF: predicated region fallthrough
CT: control target
= control target key end

     0   :  { %s1817_s27 = smov 0   ;;  %s2341_s0 = inlined_call_operand.vmem [shape: f32[576,64], index: 0, kind: input, shape index: {}]   ;;  %s2342_s1 = inlined_call_operand.vmem [shape: f32[1,64], index: 1, kind: input, shape index: {}]   ;;  %s2343_s2 = inlined_call_operand.vmem [shape: f32[1,64], index: 2, kind: input, shape index: {}]   ;;  %s2344_s3 = inlined_call_operand.vmem [shape: bf16[64,64], index: 3, kind: input, shape index: {}]   ;;  %s2345_s4 = inlined_call_operand.vmem [shape: bf16[64,64], index: 4, kind: input, shape index: {}]   ;;  %s2346_s5 = inlined_call_operand.vmem [shape: f32[1,64], index: 5, kind: input, shape index: {}]   ;;  %s2347_s6 = inlined_call_operand.vmem [shape: bf16[64,64], index: 6, kind: input, shape index: {}]   ;;  %s2348_s7 = inlined_call_operand.vmem [shape: f32[576,64], index: 7, kind: output, shape index: {0}]   ;;  %s2349_s8 = inlined_call_operand.vmem [shape: f32[3,2,64], index: 8, kind: output, shape index: {1}]  }
   0x1 LB: > { %s1823_s28 = sadd.s32 4294967295, %s1769_s27   ;;  %p1509_p0 = scmp.ge.s32.totalorder %s1769_s27, 1  ;;  %s1769_s27 = sphi %s1817_s27, %s19_s27  }
   0x2   : > { %p266_p1 = scmp.lt.s32.totalorder %s1769_s27, 4 }
   0x4   : > { %p267_p2 = pnand %p1509_p0, %p266_p1 }
   0x5   : > { %v1751_v0 = vld [vmem:[%s2344_s3] sm:$0xff] (!%p267_p2)   ;;  %s304_s9 = smul.u32 (!%p267_p2), 24, %s1823_s28  ;;  %v1752_v1 = vld [vmem:[%s2344_s3 + $0x8] sm:$0xff] (!%p267_p2)   ;;  %v1753_v2 = vld [vmem:[%s2344_s3 + $0x10] sm:$0xff] (!%p267_p2)   ;;  %vm389_vm0 = vcmask (!%p267_p2), 523264   ;;  %p316_p4 = scmp.lt.s32.totalorder (!%p267_p2), %s1823_s28, 2 }
   0x6   : > { %270 = sbr.rel (%p267_p2) target bundleno = 747 (0x2eb), region = 48  ;;  %1638 = vmatprep.subr.bf16.mxu0 (!%p267_p2), %v1751_v0  ;;  %1734 = vmatprep.subr.bf16.mxu1 (!%p267_p2), %v1751_v0  ;;  %v1754_v3 = vld [vmem:[%s2344_s3 + $0x18] sm:$0xff] (!%p267_p2)   ;;  %v1755_v11 = vld [vmem:[%s2345_s4] sm:$0xff] (!%p267_p2)   ;;  %v1756_v22 = vld [vmem:[%s2345_s4 + $0x8] sm:$0xff] (!%p267_p2)  }
   0x7   : > { %p305_p3 = scmp.lt.s32.totalorder (!%p267_p2), %s304_s9, 71  ;;  %1639 = vmatpush3.bf16.msra.mxu0 (!%p267_p2), %v1751_v0  ;;  %1738 = vmatpush3.bf16.msra.mxu1 (!%p267_p2), %v1751_v0  ;;  %v1757_v42 = vld [vmem:[%s2345_s4 + $0x10] sm:$0xff] (!%p267_p2)   ;;  %v1758_v43 = vld [vmem:[%s2345_s4 + $0x18] sm:$0xff] (!%p267_p2)   ;;  %v1759_v44 = vld [vmem:[%s2347_s6] sm:$0xff] (!%p267_p2)  }
   0x8   : > { %1640 = vmatprep.subr.bf16.mxu0 (!%p267_p2), %v1752_v1  ;;  %1735 = vmatprep.subr.bf16.mxu1 (!%p267_p2), %v1752_v1  ;;  %v1760_v45 = vld [vmem:[%s2347_s6 + $0x8] sm:$0xff] (!%p267_p2)   ;;  %v1761_v46 = vld [vmem:[%s2347_s6 + $0x10] sm:$0xff] (!%p267_p2)   ;;  %v1982_v47 = vld [vmem:[%s2342_s1] ss:$0 sm:$0xff] (!%p267_p2) }
   0x9   : > { %v1987_v49 = vld [vmem:[%s2343_s2] ss:$0 sm:$0xff] (!%p267_p2) }
   0xb   : > { %1641 = vmatpush3.bf16.msra.mxu0 (!%p267_p2), %v1752_v1  ;;  %1739 = vmatpush3.bf16.msra.mxu1 (!%p267_p2), %v1752_v1 }
   0xc   : > { %1642 = vmatprep.subr.bf16.mxu0 (!%p267_p2), %v1753_v2  ;;  %1736 = vmatprep.subr.bf16.mxu1 (!%p267_p2), %v1753_v2 }
   0xd   : > { %s2351_s9 = smov (!%p305_p3, %s304_s9), 71 }
   0xe   : > { %s1510_s14 = sshll.u32 %s2351_s9, 3  ;;  %s1138_s9 = smul.u32 192, %s1823_s28 }
   0xf   : > { %s1845_s17 = scalar_lea.vmem %s2341_s0, %s1510_s14  ;;  %1643 = vmatpush3.bf16.msra.mxu0 %v1753_v2  ;;  %1740 = vmatpush3.bf16.msra.mxu1 %v1753_v2  ;;  %s2069_s26 = scalar_lea.vmem %s2348_s7, %s1510_s14 }
  0x10   : > { %v1851_v4 = vld [vmem:[%s1845_s17] sm:$0xff]  ;;  %v1854_v5 = vld [vmem:[%s1845_s17 + $0x8] sm:$0xff]  ;;  %v1859_v7 = vld [vmem:[%s1845_s17 + $0x10] sm:$0xff]  ;;  %1644 = vmatprep.subr.bf16.mxu0 %v1754_v3  ;;  %1737 = vmatprep.subr.bf16.mxu1 %v1754_v3  ;;  %s2353_s28 = smov (!%p316_p4, %s1823_s28), 2 }
  0x11   : > { %v345_v6 = vpack.c.bf16 %v1854_v5, %v1851_v4  ;;  %v1863_v8 = vld [vmem:[%s1845_s17 + $0x18] sm:$0xff]  ;;  %v1866_v9 = vld [vmem:[%s1845_s17 + $0x20] sm:$0xff]  ;;  %v1869_v10 = vld [vmem:[%s1845_s17 + $0x28] sm:$0xff]  ;;  %s1512_s14 = sshll.u32 %s2353_s28, 1 }
  0x12   : > { %v1875_v12 = vld [vmem:[%s1845_s17 + $0x60] sm:$0xff]  ;;  %v1878_v13 = vld [vmem:[%s1845_s17 + $0x68] sm:$0xff]  ;;  %v1881_v14 = vld [vmem:[%s1845_s17 + $0x70] sm:$0xff]  ;;  %v346_v19 = vpack.c.bf16 %v1863_v8, %v1859_v7  ;;  %v347_v20 = vpack.c.bf16 %v1869_v10, %v1866_v9  ;;  %s319_s10 = scalar_lea.vmem %s2349_s8, %s1512_s14 }
  0x13   : > { %1646 = vmatprep.mubr.msk.bf16.mxu0 %vm389_vm0, %v345_v6  ;;  %v351_v15 = vpack.c.bf16 %v1878_v13, %v1875_v12  ;;  %v1886_v16 = vld [vmem:[%s1845_s17 + $0x78] sm:$0xff]  ;;  %v1889_v17 = vld [vmem:[%s1845_s17 + $0x80] sm:$0xff]  ;;  %v1892_v18 = vld [vmem:[%s1845_s17 + $0x88] sm:$0xff]  ;;  %1645 = vmatpush3.bf16.msra.mxu0 %v1754_v3 }
  0x14   : > { %v352_v21 = vpack.c.bf16 %v1886_v16, %v1881_v14  ;;  %1741 = vmatpush3.bf16.msra.mxu1 %v1754_v3  ;;  %v353_v23 = vpack.c.bf16 %v1892_v18, %v1889_v17  ;;  %v1909_v24 = vld [vmem:[%s1845_s17 + $0x30] sm:$0xff]  ;;  %v1912_v25 = vld [vmem:[%s1845_s17 + $0x38] sm:$0xff]  ;;  %v1915_v26 = vld [vmem:[%s1845_s17 + $0x40] sm:$0xff]  ;;  %1702 = vmatprep.subr.bf16.mxu0 %v1759_v44 }
  0x15   : > { %1658 = vmatprep.mubr.msk.bf16.mxu1 %vm389_vm0, %v351_v15  ;;  %1670 = vmatprep.subr.bf16.mxu1 %v1755_v11  ;;  %v1919_v27 = vld [vmem:[%s1845_s17 + $0x48] sm:$0xff]  ;;  %v1923_v28 = vld [vmem:[%s1845_s17 + $0x90] sm:$0xff]  ;;  %v1926_v29 = vld [vmem:[%s1845_s17 + $0x98] sm:$0xff]  ;;  %v348_v32 = vpack.c.bf16 %v1912_v25, %v1909_v24 }
  0x16   : > { %1647 = vmatmul.mubr.msk.bf16.vlgmr.msra.gmra.mrb[0].mxu0 %vm389_vm0, %v346_v19  ;;  %v1929_v30 = vld [vmem:[%s1845_s17 + $0xa0] sm:$0xff]  ;;  %v1932_v31 = vld [vmem:[%s1845_s17 + $0xa8] sm:$0xff]  ;;  %v349_v33 = vpack.c.bf16 %v1919_v27, %v1915_v26  ;;  %v354_v34 = vpack.c.bf16 %v1926_v29, %v1923_v28  ;;  %v1945_v36 = vld [vmem:[%s1845_s17 + $0x50] sm:$0xff] }
  0x17   : > { %1650 = vmatprep.mubr.msk.bf16.mxu0 %vm389_vm0, %v347_v20  ;;  %1659 = vmatmul.mubr.msk.bf16.vlgmr.msra.gmra.mrb[0].mxu1 %vm389_vm0, %v352_v21  ;;  %v355_v35 = vpack.c.bf16 %v1932_v31, %v1929_v30  ;;  %v1948_v37 = vld [vmem:[%s1845_s17 + $0x58] sm:$0xff]  ;;  %v1953_v38 = vld [vmem:[%s1845_s17 + $0xb0] sm:$0xff] }
  0x18   : > { %1662 = vmatprep.mubr.msk.bf16.mxu1 %vm389_vm0, %v353_v23  ;;  %1671 = vmatpush3.bf16.msra.mxu1 %v1755_v11  ;;  %v1956_v39 = vld [vmem:[%s1845_s17 + $0xb8] sm:$0xff]  ;;  %v350_v40 = vpack.c.bf16 %v1948_v37, %v1945_v36 }
  0x19   : > { %1672 = vmatprep.subr.bf16.mxu1 %v1756_v22  ;;  %v356_v41 = vpack.c.bf16 %v1956_v39, %v1953_v38  ;;  %1703 = vmatpush3.bf16.msra.mxu0 %v1759_v44 }
  0x1a   : > { %1704 = vmatprep.subr.bf16.mxu0 %v1760_v45 }
  0x1c   : > { %1673 = vmatpush3.bf16.msra.mxu1 %v1756_v22 }
  0x1d   : > { %1674 = vmatprep.subr.bf16.mxu1 %v1757_v42  ;;  %1705 = vmatpush3.bf16.msra.mxu0 %v1760_v45 }
  0x1e   : > { %1651 = vmatmul.mubr.msk.bf16.gmra.mrb[4].mxu0 %vm389_vm0, %v348_v32  ;;  %1706 = vmatprep.subr.bf16.mxu0 %v1761_v46 }
  0x1f   : > { %1654 = vmatprep.mubr.msk.bf16.mxu0 %vm389_vm0, %v349_v33  ;;  %1663 = vmatmul.mubr.msk.bf16.gmra.mrb[4].mxu1 %vm389_vm0, %v354_v34 }
  0x20   : > { %1666 = vmatprep.mubr.msk.bf16.mxu1 %vm389_vm0, %v355_v35  ;;  %1675 = vmatpush3.bf16.msra.mxu1 %v1757_v42 }
  0x21   : > { %1676 = vmatprep.subr.bf16.mxu1 %v1758_v43  ;;  %1707 = vmatpush3.bf16.msra.mxu0 %v1761_v46 }
  0x24   : > { %1677 = vmatpush3.bf16.msra.mxu1 %v1758_v43 }
  0x26   : > { %1655 = vmatmul.mubr.msk.bf16.gmra.mrb[8].mxu0 %vm389_vm0, %v350_v40 }
  0x27   : > { %1667 = vmatmul.mubr.msk.bf16.gmra.mrb[8].mxu1 %vm389_vm0, %v356_v41 }
  0xe9   : > { %v1648_v48 = vpop.f32.mrb[0].mxu0 }
  0xea   : > { %v564_v50 = vmul.f32 %v1648_v48, %v1982_v47  ;;  %v460_v51 = vpop.f32.mrb[1].mxu0  ;;  %v1660_v52 = vpop.f32.mrb[0].mxu1 }
  0xeb   : > { %v562_v53 = vmul.f32 %v1982_v47, %v460_v51  ;;  %v1649_v54 = vpop.f32.mrb[2].mxu0  ;;  %v576_v55 = vmul.f32 %v1660_v52, %v1982_v47  ;;  %v508_v56 = vpop.f32.mrb[1].mxu1 }
  0xec   : > { %v595_v57 = vadd.f32 %v1987_v49, %v564_v50  ;;  %v565_v58 = vmul.f32 %v1649_v54, %v1982_v47  ;;  %v463_v59 = vpop.f32.mrb[3].mxu0  ;;  %v574_v60 = vmul.f32 %v1982_v47, %v508_v56  ;;  %v1661_v61 = vpop.f32.mrb[2].mxu1 }
  0xed   : > { %v593_v62 = vadd.f32 %v1987_v49, %v562_v53  ;;  %v563_v63 = vmul.f32 %v1982_v47, %v463_v59  ;;  %v607_v0 = vadd.f32 %v1987_v49, %v576_v55  ;;  %v577_v1 = vmul.f32 %v1661_v61, %v1982_v47  ;;  %v511_v2 = vpop.f32.mrb[3].mxu1 }
  0xee   : > { %v596_v3 = vadd.f32 %v1987_v49, %v565_v58  ;;  %v605_v6 = vadd.f32 %v1987_v49, %v574_v60  ;;  %v575_v11 = vmul.f32 %v1982_v47, %v511_v2  ;;  %v619_v21 = vmax.f32 %v595_v57, 0.0 }
  0xef   : > { %v594_v15 = vadd.f32 %v1987_v49, %v563_v63  ;;  %v631_v19 = vmax.f32 %v607_v0, 0.0  ;;  %v608_v20 = vadd.f32 %v1987_v49, %v577_v1  ;;  %v617_v33 = vmax.f32 %v593_v62, 0.0 }
  0xf0   : > { %v620_v22 = vmax.f32 %v596_v3, 0.0  ;;  %v629_v23 = vmax.f32 %v605_v6, 0.0  ;;  %v606_v32 = vadd.f32 %v1987_v49, %v575_v11 }
  0xf1   : > { %v618_v34 = vmax.f32 %v594_v15, 0.0  ;;  %v1652_v35 = vpop.f32.mrb[4].mxu0  ;;  %v632_v40 = vmax.f32 %v608_v20, 0.0 }
  0xf2   : > { %v642_v41 = vpack.c.bf16 %v620_v22, %v619_v21  ;;  %v568_v42 = vmul.f32 %v1652_v35, %v1982_v47  ;;  %v476_v43 = vpop.f32.mrb[5].mxu0  ;;  %v630_v44 = vmax.f32 %v606_v32, 0.0  ;;  %v1664_v45 = vpop.f32.mrb[4].mxu1 }
  0xf3   : > { %v641_v46 = vpack.c.bf16 %v618_v34, %v617_v33  ;;  %v566_v48 = vmul.f32 %v1982_v47, %v476_v43  ;;  %v1653_v50 = vpop.f32.mrb[6].mxu0  ;;  %v2007_v51 = vpack.c.bf16 %v632_v40, %v631_v19  ;;  %v580_v52 = vmul.f32 %v1664_v45, %v1982_v47  ;;  %v524_v53 = vpop.f32.mrb[5].mxu1 }
  0xf4   : > { %v599_v54 = vadd.f32 %v1987_v49, %v568_v42  ;;  %v569_v55 = vmul.f32 %v1653_v50, %v1982_v47  ;;  %v479_v56 = vpop.f32.mrb[7].mxu0  ;;  %v2012_v57 = vpack.c.bf16 %v630_v44, %v629_v23  ;;  %v578_v58 = vmul.f32 %v1982_v47, %v524_v53  ;;  %v1665_v59 = vpop.f32.mrb[6].mxu1 }
  0xf5   : > { %v597_v60 = vadd.f32 %v1987_v49, %v566_v48  ;;  %v567_v61 = vmul.f32 %v1982_v47, %v479_v56  ;;  %1678 = vmatprep.mubr.msk.bf16.mxu1 %vm389_vm0, %v641_v46  ;;  %v611_v62 = vadd.f32 %v1987_v49, %v580_v52  ;;  %v581_v63 = vmul.f32 %v1665_v59, %v1982_v47  ;;  %v527_v0 = vpop.f32.mrb[7].mxu1 }
  0xf6   : > { %v600_v1 = vadd.f32 %v1987_v49, %v569_v55  ;;  %1679 = vmatmul.mubr.msk.bf16.vlgmr.msra.gmra.mrb[12].mxu1 %vm389_vm0, %v642_v41  ;;  %v609_v2 = vadd.f32 %v1987_v49, %v578_v58  ;;  %v579_v3 = vmul.f32 %v1982_v47, %v527_v0  ;;  %v623_v19 = vmax.f32 %v599_v54, 0.0 }
  0xf7   : > { %v598_v6 = vadd.f32 %v1987_v49, %v567_v61  ;;  %v635_v11 = vmax.f32 %v611_v62, 0.0  ;;  %v612_v15 = vadd.f32 %v1987_v49, %v581_v63  ;;  %v621_v23 = vmax.f32 %v597_v60, 0.0 }
  0xf8   : > { %v624_v20 = vmax.f32 %v600_v1, 0.0  ;;  %v633_v21 = vmax.f32 %v609_v2, 0.0  ;;  %v610_v22 = vadd.f32 %v1987_v49, %v579_v3 }
  0xf9   : > { %v622_v32 = vmax.f32 %v598_v6, 0.0  ;;  %v1656_v33 = vpop.f32.mrb[8].mxu0  ;;  %v636_v34 = vmax.f32 %v612_v15, 0.0 }
  0xfa   : > { %v644_v35 = vpack.c.bf16 %v624_v20, %v623_v19  ;;  %v572_v40 = vmul.f32 %v1656_v33, %v1982_v47  ;;  %v492_v41 = vpop.f32.mrb[9].mxu0  ;;  %v634_v42 = vmax.f32 %v610_v22, 0.0  ;;  %v1668_v43 = vpop.f32.mrb[8].mxu1 }
  0xfb   : > { %v643_v44 = vpack.c.bf16 %v622_v32, %v621_v23  ;;  %v570_v45 = vmul.f32 %v1982_v47, %v492_v41  ;;  %v1657_v46 = vpop.f32.mrb[10].mxu0  ;;  %v650_v48 = vpack.c.bf16 %v636_v34, %v635_v11  ;;  %v584_v50 = vmul.f32 %v1668_v43, %v1982_v47  ;;  %v540_v52 = vpop.f32.mrb[9].mxu1 }
  0xfc   : > { %v603_v53 = vadd.f32 %v1987_v49, %v572_v40  ;;  %v573_v54 = vmul.f32 %v1657_v46, %v1982_v47  ;;  %v495_v55 = vpop.f32.mrb[11].mxu0  ;;  %v649_v56 = vpack.c.bf16 %v634_v42, %v633_v21  ;;  %v582_v58 = vmul.f32 %v1982_v47, %v540_v52  ;;  %v1669_v59 = vpop.f32.mrb[10].mxu1 }
  0xfd   : > { %v601_v60 = vadd.f32 %v1987_v49, %v570_v45  ;;  %v571_v61 = vmul.f32 %v1982_v47, %v495_v55  ;;  %1682 = vmatprep.mubr.msk.bf16.mxu1 %vm389_vm0, %v643_v44  ;;  %v615_v62 = vadd.f32 %v1987_v49, %v584_v50  ;;  %v585_v63 = vmul.f32 %v1669_v59, %v1982_v47  ;;  %v543_v0 = vpop.f32.mrb[11].mxu1 }
  0xfe   : > { %v604_v1 = vadd.f32 %v1987_v49, %v573_v54  ;;  %1683 = vmatmul.mubr.msk.bf16.gmra.mrb[16].mxu1 %vm389_vm0, %v644_v35  ;;  %v613_v2 = vadd.f32 %v1987_v49, %v582_v58  ;;  %v583_v3 = vmul.f32 %v1982_v47, %v543_v0  ;;  %v627_v19 = vmax.f32 %v603_v53, 0.0  ;;  %v1762_v47 = vld [vmem:[%s2347_s6 + $0x18] sm:$0xff]  }
  0xff   : > { %v602_v6 = vadd.f32 %v1987_v49, %v571_v61  ;;  %v639_v11 = vmax.f32 %v615_v62, 0.0  ;;  %v616_v15 = vadd.f32 %v1987_v49, %v585_v63  ;;  %v625_v23 = vmax.f32 %v601_v60, 0.0  ;;  %1708 = vmatprep.subr.bf16.mxu0 %v1762_v47 }
 0x100   : > { %v628_v20 = vmax.f32 %v604_v1, 0.0  ;;  %v637_v21 = vmax.f32 %v613_v2, 0.0  ;;  %v614_v22 = vadd.f32 %v1987_v49, %v583_v3  ;;  %1709 = vmatpush3.bf16.msra.mxu0 %v1762_v47 }
 0x101   : > { %v626_v32 = vmax.f32 %v602_v6, 0.0  ;;  %v640_v33 = vmax.f32 %v616_v15, 0.0 }
 0x102   : > { %v646_v34 = vpack.c.bf16 %v628_v20, %v627_v19  ;;  %v638_v40 = vmax.f32 %v614_v22, 0.0 }
 0x103   : > { %v645_v35 = vpack.c.bf16 %v626_v32, %v625_v23  ;;  %v652_v41 = vpack.c.bf16 %v640_v33, %v639_v11 }
 0x104   : > { %v651_v42 = vpack.c.bf16 %v638_v40, %v637_v21 }
 0x105   : > { %1686 = vmatprep.mubr.msk.bf16.mxu1 %vm389_vm0, %v645_v35 }
 0x106   : > { %1687 = vmatmul.mubr.msk.bf16.gmra.mrb[20].mxu1 %vm389_vm0, %v646_v34 }
 0x107   : > { %1690 = vmatprep.mubr.msk.bf16.mxu1 %vm389_vm0, %v2012_v57  ;;  %v2061_v57 = vld [vmem:[%s2346_s5] ss:$0 sm:$0xff] }
 0x10e   : > { %1691 = vmatmul.mubr.msk.bf16.gmra.mrb[24].mxu1 %vm389_vm0, %v2007_v51 }
 0x10f   : > { %1694 = vmatprep.mubr.msk.bf16.mxu1 %vm389_vm0, %v649_v56 }
 0x116   : > { %1695 = vmatmul.mubr.msk.bf16.gmra.mrb[28].mxu1 %vm389_vm0, %v650_v48 }
 0x117   : > { %1698 = vmatprep.mubr.msk.bf16.mxu1 %vm389_vm0, %v651_v42 }
 0x11e   : > { %1699 = vmatmul.mubr.msk.bf16.gmra.mrb[32].mxu1 %vm389_vm0, %v652_v41 }
 0x1c9   : > { %v1680_v49 = vpop.f32.mrb[12].mxu1 }
 0x1ca   : > { %v852_v51 = vadd.f32 %v1680_v49, %v1859_v7  ;;  %v755_v43 = vpop.f32.mrb[13].mxu1 }
 0x1cb   : > { %v850_v44 = vadd.f32 %v755_v43, %v1851_v4  ;;  %v1681_v45 = vpop.f32.mrb[14].mxu1 }
 0x1cc   : > { %v883_v46 = vadd.f32 %v2061_v57, %v852_v51  ;;  %v853_v48 = vadd.f32 %v1681_v45, %v1863_v8  ;;  %v758_v50 = vpop.f32.mrb[15].mxu1 }
 0x1cd   : > { %v881_v7 = vadd.f32 %v2061_v57, %v850_v44  ;;  %v851_v52 = vadd.f32 %v758_v50, %v1854_v5 }
 0x1ce   : > { %907 = vst.msk [vmem:[%s2069_s26 + $0x10] sm:$0xff] %vm389_vm0, %v883_v46  ;;  %v884_v53 = vadd.f32 %v2061_v57, %v853_v48 }
 0x1cf   : > { %905 = vst.msk [vmem:[%s2069_s26] sm:$0xff] %vm389_vm0, %v881_v7  ;;  %v882_v54 = vadd.f32 %v2061_v57, %v851_v52 }
 0x1d0   : > { %908 = vst.msk [vmem:[%s2069_s26 + $0x18] sm:$0xff] %vm389_vm0, %v884_v53  ;;  %v930_v4 = vpack.c.bf16 %v884_v53, %v883_v46 }
 0x1d1   : > { %906 = vst.msk [vmem:[%s2069_s26 + $0x8] sm:$0xff] %vm389_vm0, %v882_v54  ;;  %v929_v8 = vpack.c.bf16 %v882_v54, %v881_v7  ;;  %v1684_v55 = vpop.f32.mrb[16].mxu1 }
 0x1d2   : > { %v856_v5 = vadd.f32 %v1684_v55, %v1909_v24  ;;  %v771_v56 = vpop.f32.mrb[17].mxu1 }
 0x1d3   : > { %v854_v58 = vadd.f32 %v771_v56, %v1866_v9  ;;  %v1685_v59 = vpop.f32.mrb[18].mxu1  ;;  %1710 = vmatprep.mubr.msk.bf16.mxu0 %vm389_vm0, %v929_v8 }
 0x1d4   : > { %v887_v60 = vadd.f32 %v2061_v57, %v856_v5  ;;  %v857_v61 = vadd.f32 %v1685_v59, %v1912_v25  ;;  %v774_v62 = vpop.f32.mrb[19].mxu1  ;;  %1711 = vmatmul.mubr.msk.bf16.vlgmr.msra.gmra.mrb[12].mxu0 %vm389_vm0, %v930_v4 }
 0x1d5   : > { %v885_v63 = vadd.f32 %v2061_v57, %v854_v58  ;;  %v855_v0 = vadd.f32 %v774_v62, %v1869_v10 }
 0x1d6   : > { %911 = vst.msk [vmem:[%s2069_s26 + $0x30] sm:$0xff] %vm389_vm0, %v887_v60  ;;  %v888_v24 = vadd.f32 %v2061_v57, %v857_v61 }
 0x1d7   : > { %909 = vst.msk [vmem:[%s2069_s26 + $0x20] sm:$0xff] %vm389_vm0, %v885_v63  ;;  %v886_v9 = vadd.f32 %v2061_v57, %v855_v0 }
 0x1d8   : > { %912 = vst.msk [vmem:[%s2069_s26 + $0x38] sm:$0xff] %vm389_vm0, %v888_v24  ;;  %v932_v1 = vpack.c.bf16 %v888_v24, %v887_v60  ;;  %v2182_v24 = vstv %s1138_s9 }
 0x1d9   : > { %910 = vst.msk [vmem:[%s2069_s26 + $0x28] sm:$0xff] %vm389_vm0, %v886_v9  ;;  %v931_v25 = vpack.c.bf16 %v886_v9, %v885_v63  ;;  %v1688_v2 = vpop.f32.mrb[20].mxu1  ;;  %v1139_v63 = vlaneseq }
 0x1da   : > { %v860_v10 = vadd.f32 %v1688_v2, %v1945_v36  ;;  %v787_v3 = vpop.f32.mrb[21].mxu1 }
 0x1db   : > { %v858_v6 = vadd.f32 %v787_v3, %v1915_v26  ;;  %v1689_v11 = vpop.f32.mrb[22].mxu1  ;;  %1714 = vmatprep.mubr.msk.bf16.mxu0 %vm389_vm0, %v931_v25 }
 0x1dc   : > { %v891_v15 = vadd.f32 %v2061_v57, %v860_v10  ;;  %v861_v19 = vadd.f32 %v1689_v11, %v1948_v37  ;;  %v790_v20 = vpop.f32.mrb[23].mxu1  ;;  %1715 = vmatmul.mubr.msk.bf16.gmra.mrb[16].mxu0 %vm389_vm0, %v932_v1 }
 0x1dd   : > { %v889_v21 = vadd.f32 %v2061_v57, %v858_v6  ;;  %v859_v22 = vadd.f32 %v790_v20, %v1919_v27 }
 0x1de   : > { %915 = vst.msk [vmem:[%s2069_s26 + $0x50] sm:$0xff] %vm389_vm0, %v891_v15  ;;  %v892_v36 = vadd.f32 %v2061_v57, %v861_v19 }
 0x1df   : > { %913 = vst.msk [vmem:[%s2069_s26 + $0x40] sm:$0xff] %vm389_vm0, %v889_v21  ;;  %v890_v26 = vadd.f32 %v2061_v57, %v859_v22 }
 0x1e0   : > { %916 = vst.msk [vmem:[%s2069_s26 + $0x58] sm:$0xff] %vm389_vm0, %v892_v36  ;;  %v934_v23 = vpack.c.bf16 %v892_v36, %v891_v15 }
 0x1e1   : > { %914 = vst.msk [vmem:[%s2069_s26 + $0x48] sm:$0xff] %vm389_vm0, %v890_v26  ;;  %v933_v37 = vpack.c.bf16 %v890_v26, %v889_v21  ;;  %v1692_v32 = vpop.f32.mrb[24].mxu1 }
 0x1e2   : > { %v864_v27 = vadd.f32 %v1692_v32, %v1881_v14  ;;  %v803_v33 = vpop.f32.mrb[25].mxu1 }
 0x1e3   : > { %v862_v34 = vadd.f32 %v803_v33, %v1875_v12  ;;  %v1693_v40 = vpop.f32.mrb[26].mxu1  ;;  %1718 = vmatprep.mubr.msk.bf16.mxu0 %vm389_vm0, %v933_v37 }
 0x1e4   : > { %v895_v35 = vadd.f32 %v2061_v57, %v864_v27  ;;  %v865_v41 = vadd.f32 %v1693_v40, %v1886_v16  ;;  %v806_v42 = vpop.f32.mrb[27].mxu1  ;;  %1719 = vmatmul.mubr.msk.bf16.gmra.mrb[20].mxu0 %vm389_vm0, %v934_v23  ;;  %v1771_v40 = vmov 0.0  }
 0x1e5   : > { %v893_v47 = vadd.f32 %v2061_v57, %v862_v34  ;;  %v863_v49 = vadd.f32 %v806_v42, %v1878_v13 }
 0x1e6   : > { %919 = vst.msk [vmem:[%s2069_s26 + $0x70] sm:$0xff] %vm389_vm0, %v895_v35  ;;  %v896_v14 = vadd.f32 %v2061_v57, %v865_v41 }
 0x1e7   : > { %917 = vst.msk [vmem:[%s2069_s26 + $0x60] sm:$0xff] %vm389_vm0, %v893_v47  ;;  %v894_v12 = vadd.f32 %v2061_v57, %v863_v49 }
 0x1e8   : > { %920 = vst.msk [vmem:[%s2069_s26 + $0x78] sm:$0xff] %vm389_vm0, %v896_v14  ;;  %v936_v51 = vpack.c.bf16 %v896_v14, %v895_v35 }
 0x1e9   : > { %918 = vst.msk [vmem:[%s2069_s26 + $0x68] sm:$0xff] %vm389_vm0, %v894_v12  ;;  %v935_v16 = vpack.c.bf16 %v894_v12, %v893_v47  ;;  %v1696_v43 = vpop.f32.mrb[28].mxu1 }
 0x1ea   : > { %v868_v13 = vadd.f32 %v1696_v43, %v1923_v28  ;;  %v819_v44 = vpop.f32.mrb[29].mxu1 }
 0x1eb   : > { %v866_v45 = vadd.f32 %v819_v44, %v1889_v17  ;;  %v1697_v46 = vpop.f32.mrb[30].mxu1  ;;  %1722 = vmatprep.mubr.msk.bf16.mxu0 %vm389_vm0, %v935_v16 }
 0x1ec   : > { %v899_v48 = vadd.f32 %v2061_v57, %v868_v13  ;;  %v869_v50 = vadd.f32 %v1697_v46, %v1926_v29  ;;  %v822_v7 = vpop.f32.mrb[31].mxu1  ;;  %1723 = vmatmul.mubr.msk.bf16.gmra.mrb[24].mxu0 %vm389_vm0, %v936_v51 }
 0x1ed   : > { %v897_v52 = vadd.f32 %v2061_v57, %v866_v45  ;;  %v867_v53 = vadd.f32 %v822_v7, %v1892_v18 }
 0x1ee   : > { %923 = vst.msk [vmem:[%s2069_s26 + $0x90] sm:$0xff] %vm389_vm0, %v899_v48  ;;  %v900_v28 = vadd.f32 %v2061_v57, %v869_v50 }
 0x1ef   : > { %921 = vst.msk [vmem:[%s2069_s26 + $0x80] sm:$0xff] %vm389_vm0, %v897_v52  ;;  %v898_v17 = vadd.f32 %v2061_v57, %v867_v53 }
 0x1f0   : > { %924 = vst.msk [vmem:[%s2069_s26 + $0x98] sm:$0xff] %vm389_vm0, %v900_v28  ;;  %v938_v54 = vpack.c.bf16 %v900_v28, %v899_v48 }
 0x1f1   : > { %922 = vst.msk [vmem:[%s2069_s26 + $0x88] sm:$0xff] %vm389_vm0, %v898_v17  ;;  %v937_v29 = vpack.c.bf16 %v898_v17, %v897_v52  ;;  %v1700_v4 = vpop.f32.mrb[32].mxu1 }
 0x1f2   : > { %v872_v18 = vadd.f32 %v1700_v4, %v1953_v38  ;;  %v835_v8 = vpop.f32.mrb[33].mxu1 }
 0x1f3   : > { %v870_v55 = vadd.f32 %v835_v8, %v1929_v30  ;;  %v1701_v5 = vpop.f32.mrb[34].mxu1  ;;  %1726 = vmatprep.mubr.msk.bf16.mxu0 %vm389_vm0, %v937_v29 }
 0x1f4   : > { %v903_v56 = vadd.f32 %v2061_v57, %v872_v18  ;;  %v873_v58 = vadd.f32 %v1701_v5, %v1956_v39  ;;  %v838_v59 = vpop.f32.mrb[35].mxu1  ;;  %1727 = vmatmul.mubr.msk.bf16.gmra.mrb[28].mxu0 %vm389_vm0, %v938_v54 }
 0x1f5   : > { %v901_v60 = vadd.f32 %v2061_v57, %v870_v55  ;;  %v871_v61 = vadd.f32 %v838_v59, %v1932_v31  ;;  %v2178_v31 = vshrl.u32 %v1139_v63, 7 }
 0x1f6   : > { %927 = vst.msk [vmem:[%s2069_s26 + $0xb0] sm:$0xff] %vm389_vm0, %v903_v56  ;;  %v904_v38 = vadd.f32 %v2061_v57, %v873_v58 }
 0x1f7   : > { %925 = vst.msk [vmem:[%s2069_s26 + $0xa0] sm:$0xff] %vm389_vm0, %v901_v60  ;;  %v902_v30 = vadd.f32 %v2061_v57, %v871_v61  ;;  %v1142_v0 = vadd.s32 16, %v2178_v31  ;;  %v1143_v57 = vadd.s32 24, %v2178_v31  ;;  %v1141_v9 = vadd.s32 8, %v2178_v31 }
 0x1f8   : > { %928 = vst.msk [vmem:[%s2069_s26 + $0xb8] sm:$0xff] %vm389_vm0, %v904_v38  ;;  %v940_v62 = vpack.c.bf16 %v904_v38, %v903_v56  ;;  %v1146_v1 = vadd.s32 48, %v2178_v31  ;;  %v1165_v2 = vadd.s32 %v2182_v24, %v2178_v31  ;;  %v1144_v10 = vadd.s32 32, %v2178_v31 }
 0x1f9   : > { %926 = vst.msk [vmem:[%s2069_s26 + $0xa8] sm:$0xff] %vm389_vm0, %v902_v30  ;;  %v939_v39 = vpack.c.bf16 %v902_v30, %v901_v60  ;;  %v1167_v25 = vadd.s32 %v2182_v24, %v1142_v0  ;;  %v1147_v3 = vadd.s32 56, %v2178_v31  ;;  %v1168_v6 = vadd.s32 %v2182_v24, %v1143_v57 }
 0x1fa   : > { %v1166_v11 = vadd.s32 %v2182_v24, %v1141_v9  ;;  %v1171_v15 = vadd.s32 %v2182_v24, %v1146_v1  ;;  %v1145_v19 = vadd.s32 40, %v2178_v31  ;;  %v1150_v20 = vadd.s32 80, %v2178_v31 }
 0x1fb   : > { %1730 = vmatprep.mubr.msk.bf16.mxu0 %vm389_vm0, %v939_v39  ;;  %v1148_v21 = vadd.s32 64, %v2178_v31  ;;  %vm1191_vm1 = vcmp.lt.s32.totalorder %v1167_v25, 512  ;;  %vm1189_vm2 = vcmp.lt.s32.totalorder %v1165_v2, 512  ;;  %v1169_v22 = vadd.s32 %v2182_v24, %v1144_v10 }
 0x1fc   : > { %1731 = vmatmul.mubr.msk.bf16.gmra.mrb[32].mxu0 %vm389_vm0, %v940_v62  ;;  %v1172_v36 = vadd.s32 %v2182_v24, %v1147_v3  ;;  %v1151_v26 = vadd.s32 88, %v2178_v31  ;;  %v1149_v23 = vadd.s32 72, %v2178_v31  ;;  %vm1192_vm3 = vcmp.lt.s32.totalorder %v1168_v6, 512 }
 0x1fd   : > { %vm1190_vm4 = vcmp.lt.s32.totalorder %v1166_v11, 512  ;;  %vm1195_vm5 = vcmp.lt.s32.totalorder %v1171_v15, 512  ;;  %v1154_v37 = vadd.s32 112, %v2178_v31  ;;  %v1170_v32 = vadd.s32 %v2182_v24, %v1145_v19 }
 0x1fe   : > { %v1175_v27 = vadd.s32 %v2182_v24, %v1150_v20  ;;  %v1173_v33 = vadd.s32 %v2182_v24, %v1148_v21  ;;  %v1152_v34 = vadd.s32 96, %v2178_v31  ;;  %v1566_v35 = vsel %vm1191_vm1, 1.0, %v1771_v40 }
 0x1ff   : > { %v1564_v41 = vsel %vm1189_vm2, 1.0, %v1771_v40  ;;  %vm1193_vm6 = vcmp.lt.s32.totalorder %v1169_v22, 512  ;;  %vm1196_vm7 = vcmp.lt.s32.totalorder %v1172_v36, 512  ;;  %v1176_v42 = vadd.s32 %v2182_v24, %v1151_v26 }
 0x200   : > { %v1174_v47 = vadd.s32 %v2182_v24, %v1149_v23  ;;  %v1567_v49 = vsel %vm1192_vm3, 1.0, %v1771_v40  ;;  %v1565_v14 = vsel %vm1190_vm4, 1.0, %v1771_v40  ;;  %v1570_v12 = vsel %vm1195_vm5, 1.0, %v1771_v40 }
 0x201   : > { %v1179_v51 = vadd.s32 %v2182_v24, %v1154_v37  ;;  %vm1194_vm8 = vcmp.lt.s32.totalorder %v1170_v32, 512  ;;  %vm1199_vm9 = vcmp.lt.s32.totalorder %v1175_v27, 512  ;;  %vm1197_vm10 = vcmp.lt.s32.totalorder %v1173_v33, 512 }
 0x202   : > { %v1177_v43 = vadd.s32 %v2182_v24, %v1152_v34  ;;  %v1568_v44 = vsel %vm1193_vm6, 1.0, %v1771_v40  ;;  %v1571_v45 = vsel %vm1196_vm7, 1.0, %v1771_v40  ;;  %v1155_v46 = vadd.s32 120, %v2178_v31 }
 0x203   : > { %v1153_v48 = vadd.s32 104, %v2178_v31  ;;  %vm1200_vm11 = vcmp.lt.s32.totalorder %v1176_v42, 512  ;;  %vm1198_vm12 = vcmp.lt.s32.totalorder %v1174_v47, 512  ;;  %v1569_v28 = vsel %vm1194_vm8, 1.0, %v1771_v40 }
 0x204   : > { %v2222_v17 = vsel %vm1199_vm9, 1.0, %v1771_v40  ;;  %v2225_v54 = vsel %vm1197_vm10, 1.0, %v1771_v40  ;;  %vm1203_vm13 = vcmp.lt.s32.totalorder %v1179_v51, 512  ;;  %vm1201_vm14 = vcmp.lt.s32.totalorder %v1177_v43, 512 }
 0x205   : > { %v2228_v8 = vsel %vm1200_vm11, 1.0, %v1771_v40  ;;  %v2231_v55 = vsel %vm1198_vm12, 1.0, %v1771_v40  ;;  %v1180_v5 = vadd.s32 %v2182_v24, %v1155_v46  ;;  %v1178_v56 = vadd.s32 %v2182_v24, %v1153_v48 }
 0x206   : > { %v2238_v30 = vsel %vm1203_vm13, 1.0, %v1771_v40  ;;  %v2241_v62 = vsel %vm1201_vm14, 1.0, %v1771_v40  ;;  %v1158_v39 = vadd.s32 144, %v2178_v31  ;;  %v1156_v19 = vadd.s32 128, %v2178_v31 }
 0x207   : > { %vm1204_vm15 = vcmp.lt.s32.totalorder %v1180_v5, 512  ;;  %vm1202_vm1 = vcmp.lt.s32.totalorder %v1178_v56, 512  ;;  %vm1338_vm10 = vcmask 516096  }
 0x208   : > { %v1183_v26 = vadd.s32 %v2182_v24, %v1158_v39  ;;  %v1577_v46 = vsel %vm1202_vm1, 1.0, %v1771_v40 }
 0x20a   : > { %vm1207_vm2 = vcmp.lt.s32.totalorder %v1183_v26, 512 }
 0x2a7   : > { %v1712_v16 = vpop.f32.mrb[12].mxu0 }
 0x2a8   : > { %v1043_v13 = vpop.f32.mrb[13].mxu0  ;;  %v1263_v50 = vmul.f32 %v1712_v16, %v1566_v35 }
 0x2a9   : > { %v1261_v7 = vmul.f32 %v1564_v41, %v1043_v13  ;;  %v1713_v52 = vpop.f32.mrb[14].mxu0  ;;  %v1159_v41 = vadd.s32 152, %v2178_v31 }
 0x2aa   : > { %v1046_v53 = vpop.f32.mrb[15].mxu0  ;;  %v1264_v4 = vmul.f32 %v1713_v52, %v1567_v49  ;;  %v1342_v58 = vmul.f32 %v1263_v50, %v1263_v50  ;;  %v1288_v63 = vsel %vm389_vm0, %v1263_v50, 0.0  ;;  %v1181_v49 = vadd.s32 %v2182_v24, %v1156_v19 }
 0x2ab   : > { %v1340_v29 = vmul.f32 %v1261_v7, %v1261_v7  ;;  %v1262_v18 = vmul.f32 %v1565_v14, %v1046_v53  ;;  %v1285_v59 = vsel %vm389_vm0, %v1261_v7, 0.0  ;;  %v1157_v14 = vadd.s32 136, %v2178_v31 }
 0x2ac   : > { %v1343_v57 = vmul.f32 %v1264_v4, %v1264_v4  ;;  %v1367_v3 = vsel %vm389_vm0, %v1342_v58, 0.0  ;;  %v1290_v6 = vsel %vm389_vm0, %v1264_v4, 0.0  ;;  %v1184_v53 = vadd.s32 %v2182_v24, %v1159_v41 }
 0x2ad   : > { %v1286_v60 = vsel %vm389_vm0, %v1262_v18, 0.0  ;;  %v1341_v61 = vmul.f32 %v1262_v18, %v1262_v18  ;;  %v1364_v0 = vsel %vm389_vm0, %v1340_v29, 0.0  ;;  %vm1205_vm3 = vcmp.lt.s32.totalorder %v1181_v49, 512 }
 0x2ae   : > { %v1287_v38 = vadd.f32 %v1286_v60, %v1285_v59  ;;  %v1369_v23 = vsel %vm389_vm0, %v1343_v57, 0.0  ;;  %v1182_v60 = vadd.s32 %v2182_v24, %v1157_v14  ;;  %vm1208_vm4 = vcmp.lt.s32.totalorder %v1184_v53, 512 }
 0x2af   : > { %v1365_v9 = vsel %vm389_vm0, %v1341_v61, 0.0  ;;  %v1716_v1 = vpop.f32.mrb[16].mxu0 }
 0x2b0   : > { %v1289_v25 = vadd.f32 %v1288_v63, %v1287_v38  ;;  %v1366_v2 = vadd.f32 %v1365_v9, %v1364_v0  ;;  %v1059_v10 = vpop.f32.mrb[17].mxu0  ;;  %v1267_v21 = vmul.f32 %v1716_v1, %v1570_v12  ;;  %v1162_v9 = vadd.s32 176, %v2178_v31 }
 0x2b1   : > { %v1265_v11 = vmul.f32 %v1568_v44, %v1059_v10  ;;  %v1717_v15 = vpop.f32.mrb[18].mxu0  ;;  %vm1206_vm5 = vcmp.lt.s32.totalorder %v1182_v60, 512 }
 0x2b2   : > { %v1368_v20 = vadd.f32 %v1367_v3, %v1366_v2  ;;  %v1291_v22 = vadd.f32 %v1290_v6, %v1289_v25  ;;  %v1062_v36 = vpop.f32.mrb[19].mxu0  ;;  %v1268_v35 = vmul.f32 %v1717_v15, %v1571_v45  ;;  %v1346_v12 = vmul.f32 %v1267_v21, %v1267_v21 }
 0x2b3   : > { %v1292_v37 = vsel %vm389_vm0, %v1265_v11, 0.0  ;;  %v1344_v32 = vmul.f32 %v1265_v11, %v1265_v11  ;;  %v1266_v27 = vmul.f32 %v1569_v28, %v1062_v36  ;;  %v1296_v13 = vsel %vm389_vm0, %v1267_v21, 0.0 }
 0x2b4   : > { %v1293_v33 = vadd.f32 %v1292_v37, %v1291_v22  ;;  %v1370_v34 = vadd.f32 %v1369_v23, %v1368_v20  ;;  %v1579_v45 = vsel %vm1204_vm15, 1.0, %v1771_v40  ;;  %v1347_v48 = vmul.f32 %v1268_v35, %v1268_v35 }
 0x2b5   : > { %v1371_v42 = vsel %vm389_vm0, %v1344_v32, 0.0  ;;  %v1294_v47 = vsel %vm389_vm0, %v1266_v27, 0.0  ;;  %v1345_v43 = vmul.f32 %v1266_v27, %v1266_v27  ;;  %v1298_v28 = vsel %vm389_vm0, %v1268_v35, 0.0 }
 0x2b6   : > { %v1372_v51 = vadd.f32 %v1371_v42, %v1370_v34  ;;  %v1295_v16 = vadd.f32 %v1294_v47, %v1293_v33  ;;  %v1375_v5 = vsel %vm389_vm0, %v1346_v12, 0.0  ;;  %v1377_v0 = vsel %vm389_vm0, %v1347_v48, 0.0 }
 0x2b7   : > { %v1720_v44 = vpop.f32.mrb[20].mxu0  ;;  %v1373_v7 = vsel %vm389_vm0, %v1345_v43, 0.0  ;;  %v1582_v6 = vsel %vm1207_vm2, 1.0, %v1771_v40  ;;  %v1160_v36 = vadd.s32 160, %v2178_v31  ;;  %v2287_v27 = vadd.s32 %v2182_v24, %v1162_v9 }
 0x2b8   : > { %v1297_v50 = vadd.f32 %v1296_v13, %v1295_v16  ;;  %v1075_v52 = vpop.f32.mrb[21].mxu0  ;;  %v1374_v29 = vadd.f32 %v1373_v7, %v1372_v51  ;;  %v1271_v56 = vmul.f32 %v1720_v44, %v2222_v17  ;;  %v1163_v42 = vadd.s32 184, %v2178_v31 }
 0x2b9   : > { %v1269_v4 = vmul.f32 %v2225_v54, %v1075_v52  ;;  %v1721_v18 = vpop.f32.mrb[22].mxu0  ;;  %v1161_v43 = vadd.s32 168, %v2178_v31  ;;  %v1583_v52 = vsel %vm1208_vm4, 1.0, %v1771_v40  ;;  %v1581_v31 = vsel %vm1206_vm5, 1.0, %v1771_v40 }
 0x2ba   : > { %v1299_v58 = vadd.f32 %v1298_v28, %v1297_v50  ;;  %v1078_v59 = vpop.f32.mrb[23].mxu0  ;;  %v1376_v61 = vadd.f32 %v1375_v5, %v1374_v29  ;;  %v1272_v54 = vmul.f32 %v1721_v18, %v2228_v8  ;;  %v1350_v10 = vmul.f32 %v1271_v56, %v1271_v56 }
 0x2bb   : > { %v1300_v38 = vsel %vm389_vm0, %v1269_v4, 0.0  ;;  %v1348_v39 = vmul.f32 %v1269_v4, %v1269_v4  ;;  %v1270_v63 = vmul.f32 %v2231_v55, %v1078_v59  ;;  %v1580_v55 = vsel %vm1205_vm3, 1.0, %v1771_v40 }
 0x2bc   : > { %v1301_v57 = vadd.f32 %v1300_v38, %v1299_v58  ;;  %v1378_v1 = vadd.f32 %v1377_v0, %v1376_v61  ;;  %v1304_v11 = vsel %vm389_vm0, %v1271_v56, 0.0  ;;  %v1351_v20 = vmul.f32 %v1272_v54, %v1272_v54 }
 0x2bd   : > { %v1379_v17 = vsel %vm389_vm0, %v1348_v39, 0.0  ;;  %v1302_v25 = vsel %vm389_vm0, %v1270_v63, 0.0  ;;  %v1349_v2 = vmul.f32 %v1270_v63, %v1270_v63  ;;  %v1306_v23 = vsel %vm389_vm0, %v1272_v54, 0.0 }
 0x2be   : > { %v1303_v3 = vadd.f32 %v1302_v25, %v1301_v57  ;;  %v1380_v15 = vadd.f32 %v1379_v17, %v1378_v1  ;;  %v1383_v33 = vsel %vm389_vm0, %v1350_v10, 0.0  ;;  %v1385_v51 = vsel %vm389_vm0, %v1351_v20, 0.0 }
 0x2bf   : > { %v1381_v8 = vsel %vm389_vm0, %v1349_v2, 0.0  ;;  %v1724_v19 = vpop.f32.mrb[24].mxu0  ;;  %v1185_v28 = vadd.s32 %v2182_v24, %v1160_v36  ;;  %vm1211_vm6 = vcmp.lt.s32.totalorder %v2287_v27, 512  ;;  %v1186_v58 = vadd.s32 %v2182_v24, %v1161_v43 }
 0x2c0   : > { %v1305_v21 = vadd.f32 %v1304_v11, %v1303_v3  ;;  %v1091_v22 = vpop.f32.mrb[25].mxu0  ;;  %v1382_v26 = vadd.f32 %v1381_v8, %v1380_v15  ;;  %v1275_v34 = vmul.f32 %v1724_v19, %v2238_v30  ;;  %v1188_v39 = vadd.s32 %v2182_v24, %v1163_v42 }
 0x2c1   : > { %v1273_v37 = vmul.f32 %v2241_v62, %v1091_v22  ;;  %v1725_v32 = vpop.f32.mrb[26].mxu0  ;;  %vm1209_vm7 = vcmp.lt.s32.totalorder %v1185_v28, 512  ;;  %vm1210_vm8 = vcmp.lt.s32.totalorder %v1186_v58, 512  ;;  %v1586_v36 = vsel %vm1211_vm6, 1.0, %v1771_v40 }
 0x2c2   : > { %v1307_v35 = vadd.f32 %v1306_v23, %v1305_v21  ;;  %v1094_v41 = vpop.f32.mrb[27].mxu0  ;;  %v1384_v47 = vadd.f32 %v1383_v33, %v1382_v26  ;;  %v1276_v16 = vmul.f32 %v1725_v32, %v1579_v45  ;;  %v1354_v50 = vmul.f32 %v1275_v34, %v1275_v34 }
 0x2c3   : > { %v1308_v49 = vsel %vm389_vm0, %v1273_v37, 0.0  ;;  %v1352_v14 = vmul.f32 %v1273_v37, %v1273_v37  ;;  %v1274_v12 = vmul.f32 %v1577_v46, %v1094_v41  ;;  %v1312_v46 = vsel %vm389_vm0, %v1275_v34, 0.0 }
 0x2c4   : > { %v1309_v62 = vadd.f32 %v1308_v49, %v1307_v35  ;;  %v1386_v13 = vadd.f32 %v1385_v51, %v1384_v47  ;;  %v1355_v18 = vmul.f32 %v1276_v16, %v1276_v16  ;;  %v1314_v53 = vsel %vm389_vm0, %v1276_v16, 0.0 }
 0x2c5   : > { %v1387_v44 = vsel %vm389_vm0, %v1352_v14, 0.0  ;;  %v1310_v30 = vsel %vm389_vm0, %v1274_v12, 0.0  ;;  %v1353_v48 = vmul.f32 %v1274_v12, %v1274_v12  ;;  %v1391_v63 = vsel %vm389_vm0, %v1354_v50, 0.0 }
 0x2c6   : > { %v1311_v7 = vadd.f32 %v1310_v30, %v1309_v62  ;;  %v1388_v29 = vadd.f32 %v1387_v44, %v1386_v13  ;;  %v1393_v25 = vsel %vm389_vm0, %v1355_v18, 0.0  ;;  %v1584_v8 = vsel %vm1209_vm7, 1.0, %v1771_v40 }
 0x2c7   : > { %v1389_v45 = vsel %vm389_vm0, %v1353_v48, 0.0  ;;  %v1728_v4 = vpop.f32.mrb[28].mxu0  ;;  %vm1212_vm9 = vcmp.lt.s32.totalorder %v1188_v39, 512  ;;  %v1585_v32 = vsel %vm1210_vm8, 1.0, %v1771_v40 }
 0x2c8   : > { %v1313_v5 = vadd.f32 %v1312_v46, %v1311_v7  ;;  %v1107_v56 = vpop.f32.mrb[29].mxu0  ;;  %v1390_v59 = vadd.f32 %v1389_v45, %v1388_v29  ;;  %v1279_v0 = vmul.f32 %v1728_v4, %v1582_v6  ;;  %v1587_v42 = vsel %vm1212_vm9, 1.0, %v1771_v40 }
 0x2c9   : > { %v1277_v61 = vmul.f32 %v1580_v55, %v1107_v56  ;;  %v1729_v38 = vpop.f32.mrb[30].mxu0 }
 0x2ca   : > { %v1315_v57 = vadd.f32 %v1314_v53, %v1313_v5  ;;  %v1110_v60 = vpop.f32.mrb[31].mxu0  ;;  %v1392_v54 = vadd.f32 %v1391_v63, %v1390_v59  ;;  %v1280_v10 = vmul.f32 %v1729_v38, %v1583_v52  ;;  %v1358_v6 = vmul.f32 %v1279_v0, %v1279_v0 }
 0x2cb   : > { %v1316_v9 = vsel %vm389_vm0, %v1277_v61, 0.0  ;;  %v1356_v1 = vmul.f32 %v1277_v61, %v1277_v61  ;;  %v1278_v17 = vmul.f32 %v1581_v31, %v1110_v60  ;;  %v1320_v19 = vsel %vm389_vm0, %v1279_v0, 0.0 }
 0x2cc   : > { %v1317_v2 = vadd.f32 %v1316_v9, %v1315_v57  ;;  %v1394_v3 = vadd.f32 %v1393_v25, %v1392_v54  ;;  %v1359_v23 = vmul.f32 %v1280_v10, %v1280_v10  ;;  %v1322_v33 = vsel %vm389_vm0, %v1280_v10, 0.0 }
 0x2cd   : > { %v1395_v55 = vsel %vm389_vm0, %v1356_v1, 0.0  ;;  %v1318_v24 = vsel %vm389_vm0, %v1278_v17, 0.0  ;;  %v1357_v11 = vmul.f32 %v1278_v17, %v1278_v17  ;;  %v1399_v47 = vsel %vm389_vm0, %v1358_v6, 0.0 }
 0x2ce   : > { %v1319_v15 = vadd.f32 %v1318_v24, %v1317_v2  ;;  %v1396_v20 = vadd.f32 %v1395_v55, %v1394_v3  ;;  %v1401_v43 = vsel %vm389_vm0, %v1359_v23, 0.0 }
 0x2cf   : > { %v1397_v21 = vsel %vm389_vm0, %v1357_v11, 0.0  ;;  %v1732_v22 = vpop.f32.mrb[32].mxu0 }
 0x2d0   : > { %v1321_v26 = vadd.f32 %v1320_v19, %v1319_v15  ;;  %v1123_v37 = vpop.f32.mrb[33].mxu0  ;;  %v1398_v34 = vadd.f32 %v1397_v21, %v1396_v20  ;;  %v1283_v49 = vmul.f32 %v1732_v22, %v1586_v36 }
 0x2d1   : > { %v1281_v35 = vmul.f32 %v1584_v8, %v1123_v37  ;;  %v1733_v41 = vpop.f32.mrb[34].mxu0 }
 0x2d2   : > { %v1323_v14 = vadd.f32 %v1322_v33, %v1321_v26  ;;  %v1126_v12 = vpop.f32.mrb[35].mxu0  ;;  %v1400_v27 = vadd.f32 %v1399_v47, %v1398_v34  ;;  %v1284_v44 = vmul.f32 %v1733_v41, %v1587_v42  ;;  %v1362_v7 = vmul.f32 %v1283_v49, %v1283_v49 }
 0x2d3   : > { %v1324_v51 = vsel %vm389_vm0, %v1281_v35, 0.0  ;;  %v1360_v62 = vmul.f32 %v1281_v35, %v1281_v35  ;;  %v1282_v16 = vmul.f32 %v1585_v32, %v1126_v12  ;;  %v1328_v28 = vsel %vm389_vm0, %v1283_v49, 0.0 }
 0x2d4   : > { %v1325_v13 = vadd.f32 %v1324_v51, %v1323_v14  ;;  %v1402_v30 = vadd.f32 %v1401_v43, %v1400_v27  ;;  %v1363_v45 = vmul.f32 %v1284_v44, %v1284_v44  ;;  %v1330_v31 = vsel %vm389_vm0, %v1284_v44, 0.0 }
 0x2d5   : > { %v1403_v48 = vsel %vm389_vm0, %v1360_v62, 0.0  ;;  %v1326_v40 = vsel %vm389_vm0, %v1282_v16, 0.0  ;;  %v1361_v50 = vmul.f32 %v1282_v16, %v1282_v16  ;;  %v1407_v5 = vsel %vm389_vm0, %v1362_v7, 0.0 }
 0x2d6   : > { %v1327_v52 = vadd.f32 %v1326_v40, %v1325_v13  ;;  %v1404_v46 = vadd.f32 %v1403_v48, %v1402_v30  ;;  %v1409_v53 = vsel %vm389_vm0, %v1363_v45, 0.0 }
 0x2d7   : > { %v1405_v29 = vsel %vm389_vm0, %v1361_v50, 0.0 }
 0x2d8   : > { %v1329_v4 = vadd.f32 %v1328_v28, %v1327_v52  ;;  %v1406_v18 = vadd.f32 %v1405_v29, %v1404_v46 }
 0x2da   : > { %v1331_v56 = vadd.f32 %v1330_v31, %v1329_v4  ;;  %v1408_v58 = vadd.f32 %v1407_v5, %v1406_v18 }
 0x2dc   : > { %v1332_v59 = vrot.slane %v1331_v56, 4  ;;  %v1410_v61 = vadd.f32 %v1409_v53, %v1408_v58 }
 0x2de   : > { %v1333_v38 = vadd.f32 %v1332_v59, %v1331_v56  ;;  %v1411_v39 = vrot.slane %v1410_v61, 4 }
 0x2e0   : > { %v1334_v63 = vrot.slane %v1333_v38, 2  ;;  %v1412_v0 = vadd.f32 %v1411_v39, %v1410_v61 }
 0x2e2   : > { %v1335_v57 = vadd.f32 %v1334_v63, %v1333_v38  ;;  %v1413_v60 = vrot.slane %v1412_v0, 2 }
 0x2e4   : > { %v1336_v54 = vrot.slane %v1335_v57, 1  ;;  %v1414_v9 = vadd.f32 %v1413_v60, %v1412_v0 }
 0x2e6   : > { %v1337_v1 = vadd.f32 %v1336_v54, %v1335_v57  ;;  %v1415_v17 = vrot.slane %v1414_v9, 1 }
 0x2e8   : > { %1339 = vst.msk [vmem:[%s319_s10] sm:$0x1] %vm1338_vm10, %v1337_v1  ;;  %v1416_v25 = vadd.f32 %v1415_v17, %v1414_v9 }
 0x2ea   : > { %1417 = vst.msk [vmem:[%s319_s10 + $0x1] sm:$0x1] %vm1338_vm10, %v1416_v25 }
 0x2eb PF: > { %s19_s27 = sadd.s32 1, %s1769_s27  }
 0x2ec   : > { %p16_p5 = scmp.ge.s32.totalorder %s19_s27, 5  }
 0x2ee   :  { %18 = sbr.rel (!%p16_p5) target bundleno = 1 (0x1), region = 90 }

// kernel: cond_generator_forward.18
= control target key start
LH: loop header
LB: loop body
LE: loop exit
PB: predicated region body
PF: predicated region fallthrough
CT: control target
= control target key end

     0   :  { %s1388_s18 = smov 0   ;;  %s1713_s0 = inlined_call_operand.vmem [shape: bf16[576,128], index: 0, kind: input, shape index: {}]   ;;  %s1714_s1 = inlined_call_operand.vmem [shape: bf16[128,64], index: 1, kind: input, shape index: {}]   ;;  %s1715_s2 = inlined_call_operand.vmem [shape: f32[1,64], index: 2, kind: input, shape index: {}]   ;;  %s1716_s3 = inlined_call_operand.vmem [shape: bf16[64,64], index: 3, kind: input, shape index: {}]   ;;  %s1717_s4 = inlined_call_operand.vmem [shape: f32[576,64], index: 4, kind: output, shape index: {0}]   ;;  %s1718_s5 = inlined_call_operand.vmem [shape: f32[3,2,64], index: 5, kind: output, shape index: {1}]  }
   0x1 LB: > { %s1394_s19 = sadd.s32 4294967295, %s1355_s18   ;;  %p1141_p0 = scmp.ge.s32.totalorder %s1355_s18, 1  ;;  %s1355_s18 = sphi %s1388_s18, %s16_s18  }
   0x2   : > { %p191_p1 = scmp.lt.s32.totalorder %s1355_s18, 4 }
   0x4   : > { %p192_p2 = pnand %p1141_p0, %p191_p1 }
   0x5   : > { %v1325_v0 = vld [vmem:[%s1714_s1] sm:$0xff] (!%p192_p2)   ;;  %s223_s22 = smul.u32 (!%p192_p2), 24, %s1394_s19  ;;  %v1326_v1 = vld [vmem:[%s1714_s1 + $0x8] sm:$0xff] (!%p192_p2)   ;;  %v1327_v2 = vld [vmem:[%s1714_s1 + $0x10] sm:$0xff] (!%p192_p2)   ;;  %vm536_vm0 = vcmask (!%p192_p2), 523264   ;;  %p235_p4 = scmp.lt.s32.totalorder (!%p192_p2), %s1394_s19, 2 }
   0x6   : > { %195 = sbr.rel (%p192_p2) target bundleno = 537 (0x219), region = 36  ;;  %1244 = vmatprep.subr.bf16.mxu0 (!%p192_p2), %v1325_v0  ;;  %v1328_v3 = vld [vmem:[%s1714_s1 + $0x18] sm:$0xff] (!%p192_p2)   ;;  %v1329_v5 = vld [vmem:[%s1714_s1 + $0x20] sm:$0xff] (!%p192_p2)   ;;  %v1330_v6 = vld [vmem:[%s1714_s1 + $0x28] sm:$0xff] (!%p192_p2)  }
   0x7   : > { %p224_p3 = scmp.lt.s32.totalorder (!%p192_p2), %s223_s22, 71  ;;  %1245 = vmatpush3.bf16.msra.mxu0 (!%p192_p2), %v1325_v0  ;;  %v1331_v7 = vld [vmem:[%s1714_s1 + $0x30] sm:$0xff] (!%p192_p2)   ;;  %v1345_v8 = vld [vmem:[%s1716_s3] sm:$0xff] (!%p192_p2)   ;;  %v1346_v9 = vld [vmem:[%s1716_s3 + $0x8] sm:$0xff] (!%p192_p2)  }
   0x8   : > { %1246 = vmatprep.subr.bf16.mxu0 (!%p192_p2), %v1326_v1  ;;  %1284 = vmatprep.subr.bf16.mxu1 (!%p192_p2), %v1345_v8  ;;  %v1332_v10 = vld [vmem:[%s1714_s1 + $0x38] sm:$0xff] (!%p192_p2)   ;;  %v1347_v22 = vld [vmem:[%s1716_s3 + $0x10] sm:$0xff] (!%p192_p2)   ;;  %v1459_v24 = vld [vmem:[%s1715_s2] ss:$0 sm:$0xff] (!%p192_p2) }
   0x9   : > { %1285 = vmatpush3.bf16.msra.mxu1 (!%p192_p2), %v1345_v8  ;;  %v1348_v23 = vld [vmem:[%s1716_s3 + $0x18] sm:$0xff] (!%p192_p2)  }
   0xa   : > { %1286 = vmatprep.subr.bf16.mxu1 (!%p192_p2), %v1346_v9 }
   0xb   : > { %1247 = vmatpush3.bf16.msra.mxu0 (!%p192_p2), %v1326_v1 }
   0xc   : > { %1248 = vmatprep.subr.bf16.mxu0 (!%p192_p2), %v1327_v2 }
   0xd   : > { %s1720_s22 = smov (!%p224_p3, %s223_s22), 71  ;;  %1287 = vmatpush3.bf16.msra.mxu1 %v1346_v9 }
   0xe   : > { %s1142_s27 = sshll.u32 %s1720_s22, 2  ;;  %1288 = vmatprep.subr.bf16.mxu1 %v1347_v22 }
   0xf   : > { %s1417_s7 = scalar_lea.vmem %s1713_s0, %s1142_s27  ;;  %1249 = vmatpush3.bf16.msra.mxu0 %v1327_v2  ;;  %s1143_s27 = sshll.u32 %s1720_s22, 3 }
  0x10   : > { %v1333_v4 = vld [vmem:[%s1417_s7] sm:$0xff]   ;;  %1250 = vmatprep.subr.bf16.mxu0 %v1328_v3  ;;  %v1334_v11 = vld [vmem:[%s1417_s7 + $0x8] sm:$0xff]   ;;  %v1335_v12 = vld [vmem:[%s1417_s7 + $0x10] sm:$0xff]   ;;  %s770_s22 = smul.u32 192, %s1394_s19  ;;  %s1722_s19 = smov (!%p235_p4, %s1394_s19), 2 }
  0x11   : > { %1260 = vmatprep.mubr.bf16.mxu0 %v1333_v4  ;;  %v1336_v13 = vld [vmem:[%s1417_s7 + $0x18] sm:$0xff]   ;;  %v1337_v14 = vld [vmem:[%s1417_s7 + $0x20] sm:$0xff]   ;;  %v1338_v15 = vld [vmem:[%s1417_s7 + $0x28] sm:$0xff]   ;;  %1289 = vmatpush3.bf16.msra.mxu1 %v1347_v22  ;;  %s1144_s8 = sshll.u32 %s1722_s19, 1 }
  0x12   : > { %v1339_v16 = vld [vmem:[%s1417_s7 + $0x30] sm:$0xff]   ;;  %v1340_v17 = vld [vmem:[%s1417_s7 + $0x38] sm:$0xff]   ;;  %v1341_v18 = vld [vmem:[%s1417_s7 + $0x40] sm:$0xff]   ;;  %1290 = vmatprep.subr.bf16.mxu1 %v1348_v23  ;;  %s238_s11 = scalar_lea.vmem %s1718_s5, %s1144_s8 }
  0x13   : > { %1251 = vmatpush3.bf16.msra.mxu0 %v1328_v3  ;;  %v1342_v19 = vld [vmem:[%s1417_s7 + $0x48] sm:$0xff]   ;;  %v1343_v20 = vld [vmem:[%s1417_s7 + $0x50] sm:$0xff]   ;;  %v1344_v21 = vld [vmem:[%s1417_s7 + $0x58] sm:$0xff]   ;;  %s1464_s7 = scalar_lea.vmem %s1717_s4, %s1143_s27 }
  0x14   : > { %1252 = vmatprep.subr.bf16.mxu0 %v1329_v5 }
  0x15   : > { %1291 = vmatpush3.bf16.msra.mxu1 %v1348_v23 }
  0x17   : > { %1253 = vmatpush3.bf16.msra.mxu0 %v1329_v5 }
  0x18   : > { %1254 = vmatprep.subr.bf16.mxu0 %v1330_v6 }
  0x1b   : > { %1255 = vmatpush3.bf16.msra.mxu0 %v1330_v6 }
  0x1c   : > { %1256 = vmatprep.subr.bf16.mxu0 %v1331_v7 }
  0x1f   : > { %1257 = vmatpush3.bf16.msra.mxu0 %v1331_v7 }
  0x20   : > { %1258 = vmatprep.subr.bf16.mxu0 %v1332_v10 }
  0x23   : > { %1259 = vmatpush3.bf16.msra.mxu0 %v1332_v10 }
  0x26   : > { %1261 = vmatmul.mubr.bf16.vlgmr.msra.gmra.mrb[0].mxu0 %v1334_v11 }
  0x27   : > { %1264 = vmatprep.mubr.bf16.mxu0 %v1335_v12 }
  0x2e   : > { %1265 = vmatmul.mubr.bf16.gmra.mrb[4].mxu0 %v1336_v13 }
  0x2f   : > { %1268 = vmatprep.mubr.bf16.mxu0 %v1337_v14 }
  0x36   : > { %1269 = vmatmul.mubr.bf16.gmra.mrb[8].mxu0 %v1338_v15 }
  0x37   : > { %1272 = vmatprep.mubr.bf16.mxu0 %v1339_v16 }
  0x3e   : > { %1273 = vmatmul.mubr.bf16.gmra.mrb[12].mxu0 %v1340_v17 }
  0x3f   : > { %1276 = vmatprep.mubr.bf16.mxu0 %v1341_v18 }
  0x46   : > { %1277 = vmatmul.mubr.bf16.gmra.mrb[16].mxu0 %v1342_v19 }
  0x47   : > { %1280 = vmatprep.mubr.bf16.mxu0 %v1343_v20 }
  0x4e   : > { %1281 = vmatmul.mubr.bf16.gmra.mrb[20].mxu0 %v1344_v21  ;;  %v771_v21 = vlaneseq }
  0x50   : > { %v1550_v22 = vshrl.u32 %v771_v21, 7 }
  0x52   : > { %v774_v23 = vadd.s32 16, %v1550_v22 }
  0xf9   : > { %v1262_v25 = vpop.f32.mrb[0].mxu0 }
  0xfa   : > { %v450_v26 = vadd.f32 %v1262_v25, %v1459_v24  ;;  %v441_v27 = vpop.f32.mrb[1].mxu0  ;;  %v1554_v25 = vstv %s770_s22 }
  0xfb   : > { %v442_v28 = vadd.f32 %v1459_v24, %v441_v27  ;;  %v1263_v29 = vpop.f32.mrb[2].mxu0  ;;  %v778_v27 = vadd.s32 48, %v1550_v22 }
  0xfc   : > { %539 = vst.msk [vmem:[%s1464_s7 + $0x10] sm:$0xff] %vm536_vm0, %v450_v26  ;;  %v453_v30 = vadd.f32 %v1263_v29, %v1459_v24  ;;  %v444_v31 = vpop.f32.mrb[3].mxu0  ;;  %v797_v29 = vadd.s32 %v1554_v25, %v1550_v22 }
  0xfd   : > { %537 = vst.msk [vmem:[%s1464_s7] sm:$0xff] %vm536_vm0, %v442_v28  ;;  %v445_v32 = vadd.f32 %v1459_v24, %v444_v31  ;;  %v779_v31 = vadd.s32 56, %v1550_v22 }
  0xfe   : > { %540 = vst.msk [vmem:[%s1464_s7 + $0x18] sm:$0xff] %vm536_vm0, %v453_v30  ;;  %v562_v33 = vpack.c.bf16 %v453_v30, %v450_v26  ;;  %v773_v26 = vadd.s32 8, %v1550_v22  ;;  %v776_v30 = vadd.s32 32, %v1550_v22  ;;  %vm821_vm2 = vcmp.lt.s32.totalorder %v797_v29, 512 }
  0xff   : > { %538 = vst.msk [vmem:[%s1464_s7 + $0x8] sm:$0xff] %vm536_vm0, %v445_v32  ;;  %v561_v34 = vpack.c.bf16 %v445_v32, %v442_v28  ;;  %v799_v28 = vadd.s32 %v1554_v25, %v774_v23 }
 0x101   : > { %v1266_v35 = vpop.f32.mrb[4].mxu0  ;;  %1292 = vmatprep.mubr.msk.bf16.mxu1 %vm536_vm0, %v561_v34  ;;  %v803_v34 = vadd.s32 %v1554_v25, %v778_v27  ;;  %vm823_vm1 = vcmp.lt.s32.totalorder %v799_v28, 512 }
 0x102   : > { %v466_v36 = vadd.f32 %v1266_v35, %v1459_v24  ;;  %v457_v37 = vpop.f32.mrb[5].mxu0  ;;  %1293 = vmatmul.mubr.msk.bf16.vlgmr.msra.gmra.mrb[0].mxu1 %vm536_vm0, %v562_v33  ;;  %v798_v33 = vadd.s32 %v1554_v25, %v773_v26  ;;  %v777_v35 = vadd.s32 40, %v1550_v22 }
 0x103   : > { %v458_v38 = vadd.f32 %v1459_v24, %v457_v37  ;;  %v1267_v39 = vpop.f32.mrb[6].mxu0  ;;  %v780_v37 = vadd.s32 64, %v1550_v22  ;;  %vm827_vm5 = vcmp.lt.s32.totalorder %v803_v34, 512 }
 0x104   : > { %543 = vst.msk [vmem:[%s1464_s7 + $0x30] sm:$0xff] %vm536_vm0, %v466_v36  ;;  %v469_v40 = vadd.f32 %v1267_v39, %v1459_v24  ;;  %v460_v41 = vpop.f32.mrb[7].mxu0  ;;  %v804_v39 = vadd.s32 %v1554_v25, %v779_v31  ;;  %vm822_vm4 = vcmp.lt.s32.totalorder %v798_v33, 512 }
 0x105   : > { %541 = vst.msk [vmem:[%s1464_s7 + $0x20] sm:$0xff] %vm536_vm0, %v458_v38  ;;  %v461_v42 = vadd.f32 %v1459_v24, %v460_v41  ;;  %v781_v41 = vadd.s32 72, %v1550_v22 }
 0x106   : > { %544 = vst.msk [vmem:[%s1464_s7 + $0x38] sm:$0xff] %vm536_vm0, %v469_v40  ;;  %v564_v43 = vpack.c.bf16 %v469_v40, %v466_v36  ;;  %v782_v36 = vadd.s32 80, %v1550_v22  ;;  %v783_v40 = vadd.s32 88, %v1550_v22  ;;  %vm828_vm7 = vcmp.lt.s32.totalorder %v804_v39, 512 }
 0x107   : > { %542 = vst.msk [vmem:[%s1464_s7 + $0x28] sm:$0xff] %vm536_vm0, %v461_v42  ;;  %v563_v44 = vpack.c.bf16 %v461_v42, %v458_v38  ;;  %v801_v38 = vadd.s32 %v1554_v25, %v776_v30  ;;  %v786_v42 = vadd.s32 112, %v1550_v22 }
 0x109   : > { %v1270_v45 = vpop.f32.mrb[8].mxu0  ;;  %1296 = vmatprep.mubr.msk.bf16.mxu1 %vm536_vm0, %v563_v44  ;;  %v807_v44 = vadd.s32 %v1554_v25, %v782_v36  ;;  %vm825_vm6 = vcmp.lt.s32.totalorder %v801_v38, 512 }
 0x10a   : > { %v482_v46 = vadd.f32 %v1270_v45, %v1459_v24  ;;  %v473_v47 = vpop.f32.mrb[9].mxu0  ;;  %1297 = vmatmul.mubr.msk.bf16.gmra.mrb[4].mxu1 %vm536_vm0, %v564_v43  ;;  %v802_v43 = vadd.s32 %v1554_v25, %v777_v35  ;;  %v805_v45 = vadd.s32 %v1554_v25, %v780_v37  ;;  %v788_v35 = vadd.s32 128, %v1550_v22 }
 0x10b   : > { %v474_v48 = vadd.f32 %v1459_v24, %v473_v47  ;;  %v1271_v49 = vpop.f32.mrb[10].mxu0  ;;  %v1357_v47 = vmov 0.0   ;;  %vm831_vm9 = vcmp.lt.s32.totalorder %v807_v44, 512 }
 0x10c   : > { %547 = vst.msk [vmem:[%s1464_s7 + $0x50] sm:$0xff] %vm536_vm0, %v482_v46  ;;  %v485_v50 = vadd.f32 %v1271_v49, %v1459_v24  ;;  %v476_v51 = vpop.f32.mrb[11].mxu0  ;;  %v1182_v49 = vsel %vm821_vm2, 1.0, %v1357_v47  ;;  %vm826_vm8 = vcmp.lt.s32.totalorder %v802_v43, 512  ;;  %vm829_vm10 = vcmp.lt.s32.totalorder %v805_v45, 512 }
 0x10d   : > { %545 = vst.msk [vmem:[%s1464_s7 + $0x40] sm:$0xff] %vm536_vm0, %v474_v48  ;;  %v477_v52 = vadd.f32 %v1459_v24, %v476_v51  ;;  %v806_v51 = vadd.s32 %v1554_v25, %v781_v41 }
 0x10e   : > { %548 = vst.msk [vmem:[%s1464_s7 + $0x58] sm:$0xff] %vm536_vm0, %v485_v50  ;;  %v566_v53 = vpack.c.bf16 %v485_v50, %v482_v46  ;;  %v784_v46 = vadd.s32 96, %v1550_v22  ;;  %v808_v50 = vadd.s32 %v1554_v25, %v783_v40 }
 0x10f   : > { %546 = vst.msk [vmem:[%s1464_s7 + $0x48] sm:$0xff] %vm536_vm0, %v477_v52  ;;  %v565_v54 = vpack.c.bf16 %v477_v52, %v474_v48  ;;  %v1184_v48 = vsel %vm823_vm1, 1.0, %v1357_v47  ;;  %vm830_vm12 = vcmp.lt.s32.totalorder %v806_v51, 512 }
 0x110   : > { %vm832_vm11 = vcmp.lt.s32.totalorder %v808_v50, 512 }
 0x111   : > { %v1274_v55 = vpop.f32.mrb[12].mxu0  ;;  %1300 = vmatprep.mubr.msk.bf16.mxu1 %vm536_vm0, %v565_v54  ;;  %v1188_v54 = vsel %vm827_vm5, 1.0, %v1357_v47 }
 0x112   : > { %v498_v56 = vadd.f32 %v1274_v55, %v1459_v24  ;;  %v489_v57 = vpop.f32.mrb[13].mxu0  ;;  %1301 = vmatmul.mubr.msk.bf16.gmra.mrb[8].mxu1 %vm536_vm0, %v566_v53  ;;  %v1183_v53 = vsel %vm822_vm4, 1.0, %v1357_v47  ;;  %v811_v55 = vadd.s32 %v1554_v25, %v786_v42 }
 0x113   : > { %v490_v58 = vadd.f32 %v1459_v24, %v489_v57  ;;  %v1275_v59 = vpop.f32.mrb[14].mxu0  ;;  %v809_v57 = vadd.s32 %v1554_v25, %v784_v46 }
 0x114   : > { %551 = vst.msk [vmem:[%s1464_s7 + $0x70] sm:$0xff] %vm536_vm0, %v498_v56  ;;  %v501_v60 = vadd.f32 %v1275_v59, %v1459_v24  ;;  %v492_v61 = vpop.f32.mrb[15].mxu0  ;;  %v1186_v59 = vsel %vm825_vm6, 1.0, %v1357_v47  ;;  %vm835_vm13 = vcmp.lt.s32.totalorder %v811_v55, 512 }
 0x115   : > { %549 = vst.msk [vmem:[%s1464_s7 + $0x60] sm:$0xff] %vm536_vm0, %v490_v58  ;;  %v493_v62 = vadd.f32 %v1459_v24, %v492_v61  ;;  %v787_v61 = vadd.s32 120, %v1550_v22  ;;  %vm833_vm14 = vcmp.lt.s32.totalorder %v809_v57, 512 }
 0x116   : > { %552 = vst.msk [vmem:[%s1464_s7 + $0x78] sm:$0xff] %vm536_vm0, %v501_v60  ;;  %v568_v63 = vpack.c.bf16 %v501_v60, %v498_v56  ;;  %v1189_v60 = vsel %vm828_vm7, 1.0, %v1357_v47 }
 0x117   : > { %550 = vst.msk [vmem:[%s1464_s7 + $0x68] sm:$0xff] %vm536_vm0, %v493_v62  ;;  %v567_v0 = vpack.c.bf16 %v493_v62, %v490_v58  ;;  %v785_v62 = vadd.s32 104, %v1550_v22 }
 0x119   : > { %v1278_v1 = vpop.f32.mrb[16].mxu0  ;;  %1304 = vmatprep.mubr.msk.bf16.mxu1 %vm536_vm0, %v567_v0 }
 0x11a   : > { %v514_v2 = vadd.f32 %v1278_v1, %v1459_v24  ;;  %v505_v3 = vpop.f32.mrb[17].mxu0  ;;  %1305 = vmatmul.mubr.msk.bf16.gmra.mrb[12].mxu1 %vm536_vm0, %v568_v63 }
 0x11b   : > { %v506_v4 = vadd.f32 %v1459_v24, %v505_v3  ;;  %v1279_v5 = vpop.f32.mrb[18].mxu0  ;;  %v1187_v3 = vsel %vm826_vm8, 1.0, %v1357_v47 }
 0x11c   : > { %555 = vst.msk [vmem:[%s1464_s7 + $0x90] sm:$0xff] %vm536_vm0, %v514_v2  ;;  %v517_v6 = vadd.f32 %v1279_v5, %v1459_v24  ;;  %v508_v7 = vpop.f32.mrb[19].mxu0  ;;  %v1597_v5 = vsel %vm829_vm10, 1.0, %v1357_v47  ;;  %vm970_vm10 = vcmask 516096  }
 0x11d   : > { %553 = vst.msk [vmem:[%s1464_s7 + $0x80] sm:$0xff] %vm536_vm0, %v506_v4  ;;  %v509_v8 = vadd.f32 %v1459_v24, %v508_v7 }
 0x11e   : > { %556 = vst.msk [vmem:[%s1464_s7 + $0x98] sm:$0xff] %vm536_vm0, %v517_v6  ;;  %v570_v9 = vpack.c.bf16 %v517_v6, %v514_v2 }
 0x11f   : > { %554 = vst.msk [vmem:[%s1464_s7 + $0x88] sm:$0xff] %vm536_vm0, %v509_v8  ;;  %v569_v10 = vpack.c.bf16 %v509_v8, %v506_v4  ;;  %v1594_v4 = vsel %vm831_vm9, 1.0, %v1357_v47 }
 0x121   : > { %v1282_v11 = vpop.f32.mrb[20].mxu0  ;;  %1308 = vmatprep.mubr.msk.bf16.mxu1 %vm536_vm0, %v569_v10  ;;  %v1603_v10 = vsel %vm830_vm12, 1.0, %v1357_v47 }
 0x122   : > { %v530_v12 = vadd.f32 %v1282_v11, %v1459_v24  ;;  %v521_v13 = vpop.f32.mrb[21].mxu0  ;;  %1309 = vmatmul.mubr.msk.bf16.gmra.mrb[16].mxu1 %vm536_vm0, %v570_v9  ;;  %v1600_v9 = vsel %vm832_vm11, 1.0, %v1357_v47  ;;  %v812_v11 = vadd.s32 %v1554_v25, %v787_v61 }
 0x123   : > { %v522_v14 = vadd.f32 %v1459_v24, %v521_v13  ;;  %v1283_v15 = vpop.f32.mrb[22].mxu0 }
 0x124   : > { %559 = vst.msk [vmem:[%s1464_s7 + $0xb0] sm:$0xff] %vm536_vm0, %v530_v12  ;;  %v533_v16 = vadd.f32 %v1283_v15, %v1459_v24  ;;  %v524_v17 = vpop.f32.mrb[23].mxu0  ;;  %vm836_vm15 = vcmp.lt.s32.totalorder %v812_v11, 512 }
 0x125   : > { %557 = vst.msk [vmem:[%s1464_s7 + $0xa0] sm:$0xff] %vm536_vm0, %v522_v14  ;;  %v525_v18 = vadd.f32 %v1459_v24, %v524_v17  ;;  %v775_v24 = vadd.s32 24, %v1550_v22 }
 0x126   : > { %560 = vst.msk [vmem:[%s1464_s7 + $0xb8] sm:$0xff] %vm536_vm0, %v533_v16  ;;  %v572_v19 = vpack.c.bf16 %v533_v16, %v530_v12  ;;  %v810_v12 = vadd.s32 %v1554_v25, %v785_v62 }
 0x127   : > { %558 = vst.msk [vmem:[%s1464_s7 + $0xa8] sm:$0xff] %vm536_vm0, %v525_v18  ;;  %v571_v20 = vpack.c.bf16 %v525_v18, %v522_v14  ;;  %v800_v32 = vadd.s32 %v1554_v25, %v775_v24  ;;  %v1610_v18 = vsel %vm835_vm13, 1.0, %v1357_v47 }
 0x128   : > { %vm834_vm1 = vcmp.lt.s32.totalorder %v810_v12, 512 }
 0x129   : > { %1312 = vmatprep.mubr.msk.bf16.mxu1 %vm536_vm0, %v571_v20  ;;  %vm824_vm3 = vcmp.lt.s32.totalorder %v800_v32, 512  ;;  %v790_v20 = vadd.s32 144, %v1550_v22  ;;  %v1195_v61 = vsel %vm834_vm1, 1.0, %v1357_v47 }
 0x12a   : > { %1313 = vmatmul.mubr.msk.bf16.gmra.mrb[20].mxu1 %vm536_vm0, %v572_v19  ;;  %v1185_v52 = vsel %vm824_vm3, 1.0, %v1357_v47  ;;  %v1613_v19 = vsel %vm833_vm14, 1.0, %v1357_v47 }
 0x12b   : > { %v815_v40 = vadd.s32 %v1554_v25, %v790_v20 }
 0x12d   : > { %vm839_vm2 = vcmp.lt.s32.totalorder %v815_v40, 512 }
 0x1d5   : > { %v1294_v56 = vpop.f32.mrb[0].mxu1 }
 0x1d6   : > { %v675_v58 = vpop.f32.mrb[1].mxu1  ;;  %v895_v63 = vmul.f32 %v1294_v56, %v1184_v48 }
 0x1d7   : > { %v893_v0 = vmul.f32 %v1182_v49, %v675_v58  ;;  %v1295_v1 = vpop.f32.mrb[2].mxu1  ;;  %v791_v49 = vadd.s32 152, %v1550_v22 }
 0x1d8   : > { %v678_v2 = vpop.f32.mrb[3].mxu1  ;;  %v896_v7 = vmul.f32 %v1295_v1, %v1185_v52  ;;  %v974_v13 = vmul.f32 %v895_v63, %v895_v63  ;;  %v920_v21 = vsel %vm536_vm0, %v895_v63, 0.0  ;;  %v813_v52 = vadd.s32 %v1554_v25, %v788_v35 }
 0x1d9   : > { %v972_v6 = vmul.f32 %v893_v0, %v893_v0  ;;  %v894_v8 = vmul.f32 %v1183_v53, %v678_v2  ;;  %v917_v14 = vsel %vm536_vm0, %v893_v0, 0.0  ;;  %v789_v53 = vadd.s32 136, %v1550_v22 }
 0x1da   : > { %v975_v24 = vmul.f32 %v896_v7, %v896_v7  ;;  %v999_v31 = vsel %vm536_vm0, %v974_v13, 0.0  ;;  %v922_v32 = vsel %vm536_vm0, %v896_v7, 0.0  ;;  %v816_v2 = vadd.s32 %v1554_v25, %v791_v49 }
 0x1db   : > { %v918_v15 = vsel %vm536_vm0, %v894_v8, 0.0  ;;  %v973_v16 = vmul.f32 %v894_v8, %v894_v8  ;;  %v996_v23 = vsel %vm536_vm0, %v972_v6, 0.0  ;;  %vm837_vm3 = vcmp.lt.s32.totalorder %v813_v52, 512 }
 0x1dc   : > { %v919_v17 = vadd.f32 %v918_v15, %v917_v14  ;;  %v1001_v41 = vsel %vm536_vm0, %v975_v24, 0.0  ;;  %v814_v15 = vadd.s32 %v1554_v25, %v789_v53  ;;  %vm840_vm4 = vcmp.lt.s32.totalorder %v816_v2, 512 }
 0x1dd   : > { %v997_v26 = vsel %vm536_vm0, %v973_v16, 0.0  ;;  %v1298_v27 = vpop.f32.mrb[4].mxu1 }
 0x1de   : > { %v921_v28 = vadd.f32 %v920_v21, %v919_v17  ;;  %v998_v29 = vadd.f32 %v997_v26, %v996_v23  ;;  %v691_v30 = vpop.f32.mrb[5].mxu1  ;;  %v899_v37 = vmul.f32 %v1298_v27, %v1188_v54  ;;  %v794_v26 = vadd.s32 176, %v1550_v22 }
 0x1df   : > { %v897_v33 = vmul.f32 %v1186_v59, %v691_v30  ;;  %v1299_v34 = vpop.f32.mrb[6].mxu1  ;;  %vm838_vm5 = vcmp.lt.s32.totalorder %v814_v15, 512 }
 0x1e0   : > { %v1000_v36 = vadd.f32 %v999_v31, %v998_v29  ;;  %v923_v38 = vadd.f32 %v922_v32, %v921_v28  ;;  %v694_v39 = vpop.f32.mrb[7].mxu1  ;;  %v900_v48 = vmul.f32 %v1299_v34, %v1189_v60  ;;  %v978_v54 = vmul.f32 %v899_v37, %v899_v37 }
 0x1e1   : > { %v924_v42 = vsel %vm536_vm0, %v897_v33, 0.0  ;;  %v976_v43 = vmul.f32 %v897_v33, %v897_v33  ;;  %v898_v44 = vmul.f32 %v1187_v3, %v694_v39  ;;  %v928_v58 = vsel %vm536_vm0, %v899_v37, 0.0 }
 0x1e2   : > { %v925_v45 = vadd.f32 %v924_v42, %v923_v38  ;;  %v1002_v46 = vadd.f32 %v1001_v41, %v1000_v36  ;;  %v1197_v60 = vsel %vm836_vm15, 1.0, %v1357_v47  ;;  %v979_v62 = vmul.f32 %v900_v48, %v900_v48 }
 0x1e3   : > { %v1003_v50 = vsel %vm536_vm0, %v976_v43, 0.0  ;;  %v926_v51 = vsel %vm536_vm0, %v898_v44, 0.0  ;;  %v977_v57 = vmul.f32 %v898_v44, %v898_v44  ;;  %v930_v3 = vsel %vm536_vm0, %v900_v48, 0.0 }
 0x1e4   : > { %v1004_v55 = vadd.f32 %v1003_v50, %v1002_v46  ;;  %v927_v56 = vadd.f32 %v926_v51, %v925_v45  ;;  %v1007_v11 = vsel %vm536_vm0, %v978_v54, 0.0  ;;  %v1009_v23 = vsel %vm536_vm0, %v979_v62, 0.0 }
 0x1e5   : > { %v1302_v59 = vpop.f32.mrb[8].mxu1  ;;  %v1005_v0 = vsel %vm536_vm0, %v977_v57, 0.0  ;;  %v1200_v32 = vsel %vm839_vm2, 1.0, %v1357_v47  ;;  %v792_v39 = vadd.s32 160, %v1550_v22  ;;  %v1659_v44 = vadd.s32 %v1554_v25, %v794_v26 }
 0x1e6   : > { %v929_v63 = vadd.f32 %v928_v58, %v927_v56  ;;  %v707_v1 = vpop.f32.mrb[9].mxu1  ;;  %v1006_v6 = vadd.f32 %v1005_v0, %v1004_v55  ;;  %v903_v12 = vmul.f32 %v1302_v59, %v1594_v4  ;;  %v795_v50 = vadd.s32 184, %v1550_v22 }
 0x1e7   : > { %v901_v7 = vmul.f32 %v1597_v5, %v707_v1  ;;  %v1303_v8 = vpop.f32.mrb[10].mxu1  ;;  %v793_v57 = vadd.s32 168, %v1550_v22  ;;  %v1201_v1 = vsel %vm840_vm4, 1.0, %v1357_v47  ;;  %v1199_v22 = vsel %vm838_vm5, 1.0, %v1357_v47 }
 0x1e8   : > { %v931_v13 = vadd.f32 %v930_v3, %v929_v63  ;;  %v710_v14 = vpop.f32.mrb[11].mxu1  ;;  %v1008_v16 = vadd.f32 %v1007_v11, %v1006_v6  ;;  %v904_v5 = vmul.f32 %v1303_v8, %v1600_v9  ;;  %v982_v30 = vmul.f32 %v903_v12, %v903_v12 }
 0x1e9   : > { %v932_v17 = vsel %vm536_vm0, %v901_v7, 0.0  ;;  %v980_v20 = vmul.f32 %v901_v7, %v901_v7  ;;  %v902_v21 = vmul.f32 %v1603_v10, %v710_v14  ;;  %v1198_v10 = vsel %vm837_vm3, 1.0, %v1357_v47 }
 0x1ea   : > { %v933_v24 = vadd.f32 %v932_v17, %v931_v13  ;;  %v1010_v27 = vadd.f32 %v1009_v23, %v1008_v16  ;;  %v936_v33 = vsel %vm536_vm0, %v903_v12, 0.0  ;;  %v983_v36 = vmul.f32 %v904_v5, %v904_v5 }
 0x1eb   : > { %v1011_v4 = vsel %vm536_vm0, %v980_v20, 0.0  ;;  %v934_v28 = vsel %vm536_vm0, %v902_v21, 0.0  ;;  %v981_v29 = vmul.f32 %v902_v21, %v902_v21  ;;  %v938_v41 = vsel %vm536_vm0, %v904_v5, 0.0 }
 0x1ec   : > { %v935_v31 = vadd.f32 %v934_v28, %v933_v24  ;;  %v1012_v34 = vadd.f32 %v1011_v4, %v1010_v27  ;;  %v1015_v45 = vsel %vm536_vm0, %v982_v30, 0.0  ;;  %v1017_v55 = vsel %vm536_vm0, %v983_v36, 0.0 }
 0x1ed   : > { %v1013_v9 = vsel %vm536_vm0, %v981_v29, 0.0  ;;  %v1306_v35 = vpop.f32.mrb[12].mxu1  ;;  %v817_v3 = vadd.s32 %v1554_v25, %v792_v39  ;;  %vm843_vm6 = vcmp.lt.s32.totalorder %v1659_v44, 512  ;;  %v818_v13 = vadd.s32 %v1554_v25, %v793_v57 }
 0x1ee   : > { %v937_v37 = vadd.f32 %v936_v33, %v935_v31  ;;  %v723_v38 = vpop.f32.mrb[13].mxu1  ;;  %v1014_v40 = vadd.f32 %v1013_v9, %v1012_v34  ;;  %v907_v46 = vmul.f32 %v1306_v35, %v1610_v18  ;;  %v820_v20 = vadd.s32 %v1554_v25, %v795_v50 }
 0x1ef   : > { %v905_v42 = vmul.f32 %v1613_v19, %v723_v38  ;;  %v1307_v43 = vpop.f32.mrb[14].mxu1  ;;  %vm841_vm7 = vcmp.lt.s32.totalorder %v817_v3, 512  ;;  %vm842_vm8 = vcmp.lt.s32.totalorder %v818_v13, 512  ;;  %v1204_v39 = vsel %vm843_vm6, 1.0, %v1357_v47 }
 0x1f0   : > { %v939_v48 = vadd.f32 %v938_v41, %v937_v37  ;;  %v726_v49 = vpop.f32.mrb[15].mxu1  ;;  %v1016_v51 = vadd.f32 %v1015_v45, %v1014_v40  ;;  %v908_v56 = vmul.f32 %v1307_v43, %v1197_v60  ;;  %v986_v63 = vmul.f32 %v907_v46, %v907_v46 }
 0x1f1   : > { %v940_v52 = vsel %vm536_vm0, %v905_v42, 0.0  ;;  %v984_v53 = vmul.f32 %v905_v42, %v905_v42  ;;  %v906_v54 = vmul.f32 %v1195_v61, %v726_v49  ;;  %v944_v61 = vsel %vm536_vm0, %v907_v46, 0.0 }
 0x1f2   : > { %v941_v19 = vadd.f32 %v940_v52, %v939_v48  ;;  %v1018_v58 = vadd.f32 %v1017_v55, %v1016_v51  ;;  %v987_v8 = vmul.f32 %v908_v56, %v908_v56  ;;  %v946_v2 = vsel %vm536_vm0, %v908_v56, 0.0 }
 0x1f3   : > { %v1019_v59 = vsel %vm536_vm0, %v984_v53, 0.0  ;;  %v942_v18 = vsel %vm536_vm0, %v906_v54, 0.0  ;;  %v985_v62 = vmul.f32 %v906_v54, %v906_v54  ;;  %v1023_v21 = vsel %vm536_vm0, %v986_v63, 0.0 }
 0x1f4   : > { %v943_v0 = vadd.f32 %v942_v18, %v941_v19  ;;  %v1020_v6 = vadd.f32 %v1019_v59, %v1018_v58  ;;  %v1025_v28 = vsel %vm536_vm0, %v987_v8, 0.0  ;;  %v1202_v9 = vsel %vm841_vm7, 1.0, %v1357_v47 }
 0x1f5   : > { %v1021_v60 = vsel %vm536_vm0, %v985_v62, 0.0  ;;  %v1310_v7 = vpop.f32.mrb[16].mxu1  ;;  %vm844_vm9 = vcmp.lt.s32.totalorder %v820_v20, 512  ;;  %v1203_v43 = vsel %vm842_vm8, 1.0, %v1357_v47 }
 0x1f6   : > { %v945_v11 = vadd.f32 %v944_v61, %v943_v0  ;;  %v739_v12 = vpop.f32.mrb[17].mxu1  ;;  %v1022_v14 = vadd.f32 %v1021_v60, %v1020_v6  ;;  %v911_v23 = vmul.f32 %v1310_v7, %v1200_v32  ;;  %v1205_v50 = vsel %vm844_vm9, 1.0, %v1357_v47 }
 0x1f7   : > { %v909_v16 = vmul.f32 %v1198_v10, %v739_v12  ;;  %v1311_v17 = vpop.f32.mrb[18].mxu1 }
 0x1f8   : > { %v947_v24 = vadd.f32 %v946_v2, %v945_v11  ;;  %v742_v15 = vpop.f32.mrb[19].mxu1  ;;  %v1024_v5 = vadd.f32 %v1023_v21, %v1022_v14  ;;  %v912_v30 = vmul.f32 %v1311_v17, %v1201_v1  ;;  %v990_v32 = vmul.f32 %v911_v23, %v911_v23 }
 0x1f9   : > { %v948_v26 = vsel %vm536_vm0, %v909_v16, 0.0  ;;  %v988_v27 = vmul.f32 %v909_v16, %v909_v16  ;;  %v910_v4 = vmul.f32 %v1199_v22, %v742_v15  ;;  %v952_v35 = vsel %vm536_vm0, %v911_v23, 0.0 }
 0x1fa   : > { %v949_v29 = vadd.f32 %v948_v26, %v947_v24  ;;  %v1026_v31 = vadd.f32 %v1025_v28, %v1024_v5  ;;  %v991_v41 = vmul.f32 %v912_v30, %v912_v30  ;;  %v954_v45 = vsel %vm536_vm0, %v912_v30, 0.0 }
 0x1fb   : > { %v1027_v10 = vsel %vm536_vm0, %v988_v27, 0.0  ;;  %v950_v25 = vsel %vm536_vm0, %v910_v4, 0.0  ;;  %v989_v33 = vmul.f32 %v910_v4, %v910_v4  ;;  %v1031_v51 = vsel %vm536_vm0, %v990_v32, 0.0 }
 0x1fc   : > { %v951_v34 = vadd.f32 %v950_v25, %v949_v29  ;;  %v1028_v36 = vadd.f32 %v1027_v10, %v1026_v31  ;;  %v1033_v57 = vsel %vm536_vm0, %v991_v41, 0.0 }
 0x1fd   : > { %v1029_v37 = vsel %vm536_vm0, %v989_v33, 0.0  ;;  %v1314_v38 = vpop.f32.mrb[20].mxu1 }
 0x1fe   : > { %v953_v40 = vadd.f32 %v952_v35, %v951_v34  ;;  %v755_v42 = vpop.f32.mrb[21].mxu1  ;;  %v1030_v46 = vadd.f32 %v1029_v37, %v1028_v36  ;;  %v915_v52 = vmul.f32 %v1314_v38, %v1204_v39 }
 0x1ff   : > { %v913_v48 = vmul.f32 %v1202_v9, %v755_v42  ;;  %v1315_v49 = vpop.f32.mrb[22].mxu1 }
 0x200   : > { %v955_v53 = vadd.f32 %v954_v45, %v953_v40  ;;  %v758_v54 = vpop.f32.mrb[23].mxu1  ;;  %v1032_v44 = vadd.f32 %v1031_v51, %v1030_v46  ;;  %v916_v59 = vmul.f32 %v1315_v49, %v1205_v50  ;;  %v994_v0 = vmul.f32 %v915_v52, %v915_v52 }
 0x201   : > { %v956_v55 = vsel %vm536_vm0, %v913_v48, 0.0  ;;  %v992_v19 = vmul.f32 %v913_v48, %v913_v48  ;;  %v914_v56 = vmul.f32 %v1203_v43, %v758_v54  ;;  %v960_v3 = vsel %vm536_vm0, %v915_v52, 0.0 }
 0x202   : > { %v957_v58 = vadd.f32 %v956_v55, %v955_v53  ;;  %v1034_v18 = vadd.f32 %v1033_v57, %v1032_v44  ;;  %v995_v60 = vmul.f32 %v916_v59, %v916_v59  ;;  %v962_v22 = vsel %vm536_vm0, %v916_v59, 0.0 }
 0x203   : > { %v1035_v62 = vsel %vm536_vm0, %v992_v19, 0.0  ;;  %v958_v47 = vsel %vm536_vm0, %v914_v56, 0.0  ;;  %v993_v63 = vmul.f32 %v914_v56, %v914_v56  ;;  %v1039_v11 = vsel %vm536_vm0, %v994_v0, 0.0 }
 0x204   : > { %v959_v1 = vadd.f32 %v958_v47, %v957_v58  ;;  %v1036_v61 = vadd.f32 %v1035_v62, %v1034_v18  ;;  %v1041_v2 = vsel %vm536_vm0, %v995_v60, 0.0 }
 0x205   : > { %v1037_v6 = vsel %vm536_vm0, %v993_v63, 0.0 }
 0x206   : > { %v961_v7 = vadd.f32 %v960_v3, %v959_v1  ;;  %v1038_v8 = vadd.f32 %v1037_v6, %v1036_v61 }
 0x208   : > { %v963_v12 = vadd.f32 %v962_v22, %v961_v7  ;;  %v1040_v13 = vadd.f32 %v1039_v11, %v1038_v8 }
 0x20a   : > { %v964_v14 = vrot.slane %v963_v12, 4  ;;  %v1042_v16 = vadd.f32 %v1041_v2, %v1040_v13 }
 0x20c   : > { %v965_v17 = vadd.f32 %v964_v14, %v963_v12  ;;  %v1043_v20 = vrot.slane %v1042_v16, 4 }
 0x20e   : > { %v966_v21 = vrot.slane %v965_v17, 2  ;;  %v1044_v23 = vadd.f32 %v1043_v20, %v1042_v16 }
 0x210   : > { %v967_v24 = vadd.f32 %v966_v21, %v965_v17  ;;  %v1045_v15 = vrot.slane %v1044_v23, 2 }
 0x212   : > { %v968_v5 = vrot.slane %v967_v24, 1  ;;  %v1046_v26 = vadd.f32 %v1045_v15, %v1044_v23 }
 0x214   : > { %v969_v27 = vadd.f32 %v968_v5, %v967_v24  ;;  %v1047_v4 = vrot.slane %v1046_v26, 1 }
 0x216   : > { %971 = vst.msk [vmem:[%s238_s11] sm:$0x1] %vm970_vm10, %v969_v27  ;;  %v1048_v28 = vadd.f32 %v1047_v4, %v1046_v26 }
 0x218   : > { %1049 = vst.msk [vmem:[%s238_s11 + $0x1] sm:$0x1] %vm970_vm10, %v1048_v28 }
 0x219 PF: > { %s16_s18 = sadd.s32 1, %s1355_s18  }
 0x21a   : > { %p13_p5 = scmp.ge.s32.totalorder %s16_s18, 5  }
 0x21c   :  { %15 = sbr.rel (!%p13_p5) target bundleno = 1 (0x1), region = 78 }

// kernel: cond_generator_forward.34
= control target key start
LH: loop header
LB: loop body
LE: loop exit
PB: predicated region body
PF: predicated region fallthrough
CT: control target
= control target key end

     0   :  { %s1119_s21 = smov 0   ;;  %s1450_s0 = inlined_call_operand.vmem [shape: f32[576,64], index: 0, kind: input, shape index: {}]   ;;  %s1451_s1 = inlined_call_operand.vmem [shape: f32[1,64], index: 1, kind: input, shape index: {}]   ;;  %s1452_s2 = inlined_call_operand.vmem [shape: f32[1,64], index: 2, kind: input, shape index: {}]   ;;  %s1453_s3 = inlined_call_operand.vmem [shape: bf16[64,64], index: 3, kind: input, shape index: {}]   ;;  %s1454_s4 = inlined_call_operand.vmem [shape: bf16[64,64], index: 4, kind: input, shape index: {}]   ;;  %s1455_s5 = inlined_call_operand.vmem [shape: f32[1,64], index: 5, kind: input, shape index: {}]   ;;  %s1456_s6 = inlined_call_operand.vmem [shape: f32[576,64], index: 6, kind: output, shape index: {}]  }
   0x1 LB: > { %s920_s22 = sadd.s32 4294967295, %s1082_s21   ;;  %p924_p0 = scmp.ge.s32.totalorder %s1082_s21, 1  ;;  %s1082_s21 = sphi %s1119_s21, %s16_s21  }
   0x2   : > { %p213_p1 = scmp.lt.s32.totalorder %s1082_s21, 4 }
   0x4   : > { %p214_p2 = pnand %p924_p0, %p213_p1 }
   0x5   : > { %v1068_v0 = vld [vmem:[%s1453_s3] sm:$0xff] (!%p214_p2)   ;;  %s243_s25 = smul.u32 (!%p214_p2), 24, %s920_s22  ;;  %v1069_v1 = vld [vmem:[%s1453_s3 + $0x8] sm:$0xff] (!%p214_p2)   ;;  %v1070_v2 = vld [vmem:[%s1453_s3 + $0x10] sm:$0xff] (!%p214_p2)   ;;  %vm324_vm0 = vcmask (!%p214_p2), 523264  }
   0x6   : > { %217 = sbr.rel (%p214_p2) target bundleno = 506 (0x1fa), region = 44  ;;  %996 = vmatprep.subr.bf16.mxu0 (!%p214_p2), %v1068_v0  ;;  %v1072_v3 = vld [vmem:[%s1454_s4] sm:$0xff] (!%p214_p2)   ;;  %v1071_v4 = vld [vmem:[%s1453_s3 + $0x18] sm:$0xff] (!%p214_p2)   ;;  %v1073_v41 = vld [vmem:[%s1454_s4 + $0x8] sm:$0xff] (!%p214_p2)  }
   0x7   : > { %p244_p3 = scmp.lt.s32.totalorder (!%p214_p2), %s243_s25, 71  ;;  %997 = vmatpush3.bf16.msra.mxu0 (!%p214_p2), %v1068_v0  ;;  %1028 = vmatprep.subr.bf16.mxu1 (!%p214_p2), %v1072_v3  ;;  %v1074_v42 = vld [vmem:[%s1454_s4 + $0x10] sm:$0xff] (!%p214_p2)   ;;  %v1075_v43 = vld [vmem:[%s1454_s4 + $0x18] sm:$0xff] (!%p214_p2)   ;;  %v1272_v44 = vld [vmem:[%s1451_s1] ss:$0 sm:$0xff] (!%p214_p2) }
   0x8   : > { %998 = vmatprep.subr.bf16.mxu0 (!%p214_p2), %v1069_v1  ;;  %1029 = vmatpush3.bf16.msra.mxu1 (!%p214_p2), %v1072_v3  ;;  %v1277_v46 = vld [vmem:[%s1452_s2] ss:$0 sm:$0xff] (!%p214_p2) }
   0x9   : > { %1030 = vmatprep.subr.bf16.mxu1 (!%p214_p2), %v1073_v41 }
   0xb   : > { %999 = vmatpush3.bf16.msra.mxu0 (!%p214_p2), %v1069_v1 }
   0xc   : > { %1000 = vmatprep.subr.bf16.mxu0 (!%p214_p2), %v1070_v2  ;;  %1031 = vmatpush3.bf16.msra.mxu1 (!%p214_p2), %v1073_v41 }
   0xd   : > { %s1458_s25 = smov (!%p244_p3, %s243_s25), 71  ;;  %1032 = vmatprep.subr.bf16.mxu1 %v1074_v42 }
   0xe   : > { %s925_s8 = sshll.u32 %s1458_s25, 3 }
   0xf   : > { %s1147_s11 = scalar_lea.vmem %s1450_s0, %s925_s8  ;;  %1001 = vmatpush3.bf16.msra.mxu0 %v1070_v2  ;;  %s1350_s30 = scalar_lea.vmem %s1456_s6, %s925_s8 }
  0x10   : > { %v1153_v5 = vld [vmem:[%s1147_s11] sm:$0xff]  ;;  %v1156_v6 = vld [vmem:[%s1147_s11 + $0x8] sm:$0xff]  ;;  %v1162_v8 = vld [vmem:[%s1147_s11 + $0x10] sm:$0xff]  ;;  %1002 = vmatprep.subr.bf16.mxu0 %v1071_v4  ;;  %1033 = vmatpush3.bf16.msra.mxu1 %v1074_v42 }
  0x11   : > { %v280_v7 = vpack.c.bf16 %v1156_v6, %v1153_v5  ;;  %v1165_v9 = vld [vmem:[%s1147_s11 + $0x18] sm:$0xff]  ;;  %v1168_v10 = vld [vmem:[%s1147_s11 + $0x20] sm:$0xff]  ;;  %v1171_v11 = vld [vmem:[%s1147_s11 + $0x28] sm:$0xff]  ;;  %1034 = vmatprep.subr.bf16.mxu1 %v1075_v43 }
  0x12   : > { %v281_v12 = vpack.c.bf16 %v1165_v9, %v1162_v8  ;;  %v282_v13 = vpack.c.bf16 %v1171_v11, %v1168_v10  ;;  %v1180_v14 = vld [vmem:[%s1147_s11 + $0x30] sm:$0xff]  ;;  %v1183_v15 = vld [vmem:[%s1147_s11 + $0x38] sm:$0xff]  ;;  %v1186_v16 = vld [vmem:[%s1147_s11 + $0x40] sm:$0xff] }
  0x13   : > { %1004 = vmatprep.mubr.msk.bf16.mxu0 %vm324_vm0, %v280_v7  ;;  %1003 = vmatpush3.bf16.msra.mxu0 %v1071_v4  ;;  %v1189_v17 = vld [vmem:[%s1147_s11 + $0x48] sm:$0xff]  ;;  %v283_v18 = vpack.c.bf16 %v1183_v15, %v1180_v14  ;;  %v1198_v20 = vld [vmem:[%s1147_s11 + $0x50] sm:$0xff]  ;;  %v1201_v21 = vld [vmem:[%s1147_s11 + $0x58] sm:$0xff] }
  0x14   : > { %v284_v19 = vpack.c.bf16 %v1189_v17, %v1186_v16  ;;  %v1204_v22 = vld [vmem:[%s1147_s11 + $0x60] sm:$0xff]  ;;  %v1207_v23 = vld [vmem:[%s1147_s11 + $0x68] sm:$0xff]  ;;  %v285_v24 = vpack.c.bf16 %v1201_v21, %v1198_v20  ;;  %v1216_v26 = vld [vmem:[%s1147_s11 + $0x70] sm:$0xff]  ;;  %1035 = vmatpush3.bf16.msra.mxu1 %v1075_v43 }
  0x15   : > { %v286_v25 = vpack.c.bf16 %v1207_v23, %v1204_v22  ;;  %v1219_v27 = vld [vmem:[%s1147_s11 + $0x78] sm:$0xff]  ;;  %v1222_v28 = vld [vmem:[%s1147_s11 + $0x80] sm:$0xff]  ;;  %v1225_v29 = vld [vmem:[%s1147_s11 + $0x88] sm:$0xff] }
  0x16   : > { %1005 = vmatmul.mubr.msk.bf16.vlgmr.msra.gmra.mrb[0].mxu0 %vm324_vm0, %v281_v12  ;;  %v287_v30 = vpack.c.bf16 %v1219_v27, %v1216_v26  ;;  %v288_v31 = vpack.c.bf16 %v1225_v29, %v1222_v28  ;;  %v1234_v32 = vld [vmem:[%s1147_s11 + $0x90] sm:$0xff]  ;;  %v1237_v33 = vld [vmem:[%s1147_s11 + $0x98] sm:$0xff]  ;;  %v1240_v34 = vld [vmem:[%s1147_s11 + $0xa0] sm:$0xff] }
  0x17   : > { %1008 = vmatprep.mubr.msk.bf16.mxu0 %vm324_vm0, %v282_v13  ;;  %v1243_v35 = vld [vmem:[%s1147_s11 + $0xa8] sm:$0xff]  ;;  %v289_v36 = vpack.c.bf16 %v1237_v33, %v1234_v32  ;;  %v1252_v38 = vld [vmem:[%s1147_s11 + $0xb0] sm:$0xff]  ;;  %v1255_v39 = vld [vmem:[%s1147_s11 + $0xb8] sm:$0xff] }
  0x18   : > { %v290_v37 = vpack.c.bf16 %v1243_v35, %v1240_v34  ;;  %v291_v40 = vpack.c.bf16 %v1255_v39, %v1252_v38 }
  0x1e   : > { %1009 = vmatmul.mubr.msk.bf16.gmra.mrb[4].mxu0 %vm324_vm0, %v283_v18 }
  0x1f   : > { %1012 = vmatprep.mubr.msk.bf16.mxu0 %vm324_vm0, %v284_v19 }
  0x26   : > { %1013 = vmatmul.mubr.msk.bf16.gmra.mrb[8].mxu0 %vm324_vm0, %v285_v24 }
  0x27   : > { %1016 = vmatprep.mubr.msk.bf16.mxu0 %vm324_vm0, %v286_v25 }
  0x2e   : > { %1017 = vmatmul.mubr.msk.bf16.gmra.mrb[12].mxu0 %vm324_vm0, %v287_v30 }
  0x2f   : > { %1020 = vmatprep.mubr.msk.bf16.mxu0 %vm324_vm0, %v288_v31 }
  0x36   : > { %1021 = vmatmul.mubr.msk.bf16.gmra.mrb[16].mxu0 %vm324_vm0, %v289_v36 }
  0x37   : > { %1024 = vmatprep.mubr.msk.bf16.mxu0 %vm324_vm0, %v290_v37 }
  0x3e   : > { %1025 = vmatmul.mubr.msk.bf16.gmra.mrb[20].mxu0 %vm324_vm0, %v291_v40 }
  0xe9   : > { %v1006_v45 = vpop.f32.mrb[0].mxu0 }
  0xea   : > { %v499_v47 = vmul.f32 %v1006_v45, %v1272_v44  ;;  %v395_v48 = vpop.f32.mrb[1].mxu0 }
  0xeb   : > { %v497_v49 = vmul.f32 %v1272_v44, %v395_v48  ;;  %v1007_v50 = vpop.f32.mrb[2].mxu0 }
  0xec   : > { %v530_v51 = vadd.f32 %v1277_v46, %v499_v47  ;;  %v500_v52 = vmul.f32 %v1007_v50, %v1272_v44  ;;  %v398_v53 = vpop.f32.mrb[3].mxu0 }
  0xed   : > { %v528_v54 = vadd.f32 %v1277_v46, %v497_v49  ;;  %v498_v55 = vmul.f32 %v1272_v44, %v398_v53 }
  0xee   : > { %v531_v56 = vadd.f32 %v1277_v46, %v500_v52  ;;  %v554_v58 = vmax.f32 %v530_v51, 0.0 }
  0xef   : > { %v529_v57 = vadd.f32 %v1277_v46, %v498_v55  ;;  %v552_v60 = vmax.f32 %v528_v54, 0.0 }
  0xf0   : > { %v555_v59 = vmax.f32 %v531_v56, 0.0 }
  0xf1   : > { %v553_v61 = vmax.f32 %v529_v57, 0.0  ;;  %v1010_v62 = vpop.f32.mrb[4].mxu0 }
  0xf2   : > { %v577_v63 = vpack.c.bf16 %v555_v59, %v554_v58  ;;  %v503_v0 = vmul.f32 %v1010_v62, %v1272_v44  ;;  %v411_v1 = vpop.f32.mrb[5].mxu0 }
  0xf3   : > { %v501_v2 = vmul.f32 %v1272_v44, %v411_v1  ;;  %v1011_v3 = vpop.f32.mrb[6].mxu0  ;;  %v576_v4 = vpack.c.bf16 %v553_v61, %v552_v60 }
  0xf4   : > { %v534_v7 = vadd.f32 %v1277_v46, %v503_v0  ;;  %v504_v12 = vmul.f32 %v1011_v3, %v1272_v44  ;;  %v414_v13 = vpop.f32.mrb[7].mxu0 }
  0xf5   : > { %v532_v18 = vadd.f32 %v1277_v46, %v501_v2  ;;  %v502_v19 = vmul.f32 %v1272_v44, %v414_v13  ;;  %1036 = vmatprep.mubr.msk.bf16.mxu1 %vm324_vm0, %v576_v4 }
  0xf6   : > { %v535_v24 = vadd.f32 %v1277_v46, %v504_v12  ;;  %1037 = vmatmul.mubr.msk.bf16.vlgmr.msra.gmra.mrb[0].mxu1 %vm324_vm0, %v577_v63  ;;  %v558_v30 = vmax.f32 %v534_v7, 0.0 }
  0xf7   : > { %v533_v25 = vadd.f32 %v1277_v46, %v502_v19  ;;  %v556_v36 = vmax.f32 %v532_v18, 0.0 }
  0xf8   : > { %v559_v31 = vmax.f32 %v535_v24, 0.0 }
  0xf9   : > { %v557_v37 = vmax.f32 %v533_v25, 0.0  ;;  %v1014_v40 = vpop.f32.mrb[8].mxu0 }
  0xfa   : > { %v579_v41 = vpack.c.bf16 %v559_v31, %v558_v30  ;;  %v507_v42 = vmul.f32 %v1014_v40, %v1272_v44  ;;  %v427_v43 = vpop.f32.mrb[9].mxu0 }
  0xfb   : > { %v578_v45 = vpack.c.bf16 %v557_v37, %v556_v36  ;;  %v505_v47 = vmul.f32 %v1272_v44, %v427_v43  ;;  %v1015_v48 = vpop.f32.mrb[10].mxu0 }
  0xfc   : > { %v538_v49 = vadd.f32 %v1277_v46, %v507_v42  ;;  %v508_v50 = vmul.f32 %v1015_v48, %v1272_v44  ;;  %v430_v51 = vpop.f32.mrb[11].mxu0 }
  0xfd   : > { %v536_v52 = vadd.f32 %v1277_v46, %v505_v47  ;;  %v506_v53 = vmul.f32 %v1272_v44, %v430_v51  ;;  %1040 = vmatprep.mubr.msk.bf16.mxu1 %vm324_vm0, %v578_v45 }
  0xfe   : > { %v539_v54 = vadd.f32 %v1277_v46, %v508_v50  ;;  %1041 = vmatmul.mubr.msk.bf16.gmra.mrb[4].mxu1 %vm324_vm0, %v579_v41  ;;  %v562_v56 = vmax.f32 %v538_v49, 0.0 }
  0xff   : > { %v537_v55 = vadd.f32 %v1277_v46, %v506_v53  ;;  %v560_v58 = vmax.f32 %v536_v52, 0.0 }
 0x100   : > { %v563_v57 = vmax.f32 %v539_v54, 0.0 }
 0x101   : > { %v561_v59 = vmax.f32 %v537_v55, 0.0  ;;  %v1018_v60 = vpop.f32.mrb[12].mxu0 }
 0x102   : > { %v581_v61 = vpack.c.bf16 %v563_v57, %v562_v56  ;;  %v511_v62 = vmul.f32 %v1018_v60, %v1272_v44  ;;  %v443_v63 = vpop.f32.mrb[13].mxu0 }
 0x103   : > { %v580_v0 = vpack.c.bf16 %v561_v59, %v560_v58  ;;  %v509_v1 = vmul.f32 %v1272_v44, %v443_v63  ;;  %v1019_v2 = vpop.f32.mrb[14].mxu0 }
 0x104   : > { %v542_v3 = vadd.f32 %v1277_v46, %v511_v62  ;;  %v512_v4 = vmul.f32 %v1019_v2, %v1272_v44  ;;  %v446_v7 = vpop.f32.mrb[15].mxu0 }
 0x105   : > { %v540_v12 = vadd.f32 %v1277_v46, %v509_v1  ;;  %v510_v13 = vmul.f32 %v1272_v44, %v446_v7  ;;  %1044 = vmatprep.mubr.msk.bf16.mxu1 %vm324_vm0, %v580_v0 }
 0x106   : > { %v543_v18 = vadd.f32 %v1277_v46, %v512_v4  ;;  %1045 = vmatmul.mubr.msk.bf16.gmra.mrb[8].mxu1 %vm324_vm0, %v581_v61  ;;  %v566_v24 = vmax.f32 %v542_v3, 0.0 }
 0x107   : > { %v541_v19 = vadd.f32 %v1277_v46, %v510_v13  ;;  %v564_v30 = vmax.f32 %v540_v12, 0.0 }
 0x108   : > { %v567_v25 = vmax.f32 %v543_v18, 0.0 }
 0x109   : > { %v565_v31 = vmax.f32 %v541_v19, 0.0  ;;  %v1022_v36 = vpop.f32.mrb[16].mxu0 }
 0x10a   : > { %v583_v37 = vpack.c.bf16 %v567_v25, %v566_v24  ;;  %v515_v40 = vmul.f32 %v1022_v36, %v1272_v44  ;;  %v459_v41 = vpop.f32.mrb[17].mxu0  ;;  %v1342_v36 = vld [vmem:[%s1455_s5] ss:$0 sm:$0xff] }
 0x10b   : > { %v582_v42 = vpack.c.bf16 %v565_v31, %v564_v30  ;;  %v513_v43 = vmul.f32 %v1272_v44, %v459_v41  ;;  %v1023_v45 = vpop.f32.mrb[18].mxu0 }
 0x10c   : > { %v546_v47 = vadd.f32 %v1277_v46, %v515_v40  ;;  %v516_v48 = vmul.f32 %v1023_v45, %v1272_v44  ;;  %v462_v49 = vpop.f32.mrb[19].mxu0 }
 0x10d   : > { %v544_v50 = vadd.f32 %v1277_v46, %v513_v43  ;;  %v514_v51 = vmul.f32 %v1272_v44, %v462_v49  ;;  %1048 = vmatprep.mubr.msk.bf16.mxu1 %vm324_vm0, %v582_v42 }
 0x10e   : > { %v547_v52 = vadd.f32 %v1277_v46, %v516_v48  ;;  %1049 = vmatmul.mubr.msk.bf16.gmra.mrb[12].mxu1 %vm324_vm0, %v583_v37  ;;  %v570_v54 = vmax.f32 %v546_v47, 0.0 }
 0x10f   : > { %v545_v53 = vadd.f32 %v1277_v46, %v514_v51  ;;  %v568_v56 = vmax.f32 %v544_v50, 0.0 }
 0x110   : > { %v571_v55 = vmax.f32 %v547_v52, 0.0 }
 0x111   : > { %v569_v57 = vmax.f32 %v545_v53, 0.0  ;;  %v1026_v58 = vpop.f32.mrb[20].mxu0 }
 0x112   : > { %v585_v59 = vpack.c.bf16 %v571_v55, %v570_v54  ;;  %v519_v60 = vmul.f32 %v1026_v58, %v1272_v44  ;;  %v475_v61 = vpop.f32.mrb[21].mxu0 }
 0x113   : > { %v584_v62 = vpack.c.bf16 %v569_v57, %v568_v56  ;;  %v517_v63 = vmul.f32 %v1272_v44, %v475_v61  ;;  %v1027_v0 = vpop.f32.mrb[22].mxu0 }
 0x114   : > { %v550_v1 = vadd.f32 %v1277_v46, %v519_v60  ;;  %v520_v2 = vmul.f32 %v1027_v0, %v1272_v44  ;;  %v478_v3 = vpop.f32.mrb[23].mxu0 }
 0x115   : > { %v548_v4 = vadd.f32 %v1277_v46, %v517_v63  ;;  %v518_v7 = vmul.f32 %v1272_v44, %v478_v3  ;;  %1052 = vmatprep.mubr.msk.bf16.mxu1 %vm324_vm0, %v584_v62 }
 0x116   : > { %v551_v12 = vadd.f32 %v1277_v46, %v520_v2  ;;  %1053 = vmatmul.mubr.msk.bf16.gmra.mrb[16].mxu1 %vm324_vm0, %v585_v59  ;;  %v574_v18 = vmax.f32 %v550_v1, 0.0 }
 0x117   : > { %v549_v13 = vadd.f32 %v1277_v46, %v518_v7  ;;  %v572_v24 = vmax.f32 %v548_v4, 0.0 }
 0x118   : > { %v575_v19 = vmax.f32 %v551_v12, 0.0 }
 0x119   : > { %v573_v25 = vmax.f32 %v549_v13, 0.0 }
 0x11a   : > { %v587_v30 = vpack.c.bf16 %v575_v19, %v574_v18 }
 0x11b   : > { %v586_v31 = vpack.c.bf16 %v573_v25, %v572_v24 }
 0x11d   : > { %1056 = vmatprep.mubr.msk.bf16.mxu1 %vm324_vm0, %v586_v31 }
 0x11e   : > { %1057 = vmatmul.mubr.msk.bf16.gmra.mrb[20].mxu1 %vm324_vm0, %v587_v30 }
 0x1c9   : > { %v1038_v44 = vpop.f32.mrb[0].mxu1 }
 0x1ca   : > { %v787_v37 = vadd.f32 %v1038_v44, %v1162_v8  ;;  %v690_v40 = vpop.f32.mrb[1].mxu1 }
 0x1cb   : > { %v785_v46 = vadd.f32 %v690_v40, %v1153_v5  ;;  %v1039_v41 = vpop.f32.mrb[2].mxu1 }
 0x1cc   : > { %v818_v42 = vadd.f32 %v1342_v36, %v787_v37  ;;  %v788_v43 = vadd.f32 %v1039_v41, %v1165_v9  ;;  %v693_v45 = vpop.f32.mrb[3].mxu1 }
 0x1cd   : > { %v816_v8 = vadd.f32 %v1342_v36, %v785_v46  ;;  %v786_v47 = vadd.f32 %v693_v45, %v1156_v6 }
 0x1ce   : > { %842 = vst.msk [vmem:[%s1350_s30 + $0x10] sm:$0xff] %vm324_vm0, %v818_v42  ;;  %v819_v48 = vadd.f32 %v1342_v36, %v788_v43 }
 0x1cf   : > { %840 = vst.msk [vmem:[%s1350_s30] sm:$0xff] %vm324_vm0, %v816_v8  ;;  %v817_v5 = vadd.f32 %v1342_v36, %v786_v47 }
 0x1d0   : > { %843 = vst.msk [vmem:[%s1350_s30 + $0x18] sm:$0xff] %vm324_vm0, %v819_v48 }
 0x1d1   : > { %841 = vst.msk [vmem:[%s1350_s30 + $0x8] sm:$0xff] %vm324_vm0, %v817_v5  ;;  %v1042_v9 = vpop.f32.mrb[4].mxu1 }
 0x1d2   : > { %v791_v49 = vadd.f32 %v1042_v9, %v1180_v14  ;;  %v706_v6 = vpop.f32.mrb[5].mxu1 }
 0x1d3   : > { %v789_v50 = vadd.f32 %v706_v6, %v1168_v10  ;;  %v1043_v51 = vpop.f32.mrb[6].mxu1 }
 0x1d4   : > { %v822_v52 = vadd.f32 %v1342_v36, %v791_v49  ;;  %v792_v53 = vadd.f32 %v1043_v51, %v1183_v15  ;;  %v709_v54 = vpop.f32.mrb[7].mxu1 }
 0x1d5   : > { %v820_v55 = vadd.f32 %v1342_v36, %v789_v50  ;;  %v790_v56 = vadd.f32 %v709_v54, %v1171_v11 }
 0x1d6   : > { %846 = vst.msk [vmem:[%s1350_s30 + $0x30] sm:$0xff] %vm324_vm0, %v822_v52  ;;  %v823_v57 = vadd.f32 %v1342_v36, %v792_v53 }
 0x1d7   : > { %844 = vst.msk [vmem:[%s1350_s30 + $0x20] sm:$0xff] %vm324_vm0, %v820_v55  ;;  %v821_v10 = vadd.f32 %v1342_v36, %v790_v56 }
 0x1d8   : > { %847 = vst.msk [vmem:[%s1350_s30 + $0x38] sm:$0xff] %vm324_vm0, %v823_v57 }
 0x1d9   : > { %845 = vst.msk [vmem:[%s1350_s30 + $0x28] sm:$0xff] %vm324_vm0, %v821_v10  ;;  %v1046_v14 = vpop.f32.mrb[8].mxu1 }
 0x1da   : > { %v795_v15 = vadd.f32 %v1046_v14, %v1198_v20  ;;  %v722_v11 = vpop.f32.mrb[9].mxu1 }
 0x1db   : > { %v793_v58 = vadd.f32 %v722_v11, %v1186_v16  ;;  %v1047_v59 = vpop.f32.mrb[10].mxu1 }
 0x1dc   : > { %v826_v60 = vadd.f32 %v1342_v36, %v795_v15  ;;  %v796_v61 = vadd.f32 %v1047_v59, %v1201_v21  ;;  %v725_v62 = vpop.f32.mrb[11].mxu1 }
 0x1dd   : > { %v824_v63 = vadd.f32 %v1342_v36, %v793_v58  ;;  %v794_v0 = vadd.f32 %v725_v62, %v1189_v17 }
 0x1de   : > { %850 = vst.msk [vmem:[%s1350_s30 + $0x50] sm:$0xff] %vm324_vm0, %v826_v60  ;;  %v827_v1 = vadd.f32 %v1342_v36, %v796_v61 }
 0x1df   : > { %848 = vst.msk [vmem:[%s1350_s30 + $0x40] sm:$0xff] %vm324_vm0, %v824_v63  ;;  %v825_v16 = vadd.f32 %v1342_v36, %v794_v0 }
 0x1e0   : > { %851 = vst.msk [vmem:[%s1350_s30 + $0x58] sm:$0xff] %vm324_vm0, %v827_v1 }
 0x1e1   : > { %849 = vst.msk [vmem:[%s1350_s30 + $0x48] sm:$0xff] %vm324_vm0, %v825_v16  ;;  %v1050_v20 = vpop.f32.mrb[12].mxu1 }
 0x1e2   : > { %v799_v21 = vadd.f32 %v1050_v20, %v1216_v26  ;;  %v738_v17 = vpop.f32.mrb[13].mxu1 }
 0x1e3   : > { %v797_v2 = vadd.f32 %v738_v17, %v1204_v22  ;;  %v1051_v3 = vpop.f32.mrb[14].mxu1 }
 0x1e4   : > { %v830_v4 = vadd.f32 %v1342_v36, %v799_v21  ;;  %v800_v7 = vadd.f32 %v1051_v3, %v1219_v27  ;;  %v741_v12 = vpop.f32.mrb[15].mxu1 }
 0x1e5   : > { %v828_v13 = vadd.f32 %v1342_v36, %v797_v2  ;;  %v798_v18 = vadd.f32 %v741_v12, %v1207_v23 }
 0x1e6   : > { %854 = vst.msk [vmem:[%s1350_s30 + $0x70] sm:$0xff] %vm324_vm0, %v830_v4  ;;  %v831_v19 = vadd.f32 %v1342_v36, %v800_v7 }
 0x1e7   : > { %852 = vst.msk [vmem:[%s1350_s30 + $0x60] sm:$0xff] %vm324_vm0, %v828_v13  ;;  %v829_v22 = vadd.f32 %v1342_v36, %v798_v18 }
 0x1e8   : > { %855 = vst.msk [vmem:[%s1350_s30 + $0x78] sm:$0xff] %vm324_vm0, %v831_v19 }
 0x1e9   : > { %853 = vst.msk [vmem:[%s1350_s30 + $0x68] sm:$0xff] %vm324_vm0, %v829_v22  ;;  %v1054_v26 = vpop.f32.mrb[16].mxu1 }
 0x1ea   : > { %v803_v27 = vadd.f32 %v1054_v26, %v1234_v32  ;;  %v754_v23 = vpop.f32.mrb[17].mxu1 }
 0x1eb   : > { %v801_v24 = vadd.f32 %v754_v23, %v1222_v28  ;;  %v1055_v25 = vpop.f32.mrb[18].mxu1 }
 0x1ec   : > { %v834_v30 = vadd.f32 %v1342_v36, %v803_v27  ;;  %v804_v31 = vadd.f32 %v1055_v25, %v1237_v33  ;;  %v757_v44 = vpop.f32.mrb[19].mxu1 }
 0x1ed   : > { %v832_v37 = vadd.f32 %v1342_v36, %v801_v24  ;;  %v802_v40 = vadd.f32 %v757_v44, %v1225_v29 }
 0x1ee   : > { %858 = vst.msk [vmem:[%s1350_s30 + $0x90] sm:$0xff] %vm324_vm0, %v834_v30  ;;  %v835_v46 = vadd.f32 %v1342_v36, %v804_v31 }
 0x1ef   : > { %856 = vst.msk [vmem:[%s1350_s30 + $0x80] sm:$0xff] %vm324_vm0, %v832_v37  ;;  %v833_v28 = vadd.f32 %v1342_v36, %v802_v40 }
 0x1f0   : > { %859 = vst.msk [vmem:[%s1350_s30 + $0x98] sm:$0xff] %vm324_vm0, %v835_v46 }
 0x1f1   : > { %857 = vst.msk [vmem:[%s1350_s30 + $0x88] sm:$0xff] %vm324_vm0, %v833_v28  ;;  %v1058_v32 = vpop.f32.mrb[20].mxu1 }
 0x1f2   : > { %v807_v33 = vadd.f32 %v1058_v32, %v1252_v38  ;;  %v770_v29 = vpop.f32.mrb[21].mxu1 }
 0x1f3   : > { %v805_v41 = vadd.f32 %v770_v29, %v1240_v34  ;;  %v1059_v42 = vpop.f32.mrb[22].mxu1 }
 0x1f4   : > { %v838_v43 = vadd.f32 %v1342_v36, %v807_v33  ;;  %v808_v45 = vadd.f32 %v1059_v42, %v1255_v39  ;;  %v773_v8 = vpop.f32.mrb[23].mxu1 }
 0x1f5   : > { %v836_v47 = vadd.f32 %v1342_v36, %v805_v41  ;;  %v806_v48 = vadd.f32 %v773_v8, %v1243_v35 }
 0x1f6   : > { %862 = vst.msk [vmem:[%s1350_s30 + $0xb0] sm:$0xff] %vm324_vm0, %v838_v43  ;;  %v839_v5 = vadd.f32 %v1342_v36, %v808_v45 }
 0x1f7   : > { %860 = vst.msk [vmem:[%s1350_s30 + $0xa0] sm:$0xff] %vm324_vm0, %v836_v47  ;;  %v837_v38 = vadd.f32 %v1342_v36, %v806_v48 }
 0x1f8   : > { %863 = vst.msk [vmem:[%s1350_s30 + $0xb8] sm:$0xff] %vm324_vm0, %v839_v5 }
 0x1f9   : > { %861 = vst.msk [vmem:[%s1350_s30 + $0xa8] sm:$0xff] %vm324_vm0, %v837_v38 }
 0x1fa PF: > { %s16_s21 = sadd.s32 1, %s1082_s21  }
 0x1fb   : > { %p13_p4 = scmp.ge.s32.totalorder %s16_s21, 5  }
 0x1fd   :  { %15 = sbr.rel (!%p13_p4) target bundleno = 1 (0x1), region = 74 }

// kernel: cond_generator_forward.35
= control target key start
LH: loop header
LB: loop body
LE: loop exit
PB: predicated region body
PF: predicated region fallthrough
CT: control target
= control target key end

     0   :  { %8 = vsyncpa [#allocation3], 0  ;;  %s1997_s0 = inlined_call_operand.vmem [shape: f32[2,1,16,1,16,64], index: 0, kind: input, shape index: {}]   ;;  %s1998_s1 = inlined_call_operand.vmem [shape: bf16[4,64,512], index: 1, kind: input, shape index: {}]   ;;  %s1999_s2 = inlined_call_operand.vmem [shape: f32[1,512], index: 2, kind: input, shape index: {}]   ;;  %s2000_s3 = inlined_call_operand.hbm [shape: f32[2,1,1,512], index: 3, kind: output, shape index: {}]  }
   0x1   :  { %10 = vsyncpa [#allocation3 + $0x1], 0  ;;  %s1636_s12 = smov 0   ;;  %s1638_s13 = smov 0  }
   0x2   :  { %s1640_s14 = smov 0   ;;  %s1642_s15 = smov 0  }
   0x3   :  { %s1644_s16 = smov 0   ;;  %s1646_s17 = smov 0  }
   0x4 LB: > { %s1215_s18 = sadd.s32 4294967295, %s1611_s17   ;;  %s1216_s19 = sadd.s32 4294967294, %s1611_s17   ;;  %s1611_s17 = sphi %s1646_s17, %s16_s17   ;;  %s1607_s16 = sphi %s1644_s16, %s2007_s16   ;;  %s1603_s15 = sphi %s1642_s15, %s2006_s15   ;;  %s1599_s14 = sphi %s1640_s14, %s2005_s14   ;;  %s1595_s13 = sphi %s1638_s13, %s2004_s13   ;;  %s1591_s12 = sphi %s1636_s12, %s2003_s12  }
   0x5   : > { %s28_s20 = sadd.s32 1, %s1607_s16  ;;  %s107_s21 = sadd.s32 1, %s1599_s14 }
   0x6   : > { %p30_p0 = scmp.ge.s32.totalorder %s28_s20, 2  ;;  %p117_p1 = scmp.ne.s32.totalorder %s1599_s14, %s1595_s13 }
   0x7   : > { %p118_p2 = scmp.eq.s32.totalorder %s1215_s18, 1  ;;  %p123_p3 = scmp.ne.s32.totalorder %s1595_s13, %s1591_s12 }
   0x8   : > { %s2009_s20 = smov (%p30_p0, %s28_s20), 0  ;;  %p124_p5 = scmp.eq.s32.totalorder %s1216_s19, 1 }
   0x9   : > { %p1676_p4 = por %p118_p2, %p117_p1  ;;  %s102_s23 = ssub.s32 %s1607_s16, %s2009_s20 }
   0xa   : > { %p1219_p6 = scmp.ge.s32.totalorder %s1611_s17, 1  ;;  %p105_p7 = scmp.eq.s32.totalorder %s102_s23, 0 }
   0xb   : > { %p1683_p8 = por %p124_p5, %p123_p3  ;;  %p160_p9 = scmp.lt.s32.totalorder %s1611_s17, 3 }
   0xc   : > { %s1689_s25 = scalar_select %p105_p7, %s1599_s14, %s107_s21  }
   0xd   : > { %p161_p10 = pnand %p1219_p6, %p160_p9 }
   0xe   : > { %v1437_v0 = vld [vmem:[%s1998_s1 + $0x84] ss:$16 sps:$4 sm:$0xff] (!%p161_p10)   ;;  %p188_p11 = scmp.lt.s32.totalorder (!%p161_p10), %s1603_s15, 1  ;;  %v1439_v1 = vld [vmem:[%s1998_s1 + $0x8c] ss:$16 sps:$4 sm:$0xff] (!%p161_p10)   ;;  %v1613_v2 = vmov (!%p161_p10), 0  }
   0xf   : > { %164 = sbr.rel (%p161_p10) target bundleno = 351 (0x15f), region = 32  ;;  %410 = vmatprep.mubr.bf16.mxu0 (!%p161_p10), %v1613_v2  ;;  %451 = vmatprep.mubr.bf16.mxu1 (!%p161_p10), %v1613_v2  ;;  %v1441_v3 = vld [vmem:[%s1998_s1 + $0x80] ss:$16 sps:$4 sm:$0xff] (!%p161_p10)   ;;  %v1442_v4 = vld [vmem:[%s1998_s1 + $0x88] ss:$16 sps:$4 sm:$0xff] (!%p161_p10)   ;;  %vm374_vm0 = vcmask (!%p161_p10), 523264  }
  0x10   : > { %378 = vmatprep.subr.bf16.mxu0 (!%p161_p10), %v1437_v0  ;;  %419 = vmatprep.subr.bf16.mxu1 (!%p161_p10), %v1439_v1  ;;  %v1443_v5 = vld [vmem:[%s1998_s1 + $0xa4] ss:$16 sps:$4 sm:$0xff] (!%p161_p10)   ;;  %v1445_v6 = vld [vmem:[%s1998_s1 + $0xac] ss:$16 sps:$4 sm:$0xff] (!%p161_p10)   ;;  %v1447_v7 = vld [vmem:[%s1998_s1 + $0xa0] ss:$16 sps:$4 sm:$0xff] (!%p161_p10)  }
  0x11   : > { %379 = vmatpush1.bf16.msra.mxu0 (!%p161_p10), %v1441_v3  ;;  %420 = vmatpush1.bf16.msra.mxu1 (!%p161_p10), %v1442_v4  ;;  %v1448_v8 = vld [vmem:[%s1998_s1 + $0xa8] ss:$16 sps:$4 sm:$0xff] (!%p161_p10)   ;;  %v1449_v9 = vld [vmem:[%s1998_s1 + $0xc4] ss:$16 sps:$4 sm:$0xff] (!%p161_p10)   ;;  %v1451_v10 = vld [vmem:[%s1998_s1 + $0xcc] ss:$16 sps:$4 sm:$0xff] (!%p161_p10)  }
  0x12   : > { %380 = vmatprep.subr.bf16.mxu0 (!%p161_p10), %v1443_v5  ;;  %421 = vmatprep.subr.bf16.mxu1 (!%p161_p10), %v1445_v6  ;;  %v1453_v11 = vld [vmem:[%s1998_s1 + $0xc0] ss:$16 sps:$4 sm:$0xff] (!%p161_p10)   ;;  %v1454_v12 = vld [vmem:[%s1998_s1 + $0xc8] ss:$16 sps:$4 sm:$0xff] (!%p161_p10)   ;;  %v1455_v13 = vld [vmem:[%s1998_s1 + $0xe4] ss:$16 sps:$4 sm:$0xff] (!%p161_p10)  }
  0x13   : > { %v1457_v14 = vld [vmem:[%s1998_s1 + $0xec] ss:$16 sps:$4 sm:$0xff] (!%p161_p10)   ;;  %v1459_v15 = vld [vmem:[%s1998_s1 + $0xe0] ss:$16 sps:$4 sm:$0xff] (!%p161_p10)   ;;  %v1460_v16 = vld [vmem:[%s1998_s1 + $0xe8] ss:$16 sps:$4 sm:$0xff] (!%p161_p10)  }
  0x14   : > { %v1463_v17 = vld [vmem:[%s1998_s1 + $0x4] ss:$16 sps:$4 sm:$0xff] (!%p161_p10)   ;;  %v1466_v18 = vld [vmem:[%s1998_s1 + $0xc] ss:$16 sps:$4 sm:$0xff] (!%p161_p10)   ;;  %s185_s26 = sand.u32 (!%p161_p10), 1, %s1595_s13   ;;  %s1379_s29 = sshll.u32 (!%p161_p10), %s1603_s15, 6 }
  0x15   : > { %381 = vmatpush1.bf16.msra.mxu0 (!%p161_p10), %v1447_v7  ;;  %422 = vmatpush1.bf16.msra.mxu1 (!%p161_p10), %v1448_v8  ;;  %s1220_s27 = sshll.u32 (!%p161_p10), %s185_s26, 2  ;;  %s1948_s6 = scalar_lea.hbm (!%p161_p10), %s2000_s3, %s1379_s29 }
  0x16   : > { %s189_s7 = scalar_select %p188_p11, %s1603_s15, 1  ;;  %382 = vmatprep.subr.bf16.mxu0 %v1449_v9  ;;  %423 = vmatprep.subr.bf16.mxu1 %v1451_v10 }
  0x17   : > { %s187_s30 = scalar_lea.vmem [#allocation2], %s1220_s27  ;;  %s1120_s8 = scalar_lea.sflag [#allocation3], %s185_s26 }
  0x18   : > { %s1378_s28 = sshll.u32 %s189_s7, 8  ;;  %s1615_s15 = smov [#allocation2]  }
  0x19   : > { %s1740_s21 = scalar_lea.vmem %s1997_s0, %s1378_s28  ;;  %383 = vmatpush1.bf16.msra.mxu0 %v1453_v11  ;;  %424 = vmatpush1.bf16.msra.mxu1 %v1454_v12  ;;  %s1136_s28 = sshll.u32 %s187_s30, 4  ;;  %s1950_s28 = int_to_ptr.vmem [resolvable:$true] %s1136_s28 }
  0x1a   : > { %384 = vmatprep.subr.bf16.mxu0 %v1455_v13  ;;  %425 = vmatprep.subr.bf16.mxu1 %v1457_v14  ;;  %v198_v19 = vld [vmem:[%s1740_s21] sm:$0xff]  ;;  %v199_v20 = vld [vmem:[%s1740_s21 + $0x8] sm:$0xff]  ;;  %v1289_v58 = vld [vmem:[%s1740_s21 + $0x10] sm:$0xff]  ;;  %s1537_s9 = sshll.u32 %s1615_s15, 4  ;;  %s1538_s9 = int_to_ptr.vmem [resolvable:$false] %s1537_s9 }
  0x1b   : > { %v1223_v21 = vld [vmem:[%s1740_s21 + $0x20] sm:$0xff]  ;;  %v1224_v22 = vld [vmem:[%s1740_s21 + $0x28] sm:$0xff]  ;;  %v1290_v59 = vld [vmem:[%s1740_s21 + $0x18] sm:$0xff]  ;;  %s1539_s10 = scalar_lea.vmem %s1538_s9, 128  ;;  %p1540_p1 = scmp.lt.s32.totalorder %s1950_s28, %s1538_s9 }
  0x1c   : > { %v1225_v23 = vld [vmem:[%s1740_s21 + $0x40] sm:$0xff]  ;;  %v203_v24 = vadd.f32 %v1223_v21, %v198_v19  ;;  %v204_v25 = vadd.f32 %v1224_v22, %v199_v20  ;;  %v1226_v26 = vld [vmem:[%s1740_s21 + $0x48] sm:$0xff]  ;;  %v1291_v60 = vld [vmem:[%s1740_s21 + $0x30] sm:$0xff] }
  0x1d   : > { %385 = vmatpush1.bf16.msra.mxu0 %v1459_v15  ;;  %426 = vmatpush1.bf16.msra.mxu1 %v1460_v16  ;;  %v1227_v27 = vld [vmem:[%s1740_s21 + $0x60] sm:$0xff]  ;;  %v1228_v28 = vld [vmem:[%s1740_s21 + $0x68] sm:$0xff]  ;;  %v1292_v63 = vld [vmem:[%s1740_s21 + $0x38] sm:$0xff]  ;;  %v630_v0 = vadd.f32 %v1291_v60, %v1289_v58 }
  0x1e   : > { %542 = vmatprep.subr.bf16.mxu0 %v1463_v17  ;;  %583 = vmatprep.subr.bf16.mxu1 %v1466_v18  ;;  %v208_v29 = vadd.f32 %v1225_v23, %v203_v24  ;;  %v209_v30 = vadd.f32 %v1226_v26, %v204_v25  ;;  %v1229_v31 = vld [vmem:[%s1740_s21 + $0x80] sm:$0xff]  ;;  %v1230_v32 = vld [vmem:[%s1740_s21 + $0x88] sm:$0xff]  ;;  %v1293_v1 = vld [vmem:[%s1740_s21 + $0x50] sm:$0xff]  ;;  %v631_v4 = vadd.f32 %v1292_v63, %v1290_v59 }
  0x1f   : > { %v1231_v35 = vld [vmem:[%s1740_s21 + $0xa0] sm:$0xff]  ;;  %v1232_v36 = vld [vmem:[%s1740_s21 + $0xa8] sm:$0xff]  ;;  %v1294_v3 = vld [vmem:[%s1740_s21 + $0x58] sm:$0xff]  ;;  %v635_v7 = vadd.f32 %v1293_v1, %v630_v0 }
  0x20   : > { %v213_v33 = vadd.f32 %v1227_v27, %v208_v29  ;;  %v214_v34 = vadd.f32 %v1228_v28, %v209_v30  ;;  %v1233_v39 = vld [vmem:[%s1740_s21 + $0xc0] sm:$0xff]  ;;  %v1234_v42 = vld [vmem:[%s1740_s21 + $0xc8] sm:$0xff]  ;;  %v1295_v5 = vld [vmem:[%s1740_s21 + $0x70] sm:$0xff]  ;;  %v636_v9 = vadd.f32 %v1294_v3, %v631_v4 }
  0x21   : > { %v1235_v43 = vld [vmem:[%s1740_s21 + $0xe0] sm:$0xff]  ;;  %v1236_v47 = vld [vmem:[%s1740_s21 + $0xe8] sm:$0xff]  ;;  %v1296_v8 = vld [vmem:[%s1740_s21 + $0x78] sm:$0xff]  ;;  %v640_v12 = vadd.f32 %v1295_v5, %v635_v7 }
  0x22   : > { %v218_v37 = vadd.f32 %v1229_v31, %v213_v33  ;;  %v219_v38 = vadd.f32 %v1230_v32, %v214_v34  ;;  %v1297_v10 = vld [vmem:[%s1740_s21 + $0x90] sm:$0xff]  ;;  %v1298_v13 = vld [vmem:[%s1740_s21 + $0x98] sm:$0xff]  ;;  %v641_v14 = vadd.f32 %v1296_v8, %v636_v9 }
  0x23   : > { %v1299_v15 = vld [vmem:[%s1740_s21 + $0xb0] sm:$0xff]  ;;  %v645_v17 = vadd.f32 %v1297_v10, %v640_v12  ;;  %v1300_v18 = vld [vmem:[%s1740_s21 + $0xb8] sm:$0xff] }
  0x24   : > { %v223_v40 = vadd.f32 %v1231_v35, %v218_v37  ;;  %v224_v41 = vadd.f32 %v1232_v36, %v219_v38  ;;  %v1461_v19 = vld [vmem:[%s1998_s1] ss:$16 sps:$4 sm:$0xff]   ;;  %v646_v20 = vadd.f32 %v1298_v13, %v641_v14  ;;  %v1464_v22 = vld [vmem:[%s1998_s1 + $0x8] ss:$16 sps:$4 sm:$0xff]   ;;  %v1469_v29 = vld [vmem:[%s1998_s1 + $0x24] ss:$16 sps:$4 sm:$0xff]  }
  0x25   : > { %v1301_v21 = vld [vmem:[%s1740_s21 + $0xd0] sm:$0xff]  ;;  %v650_v24 = vadd.f32 %v1299_v15, %v645_v17  ;;  %v1302_v26 = vld [vmem:[%s1740_s21 + $0xd8] sm:$0xff] }
  0x26   : > { %v228_v44 = vadd.f32 %v1233_v39, %v223_v40  ;;  %v229_v45 = vadd.f32 %v1234_v42, %v224_v41  ;;  %v651_v25 = vadd.f32 %v1300_v18, %v646_v20  ;;  %v1303_v27 = vld [vmem:[%s1740_s21 + $0xf0] sm:$0xff]  ;;  %v1472_v30 = vld [vmem:[%s1998_s1 + $0x2c] ss:$16 sps:$4 sm:$0xff]   ;;  %v1470_v33 = vld [vmem:[%s1998_s1 + $0x28] ss:$16 sps:$4 sm:$0xff]  }
  0x27   : > { %v655_v31 = vadd.f32 %v1301_v21, %v650_v24  ;;  %v1467_v32 = vld [vmem:[%s1998_s1 + $0x20] ss:$16 sps:$4 sm:$0xff]   ;;  %v1475_v36 = vld [vmem:[%s1998_s1 + $0x44] ss:$16 sps:$4 sm:$0xff]   ;;  %v1304_v37 = vld [vmem:[%s1740_s21 + $0xf8] sm:$0xff]  ;;  %s1533_s21 = scalar_lea.vmem %s1950_s28, 64 }
  0x28   : > { %v233_v46 = vadd.f32 %v1235_v43, %v228_v44  ;;  %v234_v50 = vadd.f32 %v1236_v47, %v229_v45  ;;  %v656_v34 = vadd.f32 %v1302_v26, %v651_v25  ;;  %v1478_v38 = vld [vmem:[%s1998_s1 + $0x4c] ss:$16 sps:$4 sm:$0xff]   ;;  %v1473_v44 = vld [vmem:[%s1998_s1 + $0x40] ss:$16 sps:$4 sm:$0xff]   ;;  %v1476_v45 = vld [vmem:[%s1998_s1 + $0x48] ss:$16 sps:$4 sm:$0xff]   ;;  %p1534_p12 = scmp.ne.s32.totalorder %s1950_s28, %s1533_s21  ;;  %p1541_p2 = scmp.lt.s32.totalorder %s1539_s10, %s1533_s21 }
  0x29   : > { %v660_v35 = vadd.f32 %v1303_v27, %v655_v31  ;;  %v1484_v47 = vld [vmem:[%s1998_s1 + $0x6c] ss:$16 sps:$4 sm:$0xff]   ;;  %v1485_v58 = vld [vmem:[%s1998_s1 + $0x100] ss:$16 sps:$4 sm:$0xff]   ;;  %v1488_v59 = vld [vmem:[%s1998_s1 + $0x108] ss:$16 sps:$4 sm:$0xff]  }
  0x2a   : > { %v236_v48 = vrot.slane %v233_v46, 2  ;;  %v239_v49 = vrot.slane %v233_v46, 4  ;;  %v242_v52 = vrot.slane %v233_v46, 6  ;;  %v247_v55 = vrot.slane %v234_v50, 2  ;;  %v1493_v60 = vld [vmem:[%s1998_s1 + $0x124] ss:$16 sps:$4 sm:$0xff]   ;;  %p1535_p13 = pnand %p1534_p12, %p1676_p4  ;;  %p1542_p3 = por %p1541_p2, %p1540_p1 }
  0x2b   : > { %v250_v57 = vrot.slane %v234_v50, 4  ;;  %v253_v62 = vrot.slane %v234_v50, 6  ;;  %v663_v39 = vrot.slane %v660_v35, 2  ;;  %v666_v40 = vrot.slane %v660_v35, 4  ;;  %v1491_v0 = vld [vmem:[%s1998_s1 + $0x120] ss:$16 sps:$4 sm:$0xff]  }
  0x2c   : > { %v238_v51 = vadd.f32 %v236_v48, %v233_v46  ;;  %v661_v41 = vadd.f32 %v1304_v37, %v656_v34  ;;  %v669_v43 = vrot.slane %v660_v35, 6  ;;  %v1481_v46 = vld [vmem:[%s1998_s1 + $0x64] ss:$16 sps:$4 sm:$0xff]   ;;  %v1494_v1 = vld [vmem:[%s1998_s1 + $0x128] ss:$16 sps:$4 sm:$0xff]   ;;  %p1536_p0 = pneg %p1535_p13 }
  0x2d   : > { %v665_v42 = vadd.f32 %v663_v39, %v660_v35  ;;  %v1499_v3 = vld [vmem:[%s1998_s1 + $0x144] ss:$16 sps:$4 sm:$0xff]   ;;  %v1502_v4 = vld [vmem:[%s1998_s1 + $0x14c] ss:$16 sps:$4 sm:$0xff]   ;;  %v1500_v7 = vld [vmem:[%s1998_s1 + $0x148] ss:$16 sps:$4 sm:$0xff]  }
  0x2e   : > { %v241_v53 = vadd.f32 %v239_v49, %v238_v51  ;;  %v1479_v51 = vld [vmem:[%s1998_s1 + $0x60] ss:$16 sps:$4 sm:$0xff]   ;;  %v680_v63 = vrot.slane %v661_v41, 6  ;;  %v1505_v8 = vld [vmem:[%s1998_s1 + $0x164] ss:$16 sps:$4 sm:$0xff]   ;;  %p1543_p5 = pnand %p1542_p3, %p1536_p0 }
  0x2f   : > { %v668_v48 = vadd.f32 %v666_v40, %v665_v42  ;;  %v1508_v9 = vld [vmem:[%s1998_s1 + $0x16c] ss:$16 sps:$4 sm:$0xff]   ;;  %v1506_v12 = vld [vmem:[%s1998_s1 + $0x168] ss:$16 sps:$4 sm:$0xff]   ;;  %v1511_v13 = vld [vmem:[%s1998_s1 + $0x184] ss:$16 sps:$4 sm:$0xff]  }
  0x30   : > { %v244_v54 = vadd.f32 %v242_v52, %v241_v53  ;;  %v1482_v52 = vld [vmem:[%s1998_s1 + $0x68] ss:$16 sps:$4 sm:$0xff]   ;;  %v1487_v53 = vld [vmem:[%s1998_s1 + $0x104] ss:$16 sps:$4 sm:$0xff]   ;;  %v1514_v14 = vld [vmem:[%s1998_s1 + $0x18c] ss:$16 sps:$4 sm:$0xff]  }
  0x31   : > { %v671_v49 = vadd.f32 %v669_v43, %v668_v48  ;;  %v1512_v17 = vld [vmem:[%s1998_s1 + $0x188] ss:$16 sps:$4 sm:$0xff]   ;;  %v1517_v18 = vld [vmem:[%s1998_s1 + $0x1a4] ss:$16 sps:$4 sm:$0xff]   ;;  %v1515_v20 = vld [vmem:[%s1998_s1 + $0x1a0] ss:$16 sps:$4 sm:$0xff]  }
  0x32   : > { %v245_v56 = vadd.f32 %v244_v54, %v234_v50  ;;  %v674_v50 = vrot.slane %v661_v41, 2  ;;  %v1490_v54 = vld [vmem:[%s1998_s1 + $0x10c] ss:$16 sps:$4 sm:$0xff]   ;;  %v1518_v21 = vld [vmem:[%s1998_s1 + $0x1a8] ss:$16 sps:$4 sm:$0xff]  }
  0x33   : > { %v1521_v24 = vld [vmem:[%s1998_s1 + $0x1c0] ss:$16 sps:$4 sm:$0xff]   ;;  %v1524_v25 = vld [vmem:[%s1998_s1 + $0x1c8] ss:$16 sps:$4 sm:$0xff]   ;;  %v1529_v26 = vld [vmem:[%s1998_s1 + $0x1e4] ss:$16 sps:$4 sm:$0xff]  }
  0x34   : > { %v249_v61 = vadd.f32 %v247_v55, %v245_v56  ;;  %v672_v55 = vadd.f32 %v671_v49, %v661_v41  ;;  %v1527_v27 = vld [vmem:[%s1998_s1 + $0x1e0] ss:$16 sps:$4 sm:$0xff]  }
  0x36   : > { %v252_v6 = vadd.f32 %v250_v57, %v249_v61  ;;  %v676_v56 = vadd.f32 %v674_v50, %v672_v55  ;;  %v677_v57 = vrot.slane %v661_v41, 4  ;;  %v1496_v61 = vld [vmem:[%s1998_s1 + $0x12c] ss:$16 sps:$4 sm:$0xff]  }
  0x38   : > { %v255_v11 = vadd.f32 %v253_v62, %v252_v6  ;;  %v679_v62 = vadd.f32 %v677_v57, %v676_v56  ;;  %v1497_v6 = vld [vmem:[%s1998_s1 + $0x140] ss:$16 sps:$4 sm:$0xff]  }
  0x3a   : > { %v256_v16 = vmul.f32 0.015625, %v255_v11  ;;  %v682_v5 = vadd.f32 %v680_v63, %v679_v62  ;;  %v1503_v11 = vld [vmem:[%s1998_s1 + $0x160] ss:$16 sps:$4 sm:$0xff]   ;;  %v1061_v62 = vlaneseq }
  0x3c   : > { %v257_v23 = vpack.c.bf16 %v256_v16, %v256_v16  ;;  %v683_v10 = vmul.f32 0.015625, %v682_v5  ;;  %v1509_v16 = vld [vmem:[%s1998_s1 + $0x180] ss:$16 sps:$4 sm:$0xff]   ;;  %v1062_v63 = vshrl.u32 %v1061_v62, 7  ;;  %v1614_v5 = vmov 1966171168  }
  0x3d   : > { %vm1116_vm1 = vcmp.lt.s32.totalorder %v1061_v62, 512 }
  0x3e   : > { %v292_v28 = vshrl.u32 %v257_v23, 16  ;;  %v684_v15 = vpack.c.bf16 %v683_v10, %v683_v10 }
  0x40   : > { %1269 = vmatmul.mubr.msk.bf16.vlgmr.msra.gmra.mrb[0].mxu0 %vm374_vm0, %v292_v28  ;;  %1270 = vmatmul.mubr.msk.bf16.vlgmr.msra.gmra.mrb[0].mxu1 %vm374_vm0, %v292_v28  ;;  %v1530_v28 = vld [vmem:[%s1998_s1 + $0x1e8] ss:$16 sps:$4 sm:$0xff]  }
  0x41   : > { %543 = vmatpush1.bf16.msra.mxu0 %v1461_v19  ;;  %584 = vmatpush1.bf16.msra.mxu1 %v1464_v22  ;;  %v1520_v19 = vld [vmem:[%s1998_s1 + $0x1ac] ss:$16 sps:$4 sm:$0xff]   ;;  %v1523_v22 = vld [vmem:[%s1998_s1 + $0x1c4] ss:$16 sps:$4 sm:$0xff]  }
  0x42   : > { %544 = vmatprep.subr.bf16.mxu0 %v1469_v29  ;;  %585 = vmatprep.subr.bf16.mxu1 %v1472_v30  ;;  %v888_v29 = vshrl.u32 %v684_v15, 16 }
  0x43   : > { %574 = vmatprep.mubr.bf16.mxu0 %v1613_v2  ;;  %615 = vmatprep.mubr.bf16.mxu1 %v1613_v2 }
  0x45   : > { %545 = vmatpush1.bf16.msra.mxu0 %v1467_v32  ;;  %586 = vmatpush1.bf16.msra.mxu1 %v1470_v33 }
  0x46   : > { %546 = vmatprep.subr.bf16.mxu0 %v1475_v36  ;;  %587 = vmatprep.subr.bf16.mxu1 %v1478_v38 }
  0x49   : > { %547 = vmatpush1.bf16.msra.mxu0 %v1473_v44  ;;  %588 = vmatpush1.bf16.msra.mxu1 %v1476_v45 }
  0x4a   : > { %548 = vmatprep.subr.bf16.mxu0 %v1481_v46  ;;  %589 = vmatprep.subr.bf16.mxu1 %v1484_v47 }
  0x4d   : > { %549 = vmatpush1.bf16.msra.mxu0 %v1479_v51  ;;  %590 = vmatpush1.bf16.msra.mxu1 %v1482_v52 }
  0x4e   : > { %785 = vmatprep.subr.bf16.mxu0 %v1487_v53  ;;  %826 = vmatprep.subr.bf16.mxu1 %v1490_v54 }
  0x50   : > { %1287 = vmatmul.mubr.msk.bf16.vlgmr.msra.gmra.mrb[4].mxu0 %vm374_vm0, %v257_v23  ;;  %1288 = vmatmul.mubr.msk.bf16.vlgmr.msra.gmra.mrb[4].mxu1 %vm374_vm0, %v257_v23  ;;  %v1526_v23 = vld [vmem:[%s1998_s1 + $0x1cc] ss:$16 sps:$4 sm:$0xff]  }
  0x51   : > { %786 = vmatpush1.bf16.msra.mxu0 %v1485_v58  ;;  %827 = vmatpush1.bf16.msra.mxu1 %v1488_v59 }
  0x52   : > { %787 = vmatprep.subr.bf16.mxu0 %v1493_v60  ;;  %828 = vmatprep.subr.bf16.mxu1 %v1496_v61 }
  0x53   : > { %817 = vmatprep.mubr.bf16.mxu0 %v1613_v2  ;;  %858 = vmatprep.mubr.bf16.mxu1 %v1613_v2 }
  0x55   : > { %788 = vmatpush1.bf16.msra.mxu0 %v1491_v0  ;;  %829 = vmatpush1.bf16.msra.mxu1 %v1494_v1  ;;  %v1063_v0 = vsub.s32 0, %v1062_v63  ;;  %v1071_v1 = vsub.s32 2, %v1062_v63 }
  0x56   : > { %789 = vmatprep.subr.bf16.mxu0 %v1499_v3  ;;  %830 = vmatprep.subr.bf16.mxu1 %v1502_v4  ;;  %v1059_v3 = vld [vmem:[%s1999_s2] sm:$0xf]  ;;  %v1067_v4 = vsub.s32 1, %v1062_v63 }
  0x59   : > { %790 = vmatpush1.bf16.msra.mxu0 %v1497_v6  ;;  %831 = vmatpush1.bf16.msra.mxu1 %v1500_v7  ;;  %v1092_v6 = vunpack.c.l.s4 %v1614_v5  ;;  %v1075_v7 = vsub.s32 3, %v1062_v63 }
  0x5a   : > { %791 = vmatprep.subr.bf16.mxu0 %v1505_v8  ;;  %832 = vmatprep.subr.bf16.mxu1 %v1508_v9  ;;  %v1064_v8 = vrot.slane %v1059_v3, %v1063_v0  ;;  %v1072_v9 = vrot.slane %v1059_v3, %v1071_v1 }
  0x5d   : > { %792 = vmatpush1.bf16.msra.mxu0 %v1503_v11  ;;  %833 = vmatpush1.bf16.msra.mxu1 %v1506_v12  ;;  %v1068_v12 = vrot.slane %v1059_v3, %v1067_v4 }
  0x5e   : > { %973 = vmatprep.subr.bf16.mxu0 %v1511_v13  ;;  %1014 = vmatprep.subr.bf16.mxu1 %v1514_v14  ;;  %v1093_v13 = vunpack.c.0.s8 %v1092_v6  ;;  %v1076_v14 = vrot.slane %v1059_v3, %v1075_v7 }
  0x60   : > { %1337 = vmatmul.mubr.msk.bf16.vlgmr.msra.gmra.mrb[8].mxu0 %vm374_vm0, %v684_v15  ;;  %1338 = vmatmul.mubr.msk.bf16.vlgmr.msra.gmra.mrb[8].mxu1 %vm374_vm0, %v684_v15 }
  0x61   : > { %974 = vmatpush1.bf16.msra.mxu0 %v1509_v16  ;;  %1015 = vmatpush1.bf16.msra.mxu1 %v1512_v17 }
  0x62   : > { %975 = vmatprep.subr.bf16.mxu0 %v1517_v18  ;;  %1016 = vmatprep.subr.bf16.mxu1 %v1520_v19 }
  0x63   : > { %1005 = vmatprep.mubr.bf16.mxu0 %v1613_v2  ;;  %1046 = vmatprep.mubr.bf16.mxu1 %v1613_v2  ;;  %v1532_v2 = vld [vmem:[%s1998_s1 + $0x1ec] ss:$16 sps:$4 sm:$0xff]  }
  0x65   : > { %976 = vmatpush1.bf16.msra.mxu0 %v1515_v20  ;;  %1017 = vmatpush1.bf16.msra.mxu1 %v1518_v21 }
  0x66   : > { %977 = vmatprep.subr.bf16.mxu0 %v1523_v22  ;;  %1018 = vmatprep.subr.bf16.mxu1 %v1526_v23 }
  0x69   : > { %978 = vmatpush1.bf16.msra.mxu0 %v1521_v24  ;;  %1019 = vmatpush1.bf16.msra.mxu1 %v1524_v25 }
  0x6a   : > { %979 = vmatprep.subr.bf16.mxu0 %v1529_v26  ;;  %1020 = vmatprep.subr.bf16.mxu1 %v1532_v2 }
  0x6d   : > { %980 = vmatpush1.bf16.msra.mxu0 %v1527_v27  ;;  %1021 = vmatpush1.bf16.msra.mxu1 %v1530_v28  ;;  %v1096_v27 = vsub.s32 %v1093_v13, %v1062_v63 }
  0x70   : > { %1371 = vmatmul.mubr.msk.bf16.vlgmr.msra.gmra.mrb[12].mxu0 %vm374_vm0, %v888_v29  ;;  %1372 = vmatmul.mubr.msk.bf16.vlgmr.msra.gmra.mrb[12].mxu1 %vm374_vm0, %v888_v29 }
 0x113   : > { %v412_v30 = vpop.f32.mrb[0].mxu0  ;;  %v453_v31 = vpop.f32.mrb[0].mxu1 }
 0x114   : > { %v414_v32 = vpop.f32.mrb[1].mxu0  ;;  %v455_v33 = vpop.f32.mrb[1].mxu1 }
 0x115   : > { %v416_v34 = vpop.f32.mrb[2].mxu0  ;;  %v457_v35 = vpop.f32.mrb[2].mxu1 }
 0x116   : > { %v417_v36 = vpop.f32.mrb[3].mxu0  ;;  %v458_v37 = vpop.f32.mrb[3].mxu1 }
 0x123   : > { %v576_v38 = vpop.f32.mrb[4].mxu0  ;;  %v617_v39 = vpop.f32.mrb[4].mxu1 }
 0x124   : > { %v577_v40 = vadd.f32 %v576_v38, %v412_v30  ;;  %v618_v41 = vadd.f32 %v617_v39, %v453_v31  ;;  %v578_v42 = vpop.f32.mrb[5].mxu0  ;;  %v619_v43 = vpop.f32.mrb[5].mxu1 }
 0x125   : > { %v579_v44 = vadd.f32 %v578_v42, %v414_v32  ;;  %v620_v45 = vadd.f32 %v619_v43, %v455_v33  ;;  %v580_v46 = vpop.f32.mrb[6].mxu0  ;;  %v621_v47 = vpop.f32.mrb[6].mxu1 }
 0x126   : > { %v581_v48 = vpop.f32.mrb[7].mxu0  ;;  %v622_v49 = vpop.f32.mrb[7].mxu1 }
 0x133   : > { %v819_v50 = vpop.f32.mrb[8].mxu0  ;;  %v860_v51 = vpop.f32.mrb[8].mxu1 }
 0x134   : > { %v867_v52 = vadd.f32 %v819_v50, %v577_v40  ;;  %v869_v53 = vadd.f32 %v860_v51, %v618_v41  ;;  %v821_v54 = vpop.f32.mrb[9].mxu0  ;;  %v862_v55 = vpop.f32.mrb[9].mxu1 }
 0x135   : > { %v868_v56 = vadd.f32 %v821_v54, %v579_v44  ;;  %v870_v57 = vadd.f32 %v862_v55, %v620_v45  ;;  %v823_v58 = vpop.f32.mrb[10].mxu0  ;;  %v864_v59 = vpop.f32.mrb[10].mxu1 }
 0x136   : > { %v824_v60 = vpop.f32.mrb[11].mxu0  ;;  %v865_v61 = vpop.f32.mrb[11].mxu1 }
 0x143   : > { %v1007_v10 = vpop.f32.mrb[12].mxu0  ;;  %v1048_v11 = vpop.f32.mrb[12].mxu1 }
 0x144   : > { %v1055_v15 = vadd.f32 %v1007_v10, %v867_v52  ;;  %v1057_v16 = vadd.f32 %v1048_v11, %v869_v53  ;;  %v1009_v17 = vpop.f32.mrb[13].mxu0  ;;  %v1050_v18 = vpop.f32.mrb[13].mxu1 }
 0x145   : > { %v1056_v19 = vadd.f32 %v1009_v17, %v868_v56  ;;  %v1058_v20 = vadd.f32 %v1050_v18, %v870_v57  ;;  %v1011_v21 = vpop.f32.mrb[14].mxu0  ;;  %v1052_v22 = vpop.f32.mrb[14].mxu1 }
 0x146   : > { %v1081_v23 = vadd.f32 %v1064_v8, %v1055_v15  ;;  %v1083_v24 = vadd.f32 %v1072_v9, %v1057_v16  ;;  %v1012_v25 = vpop.f32.mrb[15].mxu0  ;;  %v1053_v26 = vpop.f32.mrb[15].mxu1 }
 0x147   : > { %v1082_v2 = vadd.f32 %v1068_v12, %v1056_v19  ;;  %v1084_v28 = vadd.f32 %v1076_v14, %v1058_v20 }
 0x149   : > { %v1089_v29 = vcombine.low %v1081_v23, %v1082_v2  ;;  %v1090_v30 = vcombine.low %v1083_v24, %v1084_v28 }
 0x14b   : > { %v1097_v31 = vrot.slane %v1089_v29, %v1096_v27  ;;  %v1104_v32 = vrot.slane %v1090_v30, %v1096_v27 }
 0x14d   : > { %v1105_v33 = vcombine.low %v1097_v31, %v1104_v32 }
 0x14f   : > { %v1112_v34 = vrot.slane %v1105_v33, %v1096_v27 }
 0x151   : > { %1118 = vst.msk [vmem:[%s187_s30] sm:$0xf] %vm1116_vm1, %v1112_v34 }
 0x152   : > { %1546 = shalt.err (!%p1543_p5)
}
 0x153   : > { %s1547_s7 = scalar_lea.hbm %s1948_s6, 64  ;;  %s1551_s19 = scalar_lea.hbm %s2000_s3, 128 }
 0x154   : > { %p1548_p6 = scmp.ne.s32.totalorder %s1948_s6, %s1547_s7  ;;  %p1552_p10 = scmp.lt.u32.totalorder %s1948_s6, %s2000_s3 }
 0x155   : > { %p1553_p11 = scmp.lt.u32.totalorder %s1551_s19, %s1547_s7  ;;  %p1555_p13 = scmp.lt.u32.totalorder %s1547_s7, %s1948_s6 }
 0x156   : > { %p1549_p7 = pnand %p1548_p6, %p1676_p4 }
 0x157   : > { %p1554_p12 = por %p1553_p11, %p1552_p10 }
 0x158   : > { %p1550_p9 = pneg %p1549_p7 }
 0x159   : > { %p1556_p0 = por %p1555_p13, %p1554_p12 }
 0x15b   : > { %p1557_p1 = pnand %p1556_p0, %p1550_p9 }
 0x15d   : > { %1560 = shalt.err (!%p1557_p1)
}
 0x15e   : > { %1380 = dma.vmem_to_hbm [thread:$0]  (%p1676_p4), %s1950_s28, 64, %s1948_s6, %s1120_s8  }
 0x15f PF: > { %p1386_p2 = scmp.ge.s32.totalorder %s1611_s17, 2  ;;  %s1148_s27 = sand.u32 1, %s1591_s12  }
 0x160   : > { %s1149_s29 = scalar_lea.sflag [#allocation3], %s1148_s27 }
 0x161   : > { %p1383_p3 = pnand %p1386_p2, %p1683_p8 }
 0x163   : > { %1586 = dma.done.wait (!%p1383_p3), %s1149_s29, 64  }
 0x164   : > { %1588 = vsyncadd (!%p1383_p3), %s1149_s29, 4294967232  ;;  %s16_s17 = sadd.s32 1, %s1611_s17   ;;  %s2003_s12 = smov %s1595_s13 }
 0x165   : > { %p13_p5 = scmp.ge.s32.totalorder %s16_s17, 4   ;;  %s2004_s13 = smov %s1599_s14 }
 0x166   : > { %s2005_s14 = smov %s1689_s25  ;;  %s2006_s15 = smov %s1607_s16 }
 0x167   : > { %s2007_s16 = smov %s2009_s20  ;;  %15 = sbr.rel (!%p13_p5) target bundleno = 4 (0x4), region = 85 }
 0x16e   :  { %1154 = vsyncpa [#allocation3], 1 }
 0x16f   :  { %1156 = vsyncpa [#allocation3 + $0x1], 1 }

</bundles_post_ra>
